<compile_context>
chip_gen: v5e
topology: v5e:2x2
jax: 0.10.0
libtpu: 0.0.40
codegen_flags: <defaults>
</compile_context>

<pallas_src>
import math

import numpy as np

import jax
import jax.numpy as jnp
from jax import lax
from jax.experimental import pallas as pl
from jax.experimental.pallas import tpu as pltpu


# ------------------------------ Pallas kernel -------------------------------

def _minist_cnn_kernel(p1_ref, w1_ref, b1_ref,
                       g2_ref, w2_ref, b2_ref,
                       g3_ref, w3_ref, b3_ref,
                       out_ref):
    """Fused forward: conv1 (VPU) -> conv2 (MXU) -> conv3 (MXU) -> mean.

    p1_ref : (196, 9)        f32   im2col patches of the input (tap order kh,kw)
    w1_ref : (9, 16)         f32   conv1 weights, row = tap, col = out channel
    g*_ref : (9, Pout, Pin)  bf16  0/1 gather matrices (stride-2 conv + padding)
    w*_ref : (9, Cin, Cout)  bf16  per-tap weight slices
    b*_ref : (1, Cout)       f32
    out_ref: (1, 10)         f32
    """
    p1 = p1_ref[...]                                   # (196, 9)
    w1 = w1_ref[...]                                   # (9, 16)
    n_pos, n_taps = p1.shape
    c1 = w1.shape[1]

    # ---- layer 1: Cin=1, K=9 -> 9 broadcast multiply-adds on the VPU ------
    acc1 = jnp.zeros((n_pos, c1), jnp.float32)
    for t in range(n_taps):
        acc1 = acc1 + p1[:, t:t + 1] * w1[t:t + 1, :]
    a1 = jnp.maximum(acc1 + b1_ref[...], 0.0).astype(jnp.bfloat16)   # (196, 16)

    # ---- layers 2-3: per-tap gather-matmul + weight-matmul on the MXU -----
    def conv_relu(act_bf16, g_ref, w_ref, b_ref):
        taps, p_out, _ = g_ref.shape
        c_out = w_ref.shape[2]
        acc = jnp.zeros((p_out, c_out), jnp.float32)
        for t in range(taps):
            gathered = jnp.dot(g_ref[t], act_bf16,
                               preferred_element_type=jnp.float32)    # (Pout, Cin)
            acc = acc + jnp.dot(gathered.astype(jnp.bfloat16), w_ref[t],
                                preferred_element_type=jnp.float32)   # (Pout, Cout)
        return jnp.maximum(acc + b_ref[...], 0.0)

    a2 = conv_relu(a1, g2_ref, w2_ref, b2_ref).astype(jnp.bfloat16)   # (49, 16)
    a3 = conv_relu(a2, g3_ref, w3_ref, b3_ref)                        # (16, 10) f32

    # ---- epilogue: avg_pool2d(., 4) on the 4x4 map + view(1, 10) ----------
    out_ref[...] = jnp.mean(a3, axis=0, keepdims=True)


def _fused_forward_call(p1, w1m, b1, G2, W2, b2, G3, W3, b3):
    return pl.pallas_call(
        _minist_cnn_kernel,
        out_shape=jax.ShapeDtypeStruct((1, 10), jnp.float32),
        grid=(1,),
        in_specs=[
            pl.BlockSpec(p1.shape, lambda i: (0, 0)),
            pl.BlockSpec(w1m.shape, lambda i: (0, 0)),
            pl.BlockSpec(b1.shape, lambda i: (0, 0)),
            pl.BlockSpec(G2.shape, lambda i: (0, 0, 0)),
            pl.BlockSpec(W2.shape, lambda i: (0, 0, 0)),
            pl.BlockSpec(b2.shape, lambda i: (0, 0)),
            pl.BlockSpec(G3.shape, lambda i: (0, 0, 0)),
            pl.BlockSpec(W3.shape, lambda i: (0, 0, 0)),
            pl.BlockSpec(b3.shape, lambda i: (0, 0)),
        ],
        out_specs=pl.BlockSpec((1, 10), lambda i: (0, 0)),
        compiler_params=pltpu.CompilerParams(
            dimension_semantics=("arbitrary",)),
    )(p1, w1m, b1, G2, W2, b2, G3, W3, b3)


# ------------------------- one-time parameter prep --------------------------

def _gather_matrices(h_in, w_in, h_out, w_out, k=3, stride=2, pad=1):
    """G[t, p_out, p_in] = 1 iff tap t of output position p_out reads input p_in.

    Taps landing in the zero padding get an all-zero row, so G encodes the
    stride, the spatial shift and the padding of the conv in one 0/1 operator.
    """
    G = np.zeros((k * k, h_out * w_out, h_in * w_in), dtype=np.float32)
    for kh in range(k):
        for kw in range(k):
            t = kh * k + kw
            for i in range(h_out):
                ii = stride * i + kh - pad
                if not (0 <= ii < h_in):
                    continue
                for j in range(w_out):
                    jj = stride * j + kw - pad
                    if 0 <= jj < w_in:
                        G[t, i * w_out + j, ii * w_in + jj] = 1.0
    return G


def prepare_params(params):
    """Build all kernel operands once: per-tap bf16 weight slices, biases,
    and the geometry-only gather matrices for layers 2-3."""
    (w1, b1), (w2, b2), (w3, b3) = params
    return {
        # conv1: (16,1,3,3) -> (9, 16): row = tap kh*3+kw, col = cout
        "w1": jnp.asarray(w1, jnp.float32).reshape(16, 9).T,
        "b1": jnp.asarray(b1, jnp.float32).reshape(1, -1),
        # conv2/3: OIHW -> (tap, cin, cout), bf16 for the MXU
        "W2": jnp.asarray(w2).transpose(2, 3, 1, 0).reshape(9, 16, 16).astype(jnp.bfloat16),
        "b2": jnp.asarray(b2, jnp.float32).reshape(1, -1),
        "W3": jnp.asarray(w3).transpose(2, 3, 1, 0).reshape(9, 16, 10).astype(jnp.bfloat16),
        "b3": jnp.asarray(b3, jnp.float32).reshape(1, -1),
        # stride-2 / pad-1 gather operators (pure geometry constants, exact in bf16)
        "G2": jnp.asarray(_gather_matrices(14, 14, 7, 7), dtype=jnp.bfloat16),
        "G3": jnp.asarray(_gather_matrices(7, 7, 4, 4), dtype=jnp.bfloat16),
    }


# ------------------------------- JAX glue -----------------------------------

def _im2col_1ch(img, k=3, stride=2, pad=1):
    """(H, W) single-channel image -> (Ho*Wo, k*k) patches, tap order (kh, kw)."""
    H, W = img.shape
    Ho = (H - k + 2 * pad) // stride + 1
    Wo = (W - k + 2 * pad) // stride + 1
    xp = jnp.pad(img, ((pad, pad), (pad, pad)))
    cols = [xp[kh:kh + stride * Ho:stride, kw:kw + stride * Wo:stride].reshape(-1)
            for kh in range(k) for kw in range(k)]
    return jnp.stack(cols, axis=1)                     # (Ho*Wo, 9)


@jax.jit
def minist_cnn_forward(x, prep):
    """x: (N, 784) with N == 1 (the torch module's final view(1, C) requires it)."""
    assert x.shape[0] == 1, "Minist_CNN's final .view(1, C) pins the batch to 1"
    img = x.reshape(1, 28, 28)[0]
    p1 = _im2col_1ch(img)                              # (196, 9), tiny XLA prep
    return _fused_forward_call(p1, prep["w1"], prep["b1"],
                               prep["G2"], prep["W2"], prep["b2"],
                               prep["G3"], prep["W3"], prep["b3"])


def init_params(key):
    """Deterministic PyTorch-style (kaiming-uniform-ish) init. Weights in OIHW."""
    shapes = [(16, 1, 3, 3), (16, 16, 3, 3), (10, 16, 3, 3)]
    params = []
    for s in shapes:
        key, kw, kb = jax.random.split(key, 3)
        fan_in = s[1] * s[2] * s[3]
        bound = 1.0 / math.sqrt(fan_in)
        w = jax.random.uniform(kw, s, jnp.float32, -bound, bound)
        b = jax.random.uniform(kb, (s[0],), jnp.float32, -bound, bound)
        params.append((w, b))
    return params


def reference_forward(x, params):
    """Pure-JAX f32 reference mirroring the PyTorch forward (NCHW)."""
    a = x.reshape(-1, 1, 28, 28)
    for w, b in params:
        a = lax.conv_general_dilated(
            a, w, window_strides=(2, 2), padding=((1, 1), (1, 1)),
            dimension_numbers=("NCHW", "OIHW", "NCHW"))
        a = jnp.maximum(a + b.reshape(1, -1, 1, 1), 0.0)
    a = jnp.mean(a, axis=(2, 3))  # avg_pool2d(., 4) on a 4x4 map -> (N, 10)
    return a.reshape(1, -1)


if __name__ == "__main__":
    key = jax.random.PRNGKey(0)
    key_x, key_p = jax.random.split(key)
    x = jax.random.normal(key_x, (1, 784), dtype=jnp.float32)  # batch 1, 28*28
    params = init_params(key_p)
    prep = prepare_params(params)

    out = jax.block_until_ready(minist_cnn_forward(x, prep))
    ref = jax.block_until_ready(reference_forward(x, params))

    assert out.shape == (1, 10), out.shape
    # bf16 MXU operands (f32 accumulate) -> slightly looser tolerance than f32.
    assert jnp.allclose(out, ref, rtol=2e-2, atol=1e-2), (out, ref)
    print("KERNEL_OK")
</pallas_src>

<mosaic_0001>
module attributes {stable_mosaic.version = 11 : i64} {
  func.func @_minist_cnn_kernel(%arg0: i32, %arg1: memref<196x9xf32, #tpu.memory_space<vmem>>, %arg2: memref<9x16xf32, #tpu.memory_space<vmem>>, %arg3: memref<1x16xf32, #tpu.memory_space<vmem>>, %arg4: memref<9x49x196xbf16, #tpu.memory_space<vmem>>, %arg5: memref<9x16x16xbf16, #tpu.memory_space<vmem>>, %arg6: memref<1x16xf32, #tpu.memory_space<vmem>>, %arg7: memref<9x16x49xbf16, #tpu.memory_space<vmem>>, %arg8: memref<9x16x10xbf16, #tpu.memory_space<vmem>>, %arg9: memref<1x10xf32, #tpu.memory_space<vmem>>, %arg10: memref<1x10xf32, #tpu.memory_space<vmem>>) attributes {dimension_semantics = [#tpu.dimension_semantics<arbitrary>], iteration_bounds = array<i64: 1>, scalar_prefetch = 0 : i64, scratch_operands = 0 : i64, tpu.core_type = #tpu.core_type<tc>, window_params = [{pipeline_mode = #tpu.pipeline_mode<synchronous>, transform_indices = @transform_0, window_bounds = array<i64: 196, 9>}, {pipeline_mode = #tpu.pipeline_mode<synchronous>, transform_indices = @transform_1, window_bounds = array<i64: 9, 16>}, {pipeline_mode = #tpu.pipeline_mode<synchronous>, transform_indices = @transform_2, window_bounds = array<i64: 1, 16>}, {pipeline_mode = #tpu.pipeline_mode<synchronous>, transform_indices = @transform_3, window_bounds = array<i64: 9, 49, 196>}, {pipeline_mode = #tpu.pipeline_mode<synchronous>, transform_indices = @transform_4, window_bounds = array<i64: 9, 16, 16>}, {pipeline_mode = #tpu.pipeline_mode<synchronous>, transform_indices = @transform_5, window_bounds = array<i64: 1, 16>}, {pipeline_mode = #tpu.pipeline_mode<synchronous>, transform_indices = @transform_6, window_bounds = array<i64: 9, 16, 49>}, {pipeline_mode = #tpu.pipeline_mode<synchronous>, transform_indices = @transform_7, window_bounds = array<i64: 9, 16, 10>}, {pipeline_mode = #tpu.pipeline_mode<synchronous>, transform_indices = @transform_8, window_bounds = array<i64: 1, 10>}, {pipeline_mode = #tpu.pipeline_mode<synchronous>, transform_indices = @transform_9, window_bounds = array<i64: 1, 10>}]} {
    %c0 = arith.constant 0 : index
    %c0_0 = arith.constant 0 : index
    %0 = vector.load %arg1[%c0, %c0_0] : memref<196x9xf32, #tpu.memory_space<vmem>>, vector<196x9xf32>
    %c0_1 = arith.constant 0 : index
    %c0_2 = arith.constant 0 : index
    %1 = vector.load %arg2[%c0_1, %c0_2] : memref<9x16xf32, #tpu.memory_space<vmem>>, vector<9x16xf32>
    %cst = arith.constant 0.000000e+00 : f32
    %2 = vector.broadcast %cst : f32 to vector<196x16xf32>
    %3 = vector.extract_strided_slice %0 {offsets = [0, 0], sizes = [196, 1], strides = [1, 1]} : vector<196x9xf32> to vector<196x1xf32>
    %4 = vector.extract_strided_slice %1 {offsets = [0, 0], sizes = [1, 16], strides = [1, 1]} : vector<9x16xf32> to vector<1x16xf32>
    %5 = vector.broadcast %3 : vector<196x1xf32> to vector<196x16xf32>
    %6 = vector.broadcast %4 : vector<1x16xf32> to vector<196x16xf32>
    %7 = arith.mulf %5, %6 : vector<196x16xf32>
    %8 = arith.addf %2, %7 : vector<196x16xf32>
    %9 = vector.extract_strided_slice %0 {offsets = [0, 1], sizes = [196, 1], strides = [1, 1]} : vector<196x9xf32> to vector<196x1xf32>
    %10 = vector.extract_strided_slice %1 {offsets = [1, 0], sizes = [1, 16], strides = [1, 1]} : vector<9x16xf32> to vector<1x16xf32>
    %11 = vector.broadcast %9 : vector<196x1xf32> to vector<196x16xf32>
    %12 = vector.broadcast %10 : vector<1x16xf32> to vector<196x16xf32>
    %13 = arith.mulf %11, %12 : vector<196x16xf32>
    %14 = arith.addf %8, %13 : vector<196x16xf32>
    %15 = vector.extract_strided_slice %0 {offsets = [0, 2], sizes = [196, 1], strides = [1, 1]} : vector<196x9xf32> to vector<196x1xf32>
    %16 = vector.extract_strided_slice %1 {offsets = [2, 0], sizes = [1, 16], strides = [1, 1]} : vector<9x16xf32> to vector<1x16xf32>
    %17 = vector.broadcast %15 : vector<196x1xf32> to vector<196x16xf32>
    %18 = vector.broadcast %16 : vector<1x16xf32> to vector<196x16xf32>
    %19 = arith.mulf %17, %18 : vector<196x16xf32>
    %20 = arith.addf %14, %19 : vector<196x16xf32>
    %21 = vector.extract_strided_slice %0 {offsets = [0, 3], sizes = [196, 1], strides = [1, 1]} : vector<196x9xf32> to vector<196x1xf32>
    %22 = vector.extract_strided_slice %1 {offsets = [3, 0], sizes = [1, 16], strides = [1, 1]} : vector<9x16xf32> to vector<1x16xf32>
    %23 = vector.broadcast %21 : vector<196x1xf32> to vector<196x16xf32>
    %24 = vector.broadcast %22 : vector<1x16xf32> to vector<196x16xf32>
    %25 = arith.mulf %23, %24 : vector<196x16xf32>
    %26 = arith.addf %20, %25 : vector<196x16xf32>
    %27 = vector.extract_strided_slice %0 {offsets = [0, 4], sizes = [196, 1], strides = [1, 1]} : vector<196x9xf32> to vector<196x1xf32>
    %28 = vector.extract_strided_slice %1 {offsets = [4, 0], sizes = [1, 16], strides = [1, 1]} : vector<9x16xf32> to vector<1x16xf32>
    %29 = vector.broadcast %27 : vector<196x1xf32> to vector<196x16xf32>
    %30 = vector.broadcast %28 : vector<1x16xf32> to vector<196x16xf32>
    %31 = arith.mulf %29, %30 : vector<196x16xf32>
    %32 = arith.addf %26, %31 : vector<196x16xf32>
    %33 = vector.extract_strided_slice %0 {offsets = [0, 5], sizes = [196, 1], strides = [1, 1]} : vector<196x9xf32> to vector<196x1xf32>
    %34 = vector.extract_strided_slice %1 {offsets = [5, 0], sizes = [1, 16], strides = [1, 1]} : vector<9x16xf32> to vector<1x16xf32>
    %35 = vector.broadcast %33 : vector<196x1xf32> to vector<196x16xf32>
    %36 = vector.broadcast %34 : vector<1x16xf32> to vector<196x16xf32>
    %37 = arith.mulf %35, %36 : vector<196x16xf32>
    %38 = arith.addf %32, %37 : vector<196x16xf32>
    %39 = vector.extract_strided_slice %0 {offsets = [0, 6], sizes = [196, 1], strides = [1, 1]} : vector<196x9xf32> to vector<196x1xf32>
    %40 = vector.extract_strided_slice %1 {offsets = [6, 0], sizes = [1, 16], strides = [1, 1]} : vector<9x16xf32> to vector<1x16xf32>
    %41 = vector.broadcast %39 : vector<196x1xf32> to vector<196x16xf32>
    %42 = vector.broadcast %40 : vector<1x16xf32> to vector<196x16xf32>
    %43 = arith.mulf %41, %42 : vector<196x16xf32>
    %44 = arith.addf %38, %43 : vector<196x16xf32>
    %45 = vector.extract_strided_slice %0 {offsets = [0, 7], sizes = [196, 1], strides = [1, 1]} : vector<196x9xf32> to vector<196x1xf32>
    %46 = vector.extract_strided_slice %1 {offsets = [7, 0], sizes = [1, 16], strides = [1, 1]} : vector<9x16xf32> to vector<1x16xf32>
    %47 = vector.broadcast %45 : vector<196x1xf32> to vector<196x16xf32>
    %48 = vector.broadcast %46 : vector<1x16xf32> to vector<196x16xf32>
    %49 = arith.mulf %47, %48 : vector<196x16xf32>
    %50 = arith.addf %44, %49 : vector<196x16xf32>
    %51 = vector.extract_strided_slice %0 {offsets = [0, 8], sizes = [196, 1], strides = [1, 1]} : vector<196x9xf32> to vector<196x1xf32>
    %52 = vector.extract_strided_slice %1 {offsets = [8, 0], sizes = [1, 16], strides = [1, 1]} : vector<9x16xf32> to vector<1x16xf32>
    %53 = vector.broadcast %51 : vector<196x1xf32> to vector<196x16xf32>
    %54 = vector.broadcast %52 : vector<1x16xf32> to vector<196x16xf32>
    %55 = arith.mulf %53, %54 : vector<196x16xf32>
    %56 = arith.addf %50, %55 : vector<196x16xf32>
    %c0_3 = arith.constant 0 : index
    %c0_4 = arith.constant 0 : index
    %57 = vector.load %arg3[%c0_3, %c0_4] : memref<1x16xf32, #tpu.memory_space<vmem>>, vector<1x16xf32>
    %58 = vector.broadcast %57 : vector<1x16xf32> to vector<196x16xf32>
    %59 = arith.addf %56, %58 : vector<196x16xf32>
    %cst_5 = arith.constant 0.000000e+00 : f32
    %60 = vector.broadcast %cst_5 : f32 to vector<196x16xf32>
    %61 = arith.maximumf %59, %60 : vector<196x16xf32>
    %62 = arith.truncf %61 : vector<196x16xf32> to vector<196x16xbf16>
    %cst_6 = arith.constant 0.000000e+00 : f32
    %63 = vector.broadcast %cst_6 : f32 to vector<49x16xf32>
    %c0_7 = arith.constant 0 : index
    %c0_8 = arith.constant 0 : index
    %c0_9 = arith.constant 0 : index
    %64 = vector.load %arg4[%c0_7, %c0_8, %c0_9] : memref<9x49x196xbf16, #tpu.memory_space<vmem>>, vector<1x49x196xbf16>
    %65 = vector.shape_cast %64 : vector<1x49x196xbf16> to vector<49x196xbf16>
    %cst_10 = arith.constant dense<0.000000e+00> : vector<49x16xf32>
    %66 = tpu.matmul %65, %62, %cst_10 {dimension_numbers = #tpu.dot_dimension_numbers<[1], [0], [0], [1], [0, 0, 1, 1], [], []>} : vector<49x196xbf16>, vector<196x16xbf16>, vector<49x16xf32> -> vector<49x16xf32>
    %67 = arith.truncf %66 : vector<49x16xf32> to vector<49x16xbf16>
    %c0_11 = arith.constant 0 : index
    %c0_12 = arith.constant 0 : index
    %c0_13 = arith.constant 0 : index
    %68 = vector.load %arg5[%c0_11, %c0_12, %c0_13] : memref<9x16x16xbf16, #tpu.memory_space<vmem>>, vector<1x16x16xbf16>
    %69 = vector.shape_cast %68 : vector<1x16x16xbf16> to vector<16x16xbf16>
    %cst_14 = arith.constant dense<0.000000e+00> : vector<49x16xf32>
    %70 = tpu.matmul %67, %69, %cst_14 {dimension_numbers = #tpu.dot_dimension_numbers<[1], [0], [0], [1], [0, 0, 1, 1], [], []>} : vector<49x16xbf16>, vector<16x16xbf16>, vector<49x16xf32> -> vector<49x16xf32>
    %71 = arith.addf %63, %70 : vector<49x16xf32>
    %c1 = arith.constant 1 : index
    %c0_15 = arith.constant 0 : index
    %c0_16 = arith.constant 0 : index
    %72 = vector.load %arg4[%c1, %c0_15, %c0_16] : memref<9x49x196xbf16, #tpu.memory_space<vmem>>, vector<1x49x196xbf16>
    %73 = vector.shape_cast %72 : vector<1x49x196xbf16> to vector<49x196xbf16>
    %cst_17 = arith.constant dense<0.000000e+00> : vector<49x16xf32>
    %74 = tpu.matmul %73, %62, %cst_17 {dimension_numbers = #tpu.dot_dimension_numbers<[1], [0], [0], [1], [0, 0, 1, 1], [], []>} : vector<49x196xbf16>, vector<196x16xbf16>, vector<49x16xf32> -> vector<49x16xf32>
    %75 = arith.truncf %74 : vector<49x16xf32> to vector<49x16xbf16>
    %c1_18 = arith.constant 1 : index
    %c0_19 = arith.constant 0 : index
    %c0_20 = arith.constant 0 : index
    %76 = vector.load %arg5[%c1_18, %c0_19, %c0_20] : memref<9x16x16xbf16, #tpu.memory_space<vmem>>, vector<1x16x16xbf16>
    %77 = vector.shape_cast %76 : vector<1x16x16xbf16> to vector<16x16xbf16>
    %cst_21 = arith.constant dense<0.000000e+00> : vector<49x16xf32>
    %78 = tpu.matmul %75, %77, %cst_21 {dimension_numbers = #tpu.dot_dimension_numbers<[1], [0], [0], [1], [0, 0, 1, 1], [], []>} : vector<49x16xbf16>, vector<16x16xbf16>, vector<49x16xf32> -> vector<49x16xf32>
    %79 = arith.addf %71, %78 : vector<49x16xf32>
    %c2 = arith.constant 2 : index
    %c0_22 = arith.constant 0 : index
    %c0_23 = arith.constant 0 : index
    %80 = vector.load %arg4[%c2, %c0_22, %c0_23] : memref<9x49x196xbf16, #tpu.memory_space<vmem>>, vector<1x49x196xbf16>
    %81 = vector.shape_cast %80 : vector<1x49x196xbf16> to vector<49x196xbf16>
    %cst_24 = arith.constant dense<0.000000e+00> : vector<49x16xf32>
    %82 = tpu.matmul %81, %62, %cst_24 {dimension_numbers = #tpu.dot_dimension_numbers<[1], [0], [0], [1], [0, 0, 1, 1], [], []>} : vector<49x196xbf16>, vector<196x16xbf16>, vector<49x16xf32> -> vector<49x16xf32>
    %83 = arith.truncf %82 : vector<49x16xf32> to vector<49x16xbf16>
    %c2_25 = arith.constant 2 : index
    %c0_26 = arith.constant 0 : index
    %c0_27 = arith.constant 0 : index
    %84 = vector.load %arg5[%c2_25, %c0_26, %c0_27] : memref<9x16x16xbf16, #tpu.memory_space<vmem>>, vector<1x16x16xbf16>
    %85 = vector.shape_cast %84 : vector<1x16x16xbf16> to vector<16x16xbf16>
    %cst_28 = arith.constant dense<0.000000e+00> : vector<49x16xf32>
    %86 = tpu.matmul %83, %85, %cst_28 {dimension_numbers = #tpu.dot_dimension_numbers<[1], [0], [0], [1], [0, 0, 1, 1], [], []>} : vector<49x16xbf16>, vector<16x16xbf16>, vector<49x16xf32> -> vector<49x16xf32>
    %87 = arith.addf %79, %86 : vector<49x16xf32>
    %c3 = arith.constant 3 : index
    %c0_29 = arith.constant 0 : index
    %c0_30 = arith.constant 0 : index
    %88 = vector.load %arg4[%c3, %c0_29, %c0_30] : memref<9x49x196xbf16, #tpu.memory_space<vmem>>, vector<1x49x196xbf16>
    %89 = vector.shape_cast %88 : vector<1x49x196xbf16> to vector<49x196xbf16>
    %cst_31 = arith.constant dense<0.000000e+00> : vector<49x16xf32>
    %90 = tpu.matmul %89, %62, %cst_31 {dimension_numbers = #tpu.dot_dimension_numbers<[1], [0], [0], [1], [0, 0, 1, 1], [], []>} : vector<49x196xbf16>, vector<196x16xbf16>, vector<49x16xf32> -> vector<49x16xf32>
    %91 = arith.truncf %90 : vector<49x16xf32> to vector<49x16xbf16>
    %c3_32 = arith.constant 3 : index
    %c0_33 = arith.constant 0 : index
    %c0_34 = arith.constant 0 : index
    %92 = vector.load %arg5[%c3_32, %c0_33, %c0_34] : memref<9x16x16xbf16, #tpu.memory_space<vmem>>, vector<1x16x16xbf16>
    %93 = vector.shape_cast %92 : vector<1x16x16xbf16> to vector<16x16xbf16>
    %cst_35 = arith.constant dense<0.000000e+00> : vector<49x16xf32>
    %94 = tpu.matmul %91, %93, %cst_35 {dimension_numbers = #tpu.dot_dimension_numbers<[1], [0], [0], [1], [0, 0, 1, 1], [], []>} : vector<49x16xbf16>, vector<16x16xbf16>, vector<49x16xf32> -> vector<49x16xf32>
    %95 = arith.addf %87, %94 : vector<49x16xf32>
    %c4 = arith.constant 4 : index
    %c0_36 = arith.constant 0 : index
    %c0_37 = arith.constant 0 : index
    %96 = vector.load %arg4[%c4, %c0_36, %c0_37] : memref<9x49x196xbf16, #tpu.memory_space<vmem>>, vector<1x49x196xbf16>
    %97 = vector.shape_cast %96 : vector<1x49x196xbf16> to vector<49x196xbf16>
    %cst_38 = arith.constant dense<0.000000e+00> : vector<49x16xf32>
    %98 = tpu.matmul %97, %62, %cst_38 {dimension_numbers = #tpu.dot_dimension_numbers<[1], [0], [0], [1], [0, 0, 1, 1], [], []>} : vector<49x196xbf16>, vector<196x16xbf16>, vector<49x16xf32> -> vector<49x16xf32>
    %99 = arith.truncf %98 : vector<49x16xf32> to vector<49x16xbf16>
    %c4_39 = arith.constant 4 : index
    %c0_40 = arith.constant 0 : index
    %c0_41 = arith.constant 0 : index
    %100 = vector.load %arg5[%c4_39, %c0_40, %c0_41] : memref<9x16x16xbf16, #tpu.memory_space<vmem>>, vector<1x16x16xbf16>
    %101 = vector.shape_cast %100 : vector<1x16x16xbf16> to vector<16x16xbf16>
    %cst_42 = arith.constant dense<0.000000e+00> : vector<49x16xf32>
    %102 = tpu.matmul %99, %101, %cst_42 {dimension_numbers = #tpu.dot_dimension_numbers<[1], [0], [0], [1], [0, 0, 1, 1], [], []>} : vector<49x16xbf16>, vector<16x16xbf16>, vector<49x16xf32> -> vector<49x16xf32>
    %103 = arith.addf %95, %102 : vector<49x16xf32>
    %c5 = arith.constant 5 : index
    %c0_43 = arith.constant 0 : index
    %c0_44 = arith.constant 0 : index
    %104 = vector.load %arg4[%c5, %c0_43, %c0_44] : memref<9x49x196xbf16, #tpu.memory_space<vmem>>, vector<1x49x196xbf16>
    %105 = vector.shape_cast %104 : vector<1x49x196xbf16> to vector<49x196xbf16>
    %cst_45 = arith.constant dense<0.000000e+00> : vector<49x16xf32>
    %106 = tpu.matmul %105, %62, %cst_45 {dimension_numbers = #tpu.dot_dimension_numbers<[1], [0], [0], [1], [0, 0, 1, 1], [], []>} : vector<49x196xbf16>, vector<196x16xbf16>, vector<49x16xf32> -> vector<49x16xf32>
    %107 = arith.truncf %106 : vector<49x16xf32> to vector<49x16xbf16>
    %c5_46 = arith.constant 5 : index
    %c0_47 = arith.constant 0 : index
    %c0_48 = arith.constant 0 : index
    %108 = vector.load %arg5[%c5_46, %c0_47, %c0_48] : memref<9x16x16xbf16, #tpu.memory_space<vmem>>, vector<1x16x16xbf16>
    %109 = vector.shape_cast %108 : vector<1x16x16xbf16> to vector<16x16xbf16>
    %cst_49 = arith.constant dense<0.000000e+00> : vector<49x16xf32>
    %110 = tpu.matmul %107, %109, %cst_49 {dimension_numbers = #tpu.dot_dimension_numbers<[1], [0], [0], [1], [0, 0, 1, 1], [], []>} : vector<49x16xbf16>, vector<16x16xbf16>, vector<49x16xf32> -> vector<49x16xf32>
    %111 = arith.addf %103, %110 : vector<49x16xf32>
    %c6 = arith.constant 6 : index
    %c0_50 = arith.constant 0 : index
    %c0_51 = arith.constant 0 : index
    %112 = vector.load %arg4[%c6, %c0_50, %c0_51] : memref<9x49x196xbf16, #tpu.memory_space<vmem>>, vector<1x49x196xbf16>
    %113 = vector.shape_cast %112 : vector<1x49x196xbf16> to vector<49x196xbf16>
    %cst_52 = arith.constant dense<0.000000e+00> : vector<49x16xf32>
    %114 = tpu.matmul %113, %62, %cst_52 {dimension_numbers = #tpu.dot_dimension_numbers<[1], [0], [0], [1], [0, 0, 1, 1], [], []>} : vector<49x196xbf16>, vector<196x16xbf16>, vector<49x16xf32> -> vector<49x16xf32>
    %115 = arith.truncf %114 : vector<49x16xf32> to vector<49x16xbf16>
    %c6_53 = arith.constant 6 : index
    %c0_54 = arith.constant 0 : index
    %c0_55 = arith.constant 0 : index
    %116 = vector.load %arg5[%c6_53, %c0_54, %c0_55] : memref<9x16x16xbf16, #tpu.memory_space<vmem>>, vector<1x16x16xbf16>
    %117 = vector.shape_cast %116 : vector<1x16x16xbf16> to vector<16x16xbf16>
    %cst_56 = arith.constant dense<0.000000e+00> : vector<49x16xf32>
    %118 = tpu.matmul %115, %117, %cst_56 {dimension_numbers = #tpu.dot_dimension_numbers<[1], [0], [0], [1], [0, 0, 1, 1], [], []>} : vector<49x16xbf16>, vector<16x16xbf16>, vector<49x16xf32> -> vector<49x16xf32>
    %119 = arith.addf %111, %118 : vector<49x16xf32>
    %c7 = arith.constant 7 : index
    %c0_57 = arith.constant 0 : index
    %c0_58 = arith.constant 0 : index
    %120 = vector.load %arg4[%c7, %c0_57, %c0_58] : memref<9x49x196xbf16, #tpu.memory_space<vmem>>, vector<1x49x196xbf16>
    %121 = vector.shape_cast %120 : vector<1x49x196xbf16> to vector<49x196xbf16>
    %cst_59 = arith.constant dense<0.000000e+00> : vector<49x16xf32>
    %122 = tpu.matmul %121, %62, %cst_59 {dimension_numbers = #tpu.dot_dimension_numbers<[1], [0], [0], [1], [0, 0, 1, 1], [], []>} : vector<49x196xbf16>, vector<196x16xbf16>, vector<49x16xf32> -> vector<49x16xf32>
    %123 = arith.truncf %122 : vector<49x16xf32> to vector<49x16xbf16>
    %c7_60 = arith.constant 7 : index
    %c0_61 = arith.constant 0 : index
    %c0_62 = arith.constant 0 : index
    %124 = vector.load %arg5[%c7_60, %c0_61, %c0_62] : memref<9x16x16xbf16, #tpu.memory_space<vmem>>, vector<1x16x16xbf16>
    %125 = vector.shape_cast %124 : vector<1x16x16xbf16> to vector<16x16xbf16>
    %cst_63 = arith.constant dense<0.000000e+00> : vector<49x16xf32>
    %126 = tpu.matmul %123, %125, %cst_63 {dimension_numbers = #tpu.dot_dimension_numbers<[1], [0], [0], [1], [0, 0, 1, 1], [], []>} : vector<49x16xbf16>, vector<16x16xbf16>, vector<49x16xf32> -> vector<49x16xf32>
    %127 = arith.addf %119, %126 : vector<49x16xf32>
    %c8 = arith.constant 8 : index
    %c0_64 = arith.constant 0 : index
    %c0_65 = arith.constant 0 : index
    %128 = vector.load %arg4[%c8, %c0_64, %c0_65] : memref<9x49x196xbf16, #tpu.memory_space<vmem>>, vector<1x49x196xbf16>
    %129 = vector.shape_cast %128 : vector<1x49x196xbf16> to vector<49x196xbf16>
    %cst_66 = arith.constant dense<0.000000e+00> : vector<49x16xf32>
    %130 = tpu.matmul %129, %62, %cst_66 {dimension_numbers = #tpu.dot_dimension_numbers<[1], [0], [0], [1], [0, 0, 1, 1], [], []>} : vector<49x196xbf16>, vector<196x16xbf16>, vector<49x16xf32> -> vector<49x16xf32>
    %131 = arith.truncf %130 : vector<49x16xf32> to vector<49x16xbf16>
    %c8_67 = arith.constant 8 : index
    %c0_68 = arith.constant 0 : index
    %c0_69 = arith.constant 0 : index
    %132 = vector.load %arg5[%c8_67, %c0_68, %c0_69] : memref<9x16x16xbf16, #tpu.memory_space<vmem>>, vector<1x16x16xbf16>
    %133 = vector.shape_cast %132 : vector<1x16x16xbf16> to vector<16x16xbf16>
    %cst_70 = arith.constant dense<0.000000e+00> : vector<49x16xf32>
    %134 = tpu.matmul %131, %133, %cst_70 {dimension_numbers = #tpu.dot_dimension_numbers<[1], [0], [0], [1], [0, 0, 1, 1], [], []>} : vector<49x16xbf16>, vector<16x16xbf16>, vector<49x16xf32> -> vector<49x16xf32>
    %135 = arith.addf %127, %134 : vector<49x16xf32>
    %c0_71 = arith.constant 0 : index
    %c0_72 = arith.constant 0 : index
    %136 = vector.load %arg6[%c0_71, %c0_72] : memref<1x16xf32, #tpu.memory_space<vmem>>, vector<1x16xf32>
    %137 = vector.broadcast %136 : vector<1x16xf32> to vector<49x16xf32>
    %138 = arith.addf %135, %137 : vector<49x16xf32>
    %cst_73 = arith.constant 0.000000e+00 : f32
    %139 = vector.broadcast %cst_73 : f32 to vector<49x16xf32>
    %140 = arith.maximumf %138, %139 : vector<49x16xf32>
    %141 = arith.truncf %140 : vector<49x16xf32> to vector<49x16xbf16>
    %cst_74 = arith.constant 0.000000e+00 : f32
    %142 = vector.broadcast %cst_74 : f32 to vector<16x10xf32>
    %c0_75 = arith.constant 0 : index
    %c0_76 = arith.constant 0 : index
    %c0_77 = arith.constant 0 : index
    %143 = vector.load %arg7[%c0_75, %c0_76, %c0_77] : memref<9x16x49xbf16, #tpu.memory_space<vmem>>, vector<1x16x49xbf16>
    %144 = vector.shape_cast %143 : vector<1x16x49xbf16> to vector<16x49xbf16>
    %cst_78 = arith.constant dense<0.000000e+00> : vector<16x16xf32>
    %145 = tpu.matmul %144, %141, %cst_78 {dimension_numbers = #tpu.dot_dimension_numbers<[1], [0], [0], [1], [0, 0, 1, 1], [], []>} : vector<16x49xbf16>, vector<49x16xbf16>, vector<16x16xf32> -> vector<16x16xf32>
    %146 = arith.truncf %145 : vector<16x16xf32> to vector<16x16xbf16>
    %c0_79 = arith.constant 0 : index
    %c0_80 = arith.constant 0 : index
    %c0_81 = arith.constant 0 : index
    %147 = vector.load %arg8[%c0_79, %c0_80, %c0_81] : memref<9x16x10xbf16, #tpu.memory_space<vmem>>, vector<1x16x10xbf16>
    %148 = vector.shape_cast %147 : vector<1x16x10xbf16> to vector<16x10xbf16>
    %cst_82 = arith.constant dense<0.000000e+00> : vector<16x10xf32>
    %149 = tpu.matmul %146, %148, %cst_82 {dimension_numbers = #tpu.dot_dimension_numbers<[1], [0], [0], [1], [0, 0, 1, 1], [], []>} : vector<16x16xbf16>, vector<16x10xbf16>, vector<16x10xf32> -> vector<16x10xf32>
    %150 = arith.addf %142, %149 : vector<16x10xf32>
    %c1_83 = arith.constant 1 : index
    %c0_84 = arith.constant 0 : index
    %c0_85 = arith.constant 0 : index
    %151 = vector.load %arg7[%c1_83, %c0_84, %c0_85] : memref<9x16x49xbf16, #tpu.memory_space<vmem>>, vector<1x16x49xbf16>
    %152 = vector.shape_cast %151 : vector<1x16x49xbf16> to vector<16x49xbf16>
    %cst_86 = arith.constant dense<0.000000e+00> : vector<16x16xf32>
    %153 = tpu.matmul %152, %141, %cst_86 {dimension_numbers = #tpu.dot_dimension_numbers<[1], [0], [0], [1], [0, 0, 1, 1], [], []>} : vector<16x49xbf16>, vector<49x16xbf16>, vector<16x16xf32> -> vector<16x16xf32>
    %154 = arith.truncf %153 : vector<16x16xf32> to vector<16x16xbf16>
    %c1_87 = arith.constant 1 : index
    %c0_88 = arith.constant 0 : index
    %c0_89 = arith.constant 0 : index
    %155 = vector.load %arg8[%c1_87, %c0_88, %c0_89] : memref<9x16x10xbf16, #tpu.memory_space<vmem>>, vector<1x16x10xbf16>
    %156 = vector.shape_cast %155 : vector<1x16x10xbf16> to vector<16x10xbf16>
    %cst_90 = arith.constant dense<0.000000e+00> : vector<16x10xf32>
    %157 = tpu.matmul %154, %156, %cst_90 {dimension_numbers = #tpu.dot_dimension_numbers<[1], [0], [0], [1], [0, 0, 1, 1], [], []>} : vector<16x16xbf16>, vector<16x10xbf16>, vector<16x10xf32> -> vector<16x10xf32>
    %158 = arith.addf %150, %157 : vector<16x10xf32>
    %c2_91 = arith.constant 2 : index
    %c0_92 = arith.constant 0 : index
    %c0_93 = arith.constant 0 : index
    %159 = vector.load %arg7[%c2_91, %c0_92, %c0_93] : memref<9x16x49xbf16, #tpu.memory_space<vmem>>, vector<1x16x49xbf16>
    %160 = vector.shape_cast %159 : vector<1x16x49xbf16> to vector<16x49xbf16>
    %cst_94 = arith.constant dense<0.000000e+00> : vector<16x16xf32>
    %161 = tpu.matmul %160, %141, %cst_94 {dimension_numbers = #tpu.dot_dimension_numbers<[1], [0], [0], [1], [0, 0, 1, 1], [], []>} : vector<16x49xbf16>, vector<49x16xbf16>, vector<16x16xf32> -> vector<16x16xf32>
    %162 = arith.truncf %161 : vector<16x16xf32> to vector<16x16xbf16>
    %c2_95 = arith.constant 2 : index
    %c0_96 = arith.constant 0 : index
    %c0_97 = arith.constant 0 : index
    %163 = vector.load %arg8[%c2_95, %c0_96, %c0_97] : memref<9x16x10xbf16, #tpu.memory_space<vmem>>, vector<1x16x10xbf16>
    %164 = vector.shape_cast %163 : vector<1x16x10xbf16> to vector<16x10xbf16>
    %cst_98 = arith.constant dense<0.000000e+00> : vector<16x10xf32>
    %165 = tpu.matmul %162, %164, %cst_98 {dimension_numbers = #tpu.dot_dimension_numbers<[1], [0], [0], [1], [0, 0, 1, 1], [], []>} : vector<16x16xbf16>, vector<16x10xbf16>, vector<16x10xf32> -> vector<16x10xf32>
    %166 = arith.addf %158, %165 : vector<16x10xf32>
    %c3_99 = arith.constant 3 : index
    %c0_100 = arith.constant 0 : index
    %c0_101 = arith.constant 0 : index
    %167 = vector.load %arg7[%c3_99, %c0_100, %c0_101] : memref<9x16x49xbf16, #tpu.memory_space<vmem>>, vector<1x16x49xbf16>
    %168 = vector.shape_cast %167 : vector<1x16x49xbf16> to vector<16x49xbf16>
    %cst_102 = arith.constant dense<0.000000e+00> : vector<16x16xf32>
    %169 = tpu.matmul %168, %141, %cst_102 {dimension_numbers = #tpu.dot_dimension_numbers<[1], [0], [0], [1], [0, 0, 1, 1], [], []>} : vector<16x49xbf16>, vector<49x16xbf16>, vector<16x16xf32> -> vector<16x16xf32>
    %170 = arith.truncf %169 : vector<16x16xf32> to vector<16x16xbf16>
    %c3_103 = arith.constant 3 : index
    %c0_104 = arith.constant 0 : index
    %c0_105 = arith.constant 0 : index
    %171 = vector.load %arg8[%c3_103, %c0_104, %c0_105] : memref<9x16x10xbf16, #tpu.memory_space<vmem>>, vector<1x16x10xbf16>
    %172 = vector.shape_cast %171 : vector<1x16x10xbf16> to vector<16x10xbf16>
    %cst_106 = arith.constant dense<0.000000e+00> : vector<16x10xf32>
    %173 = tpu.matmul %170, %172, %cst_106 {dimension_numbers = #tpu.dot_dimension_numbers<[1], [0], [0], [1], [0, 0, 1, 1], [], []>} : vector<16x16xbf16>, vector<16x10xbf16>, vector<16x10xf32> -> vector<16x10xf32>
    %174 = arith.addf %166, %173 : vector<16x10xf32>
    %c4_107 = arith.constant 4 : index
    %c0_108 = arith.constant 0 : index
    %c0_109 = arith.constant 0 : index
    %175 = vector.load %arg7[%c4_107, %c0_108, %c0_109] : memref<9x16x49xbf16, #tpu.memory_space<vmem>>, vector<1x16x49xbf16>
    %176 = vector.shape_cast %175 : vector<1x16x49xbf16> to vector<16x49xbf16>
    %cst_110 = arith.constant dense<0.000000e+00> : vector<16x16xf32>
    %177 = tpu.matmul %176, %141, %cst_110 {dimension_numbers = #tpu.dot_dimension_numbers<[1], [0], [0], [1], [0, 0, 1, 1], [], []>} : vector<16x49xbf16>, vector<49x16xbf16>, vector<16x16xf32> -> vector<16x16xf32>
    %178 = arith.truncf %177 : vector<16x16xf32> to vector<16x16xbf16>
    %c4_111 = arith.constant 4 : index
    %c0_112 = arith.constant 0 : index
    %c0_113 = arith.constant 0 : index
    %179 = vector.load %arg8[%c4_111, %c0_112, %c0_113] : memref<9x16x10xbf16, #tpu.memory_space<vmem>>, vector<1x16x10xbf16>
    %180 = vector.shape_cast %179 : vector<1x16x10xbf16> to vector<16x10xbf16>
    %cst_114 = arith.constant dense<0.000000e+00> : vector<16x10xf32>
    %181 = tpu.matmul %178, %180, %cst_114 {dimension_numbers = #tpu.dot_dimension_numbers<[1], [0], [0], [1], [0, 0, 1, 1], [], []>} : vector<16x16xbf16>, vector<16x10xbf16>, vector<16x10xf32> -> vector<16x10xf32>
    %182 = arith.addf %174, %181 : vector<16x10xf32>
    %c5_115 = arith.constant 5 : index
    %c0_116 = arith.constant 0 : index
    %c0_117 = arith.constant 0 : index
    %183 = vector.load %arg7[%c5_115, %c0_116, %c0_117] : memref<9x16x49xbf16, #tpu.memory_space<vmem>>, vector<1x16x49xbf16>
    %184 = vector.shape_cast %183 : vector<1x16x49xbf16> to vector<16x49xbf16>
    %cst_118 = arith.constant dense<0.000000e+00> : vector<16x16xf32>
    %185 = tpu.matmul %184, %141, %cst_118 {dimension_numbers = #tpu.dot_dimension_numbers<[1], [0], [0], [1], [0, 0, 1, 1], [], []>} : vector<16x49xbf16>, vector<49x16xbf16>, vector<16x16xf32> -> vector<16x16xf32>
    %186 = arith.truncf %185 : vector<16x16xf32> to vector<16x16xbf16>
    %c5_119 = arith.constant 5 : index
    %c0_120 = arith.constant 0 : index
    %c0_121 = arith.constant 0 : index
    %187 = vector.load %arg8[%c5_119, %c0_120, %c0_121] : memref<9x16x10xbf16, #tpu.memory_space<vmem>>, vector<1x16x10xbf16>
    %188 = vector.shape_cast %187 : vector<1x16x10xbf16> to vector<16x10xbf16>
    %cst_122 = arith.constant dense<0.000000e+00> : vector<16x10xf32>
    %189 = tpu.matmul %186, %188, %cst_122 {dimension_numbers = #tpu.dot_dimension_numbers<[1], [0], [0], [1], [0, 0, 1, 1], [], []>} : vector<16x16xbf16>, vector<16x10xbf16>, vector<16x10xf32> -> vector<16x10xf32>
    %190 = arith.addf %182, %189 : vector<16x10xf32>
    %c6_123 = arith.constant 6 : index
    %c0_124 = arith.constant 0 : index
    %c0_125 = arith.constant 0 : index
    %191 = vector.load %arg7[%c6_123, %c0_124, %c0_125] : memref<9x16x49xbf16, #tpu.memory_space<vmem>>, vector<1x16x49xbf16>
    %192 = vector.shape_cast %191 : vector<1x16x49xbf16> to vector<16x49xbf16>
    %cst_126 = arith.constant dense<0.000000e+00> : vector<16x16xf32>
    %193 = tpu.matmul %192, %141, %cst_126 {dimension_numbers = #tpu.dot_dimension_numbers<[1], [0], [0], [1], [0, 0, 1, 1], [], []>} : vector<16x49xbf16>, vector<49x16xbf16>, vector<16x16xf32> -> vector<16x16xf32>
    %194 = arith.truncf %193 : vector<16x16xf32> to vector<16x16xbf16>
    %c6_127 = arith.constant 6 : index
    %c0_128 = arith.constant 0 : index
    %c0_129 = arith.constant 0 : index
    %195 = vector.load %arg8[%c6_127, %c0_128, %c0_129] : memref<9x16x10xbf16, #tpu.memory_space<vmem>>, vector<1x16x10xbf16>
    %196 = vector.shape_cast %195 : vector<1x16x10xbf16> to vector<16x10xbf16>
    %cst_130 = arith.constant dense<0.000000e+00> : vector<16x10xf32>
    %197 = tpu.matmul %194, %196, %cst_130 {dimension_numbers = #tpu.dot_dimension_numbers<[1], [0], [0], [1], [0, 0, 1, 1], [], []>} : vector<16x16xbf16>, vector<16x10xbf16>, vector<16x10xf32> -> vector<16x10xf32>
    %198 = arith.addf %190, %197 : vector<16x10xf32>
    %c7_131 = arith.constant 7 : index
    %c0_132 = arith.constant 0 : index
    %c0_133 = arith.constant 0 : index
    %199 = vector.load %arg7[%c7_131, %c0_132, %c0_133] : memref<9x16x49xbf16, #tpu.memory_space<vmem>>, vector<1x16x49xbf16>
    %200 = vector.shape_cast %199 : vector<1x16x49xbf16> to vector<16x49xbf16>
    %cst_134 = arith.constant dense<0.000000e+00> : vector<16x16xf32>
    %201 = tpu.matmul %200, %141, %cst_134 {dimension_numbers = #tpu.dot_dimension_numbers<[1], [0], [0], [1], [0, 0, 1, 1], [], []>} : vector<16x49xbf16>, vector<49x16xbf16>, vector<16x16xf32> -> vector<16x16xf32>
    %202 = arith.truncf %201 : vector<16x16xf32> to vector<16x16xbf16>
    %c7_135 = arith.constant 7 : index
    %c0_136 = arith.constant 0 : index
    %c0_137 = arith.constant 0 : index
    %203 = vector.load %arg8[%c7_135, %c0_136, %c0_137] : memref<9x16x10xbf16, #tpu.memory_space<vmem>>, vector<1x16x10xbf16>
    %204 = vector.shape_cast %203 : vector<1x16x10xbf16> to vector<16x10xbf16>
    %cst_138 = arith.constant dense<0.000000e+00> : vector<16x10xf32>
    %205 = tpu.matmul %202, %204, %cst_138 {dimension_numbers = #tpu.dot_dimension_numbers<[1], [0], [0], [1], [0, 0, 1, 1], [], []>} : vector<16x16xbf16>, vector<16x10xbf16>, vector<16x10xf32> -> vector<16x10xf32>
    %206 = arith.addf %198, %205 : vector<16x10xf32>
    %c8_139 = arith.constant 8 : index
    %c0_140 = arith.constant 0 : index
    %c0_141 = arith.constant 0 : index
    %207 = vector.load %arg7[%c8_139, %c0_140, %c0_141] : memref<9x16x49xbf16, #tpu.memory_space<vmem>>, vector<1x16x49xbf16>
    %208 = vector.shape_cast %207 : vector<1x16x49xbf16> to vector<16x49xbf16>
    %cst_142 = arith.constant dense<0.000000e+00> : vector<16x16xf32>
    %209 = tpu.matmul %208, %141, %cst_142 {dimension_numbers = #tpu.dot_dimension_numbers<[1], [0], [0], [1], [0, 0, 1, 1], [], []>} : vector<16x49xbf16>, vector<49x16xbf16>, vector<16x16xf32> -> vector<16x16xf32>
    %210 = arith.truncf %209 : vector<16x16xf32> to vector<16x16xbf16>
    %c8_143 = arith.constant 8 : index
    %c0_144 = arith.constant 0 : index
    %c0_145 = arith.constant 0 : index
    %211 = vector.load %arg8[%c8_143, %c0_144, %c0_145] : memref<9x16x10xbf16, #tpu.memory_space<vmem>>, vector<1x16x10xbf16>
    %212 = vector.shape_cast %211 : vector<1x16x10xbf16> to vector<16x10xbf16>
    %cst_146 = arith.constant dense<0.000000e+00> : vector<16x10xf32>
    %213 = tpu.matmul %210, %212, %cst_146 {dimension_numbers = #tpu.dot_dimension_numbers<[1], [0], [0], [1], [0, 0, 1, 1], [], []>} : vector<16x16xbf16>, vector<16x10xbf16>, vector<16x10xf32> -> vector<16x10xf32>
    %214 = arith.addf %206, %213 : vector<16x10xf32>
    %c0_147 = arith.constant 0 : index
    %c0_148 = arith.constant 0 : index
    %215 = vector.load %arg9[%c0_147, %c0_148] : memref<1x10xf32, #tpu.memory_space<vmem>>, vector<1x10xf32>
    %216 = vector.broadcast %215 : vector<1x10xf32> to vector<16x10xf32>
    %217 = arith.addf %214, %216 : vector<16x10xf32>
    %cst_149 = arith.constant 0.000000e+00 : f32
    %218 = vector.broadcast %cst_149 : f32 to vector<16x10xf32>
    %219 = arith.maximumf %217, %218 : vector<16x10xf32>
    %cst_150 = arith.constant dense<0.000000e+00> : vector<10xf32>
    %220 = vector.multi_reduction <add>, %219, %cst_150 [0] : vector<16x10xf32> to vector<10xf32>
    %221 = vector.shape_cast %220 : vector<10xf32> to vector<1x10xf32>
    %cst_151 = arith.constant 1.600000e+01 : f32
    %222 = vector.broadcast %cst_151 : f32 to vector<1x10xf32>
    %223 = arith.divf %221, %222 : vector<1x10xf32>
    %c0_152 = arith.constant 0 : index
    %c0_153 = arith.constant 0 : index
    %224 = vector.load %arg10[%c0_152, %c0_153] : memref<1x10xf32, #tpu.memory_space<vmem>>, vector<1x10xf32>
    tpu.vector_store %arg10[%c0_152, %c0_153], %223 {strides = array<i32>} : memref<1x10xf32, #tpu.memory_space<vmem>>, vector<1x10xf32>,
    return
  }
  func.func @transform_0(%arg0: i32) -> (i32, i32) {
    %c0_i32 = arith.constant 0 : i32
    %c0_i32_0 = arith.constant 0 : i32
    %c0_i32_1 = arith.constant 0 : i32
    return %c0_i32, %c0_i32_0 : i32, i32
  }
  func.func @transform_1(%arg0: i32) -> (i32, i32) {
    %c0_i32 = arith.constant 0 : i32
    %c0_i32_0 = arith.constant 0 : i32
    %c0_i32_1 = arith.constant 0 : i32
    return %c0_i32, %c0_i32_0 : i32, i32
  }
  func.func @transform_2(%arg0: i32) -> (i32, i32) {
    %c0_i32 = arith.constant 0 : i32
    %c0_i32_0 = arith.constant 0 : i32
    %c0_i32_1 = arith.constant 0 : i32
    return %c0_i32, %c0_i32_0 : i32, i32
  }
  func.func @transform_3(%arg0: i32) -> (i32, i32, i32) {
    %c0_i32 = arith.constant 0 : i32
    %c0_i32_0 = arith.constant 0 : i32
    %c0_i32_1 = arith.constant 0 : i32
    %c0_i32_2 = arith.constant 0 : i32
    return %c0_i32, %c0_i32_0, %c0_i32_1 : i32, i32, i32
  }
  func.func @transform_4(%arg0: i32) -> (i32, i32, i32) {
    %c0_i32 = arith.constant 0 : i32
    %c0_i32_0 = arith.constant 0 : i32
    %c0_i32_1 = arith.constant 0 : i32
    %c0_i32_2 = arith.constant 0 : i32
    return %c0_i32, %c0_i32_0, %c0_i32_1 : i32, i32, i32
  }
  func.func @transform_5(%arg0: i32) -> (i32, i32) {
    %c0_i32 = arith.constant 0 : i32
    %c0_i32_0 = arith.constant 0 : i32
    %c0_i32_1 = arith.constant 0 : i32
    return %c0_i32, %c0_i32_0 : i32, i32
  }
  func.func @transform_6(%arg0: i32) -> (i32, i32, i32) {
    %c0_i32 = arith.constant 0 : i32
    %c0_i32_0 = arith.constant 0 : i32
    %c0_i32_1 = arith.constant 0 : i32
    %c0_i32_2 = arith.constant 0 : i32
    return %c0_i32, %c0_i32_0, %c0_i32_1 : i32, i32, i32
  }
  func.func @transform_7(%arg0: i32) -> (i32, i32, i32) {
    %c0_i32 = arith.constant 0 : i32
    %c0_i32_0 = arith.constant 0 : i32
    %c0_i32_1 = arith.constant 0 : i32
    %c0_i32_2 = arith.constant 0 : i32
    return %c0_i32, %c0_i32_0, %c0_i32_1 : i32, i32, i32
  }
  func.func @transform_8(%arg0: i32) -> (i32, i32) {
    %c0_i32 = arith.constant 0 : i32
    %c0_i32_0 = arith.constant 0 : i32
    %c0_i32_1 = arith.constant 0 : i32
    return %c0_i32, %c0_i32_0 : i32, i32
  }
  func.func @transform_9(%arg0: i32) -> (i32, i32) {
    %c0_i32 = arith.constant 0 : i32
    %c0_i32_0 = arith.constant 0 : i32
    %c0_i32_1 = arith.constant 0 : i32
    return %c0_i32, %c0_i32_0 : i32, i32
  }
}

</mosaic_0001>

<bundles_post_ra>
// kernel: minist_cnn_forward.1
= control target key start
LH: loop header
LB: loop body
LE: loop exit
PB: predicated region body
PF: predicated region fallthrough
CT: control target
= control target key end

     0   :  { %v6604_v2 = vmov 2   ;;  %v6600_v3 = vmov 1   ;;  %s6586_s0 = inlined_call_operand.vmem [shape: f32[196,9], index: 0, kind: input, shape index: {}]   ;;  %s6587_s1 = inlined_call_operand.vmem [shape: f32[9,16], index: 1, kind: input, shape index: {}]   ;;  %s6588_s2 = inlined_call_operand.vmem [shape: f32[1,16], index: 2, kind: input, shape index: {}]   ;;  %s6589_s3 = inlined_call_operand.vmem [shape: bf16[9,49,196], index: 3, kind: input, shape index: {}]   ;;  %s6590_s4 = inlined_call_operand.vmem [shape: bf16[9,16,16], index: 4, kind: input, shape index: {}]   ;;  %s6591_s5 = inlined_call_operand.vmem [shape: f32[1,16], index: 5, kind: input, shape index: {}]   ;;  %s6592_s6 = inlined_call_operand.vmem [shape: bf16[9,16,49], index: 6, kind: input, shape index: {}]   ;;  %s6593_s7 = inlined_call_operand.vmem [shape: bf16[9,16,10], index: 7, kind: input, shape index: {}]   ;;  %s6594_s8 = inlined_call_operand.vmem [shape: f32[1,10], index: 8, kind: input, shape index: {}]   ;;  %s6595_s9 = inlined_call_operand.hbm [shape: f32[1,10], index: 9, kind: output, shape index: {}]  }
   0x1   :  { %v4441_v0 = vld [vmem:[%s6586_s0 + $0x70] sm:$0xff]  ;;  %v4446_v1 = vld [vmem:[%s6586_s0 + $0x68] sm:$0xff]  ;;  %4187 = vset.pattern.permute.xlu2 %v6604_v2  ;;  %4190 = vset.pattern.permute.xlu0 %v6600_v3 }
   0x2   :  { %4186 = vset.pattern.permute.xlu1 %v6600_v3  ;;  %445 = vperm.xlu2 %4187, %v4441_v0  }
   0x3   :  { %294 = vperm.xlu1 %4186, %v4441_v0   ;;  %290 = vperm.xlu0 %4190, %v4446_v1  }
   0x4   :  { %14 = vsyncpa [#allocation3], 0  ;;  %v4457_v4 = vld [vmem:[%s6586_s0 + $0x78] sm:$0xff]  ;;  %v4470_v6 = vld [vmem:[%s6586_s0 + $0x40] sm:$0xff]  ;;  %v6596_v8 = vmov 0   ;;  %v6608_v10 = vmov 3  }
   0x5   :  { %v4462_v5 = vld [vmem:[%s6586_s0 + $0x58] sm:$0xff]  ;;  %v4475_v7 = vld [vmem:[%s6586_s0 + $0x60] sm:$0xff]  ;;  %v4505_v12 = vld [vmem:[%s6586_s0 + $0x90] sm:$0xff]  ;;  %v6606_v14 = vmov 4   ;;  %v6612_v15 = vmov 5   ;;  %v6602_v19 = vmov 6  }
   0x6   :  { %v4485_v9 = vld [vmem:[%s6586_s0 + $0xb8] sm:$0xff]  ;;  %v4495_v11 = vld [vmem:[%s6586_s0 + $0xa0] sm:$0xff]  ;;  %6628 = vst [vmem:[#allocation5_spill] sm:$0xff] %v4505_v12  ;;  %v4511_v13 = vld [vmem:[%s6586_s0 + $0x50] sm:$0xff]  ;;  %v6610_v34 = vmov 7   ;;  %v6598_v49 = vmov 8  }
   0x7   :  { %v4534_v16 = vld [vmem:[%s6586_s0 + $0xb0] sm:$0xff]  ;;  %v4542_v17 = vld [vmem:[%s6586_s0 + $0x28] sm:$0xff]  ;;  %v4552_v18 = vld [vmem:[%s6586_s0 + $0x18] sm:$0xff]  ;;  %vm1565_vm0 = vcmask 1041408   ;;  %vm1552_vm1 = vcmask 556032   ;;  %vm1753_vm2 = vcmask 130048  }
   0x8   :  { %v4564_v21 = vld [vmem:[%s6586_s0 + $0x88] sm:$0xff]  ;;  %v4569_v22 = vld [vmem:[%s6586_s0 + $0xc0] sm:$0xf]  ;;  %v4662_v45 = vld [vmem:[%s6586_s0 + $0x10] sm:$0xff]  ;;  %vm3056_vm3 = vcmask 1040384   ;;  %vm3052_vm4 = vcmask 400384  }
   0x9   :  { %6629 = vst [vmem:[#allocation6_spill] sm:$0xff] %v4564_v21  ;;  %v4581_v24 = vld [vmem:[%s6586_s0 + $0x48] sm:$0xff]  ;;  %v4677_v50 = vld [vmem:[%s6586_s0 + $0x80] sm:$0xff]  ;;  %v4689_v53 = vld [vmem:[%s6586_s0 + $0x30] sm:$0xff]  ;;  %vm3540_vm5 = vcmask 80896   ;;  %s3567_s14 = sshll.u32 %s6595_s9, 4  ;;  %s3568_s14 = int_to_ptr.hbm [resolvable:$true] %s3567_s14 }
   0xa   :  { %449 = vperm.xlu2 %4187, %v4457_v4   ;;  %v4649_v42 = vld [vmem:[%s6586_s0 + $0xa8] sm:$0xff]  ;;  %v4697_v55 = vld [vmem:[%s6586_s0 + $0x38] sm:$0xff]  ;;  %vm3558_vm7 = vcmask 73728  }
   0xb   :  { %298 = vperm.xlu1 %4186, %v4457_v4   ;;  %282 = vperm.xlu0 %4190, %v4462_v5  }
  0x12   :  { %4189 = vset.pattern.permute.xlu2 %v6600_v3 }
  0x13   :  { %4188 = vset.pattern.permute.xlu1 %v6596_v8  ;;  %270 = vperm.xlu0 %4190, %v4470_v6  }
  0x14   :  { %128 = vperm.xlu1 %4188, %v4446_v1   ;;  %286 = vperm.xlu2 %4189, %v4475_v7  }
  0x1b   :  { %330 = vperm.xlu0 %4190, %v4485_v9  }
  0x1c   :  { %4191 = vset.pattern.permute.xlu1 %v6608_v10  ;;  %4192 = vset.pattern.permute.xlu2 %v6608_v10 }
  0x1d   :  { %596 = vperm.xlu1 %4191, %v4441_v0   ;;  %600 = vperm.xlu2 %4192, %v4457_v4  }
  0x23   :  { %318 = vperm.xlu0 %4190, %v4495_v11  }
  0x25   :  { %4193 = vset.pattern.permute.xlu1 %v6604_v2  ;;  %4194 = vset.pattern.permute.xlu2 %v6604_v2 }
  0x26   :  { %437 = vperm.xlu1 %4193, %v4475_v7   ;;  %441 = vperm.xlu2 %4194, %v4446_v1  }
  0x2b   :  { %310 = vperm.xlu0 %4190, %v4505_v12  }
  0x2e   :  { %4195 = vset.pattern.permute.xlu1 %v6606_v14  ;;  %4196 = vset.pattern.permute.xlu2 %v6596_v8 }
  0x2f   :  { %751 = vperm.xlu1 %4195, %v4457_v4   ;;  %113 = vperm.xlu2 %4196, %v4511_v13  }
  0x33   :  { %4264 = vset.pattern.permute.xlu0 %v6596_v8 }
  0x34   :  { %133 = vperm.xlu0 %4264, %v4441_v0  }
  0x37   :  { %4197 = vset.pattern.permute.xlu1 %v6596_v8  ;;  %4198 = vset.pattern.permute.xlu2 %v6600_v3 }
  0x38   :  { %118 = vperm.xlu1 %4197, %v4462_v5   ;;  %278 = vperm.xlu2 %4198, %v4511_v13  }
  0x3c   :  { %138 = vperm.xlu0 %4264, %v4457_v4  }
  0x40   :  { %4199 = vset.pattern.permute.xlu1 %v6608_v10  ;;  %4200 = vset.pattern.permute.xlu2 %v6608_v10 }
  0x41   :  { %588 = vperm.xlu1 %4199, %v4475_v7   ;;  %592 = vperm.xlu2 %4200, %v4446_v1  }
  0x44   :  { %123 = vperm.xlu0 %4264, %v4475_v7  }
  0x49   :  { %4201 = vset.pattern.permute.xlu1 %v6612_v15  ;;  %4202 = vset.pattern.permute.xlu2 %v6612_v15 }
  0x4a   :  { %898 = vperm.xlu1 %4201, %v4441_v0   ;;  %902 = vperm.xlu2 %4202, %v4457_v4  }
  0x4c   :  { %173 = vperm.xlu0 %4264, %v4534_v16  }
  0x52   :  { %4203 = vset.pattern.permute.xlu1 %v6604_v2  ;;  %4204 = vset.pattern.permute.xlu2 %v6606_v14 }
  0x53   :  { %433 = vperm.xlu1 %4203, %v4462_v5   ;;  %739 = vperm.xlu2 %4204, %v4475_v7  }
  0x54   :  { %88 = vperm.xlu0 %4264, %v4542_v17  }
  0x5b   :  { %4205 = vset.pattern.permute.xlu1 %v6606_v14  ;;  %4206 = vset.pattern.permute.xlu2 %v6602_v19 }
  0x5c   :  { %743 = vperm.xlu1 %4205, %v4446_v1   ;;  %1049 = vperm.xlu2 %4206, %v4441_v0   ;;  %v4558_v20 = vpop.permute.xlu2 %445 }
  0x5d   :  { %78 = vperm.xlu0 %4264, %v4552_v18  }
  0x64   :  { %4207 = vset.pattern.permute.xlu1 %v6596_v8  ;;  %4208 = vset.pattern.permute.xlu2 %v6600_v3  ;;  %v4573_v23 = vpop.permute.xlu2 %449 }
  0x65   :  { %148 = vperm.xlu0 %4264, %v4564_v21   ;;  %183 = vperm.xlu1 %4207, %v4569_v22  }
  0x66   :  { %334 = vperm.xlu2 %4208, %v4569_v22  }
  0x6d   :  { %4280 = vset.pattern.permute.xlu0 %v6604_v2  ;;  %103 = vperm.xlu1 %4207, %v4470_v6  }
  0x6e   :  { %4209 = vset.pattern.permute.xlu2 %v6596_v8  ;;  %429 = vperm.xlu0 %4280, %v4511_v13   ;;  %v4587_v25 = vpop.permute.xlu2 %286 }
  0x6f   :  { %6630 = vst [vmem:[#allocation7_spill] sm:$0xff] %v4587_v25  ;;  %108 = vperm.xlu2 %4209, %v4581_v24   ;;  %v6678_v25 = vmov 1  }
  0x75   :  { %v4590_v26 = vpop.permute.xlu1 %294  ;;  %4210 = vset.pattern.permute.xlu1 %v6600_v3  ;;  %v4593_v27 = vpop.permute.xlu0 %290 }
  0x76   :  { %425 = vperm.xlu0 %4280, %v4581_v24   ;;  %274 = vperm.xlu1 %4210, %v4581_v24  }
  0x77   :  { %4211 = vset.pattern.permute.xlu2 %v6608_v10  ;;  %v4598_v28 = vpop.permute.xlu2 %600 }
  0x78   :  { %580 = vperm.xlu2 %4211, %v4511_v13  }
  0x7d   :  { %v4601_v29 = vpop.permute.xlu1 %298  ;;  %v4603_v30 = vpop.permute.xlu0 %282 }
  0x7e   :  { %477 = vperm.xlu0 %4280, %v4534_v16   ;;  %4212 = vset.pattern.permute.xlu1 %v6608_v10 }
  0x7f   :  { %584 = vperm.xlu1 %4212, %v4462_v5  }
  0x80   :  { %4213 = vset.pattern.permute.xlu2 %v6612_v15  ;;  %v4609_v31 = vpop.permute.xlu2 %441 }
  0x81   :  { %890 = vperm.xlu2 %4213, %v4475_v7  }
  0x85   :  { %v4612_v32 = vpop.permute.xlu0 %270 }
  0x86   :  { %6631 = vst [vmem:[#allocation8_spill] sm:$0xff] %v4612_v32  ;;  %461 = vperm.xlu0 %4280, %v4505_v12   ;;  %v4615_v33 = vpop.permute.xlu1 %128  ;;  %v6667_v32 = vmov 8  }
  0x87   :  { %4214 = vset.pattern.permute.xlu1 %v6610_v34 }
  0x88   :  { %1200 = vperm.xlu1 %4214, %v4441_v0  }
  0x89   :  { %4215 = vset.pattern.permute.xlu2 %v6610_v34  ;;  %v4620_v35 = vpop.permute.xlu2 %113 }
  0x8a   :  { %6632 = vst [vmem:[#allocation9_spill] sm:$0xff] %v4620_v35  ;;  %1204 = vperm.xlu2 %4215, %v4457_v4  }
  0x8d   :  { %v4623_v36 = vpop.permute.xlu0 %330 }
  0x8e   :  { %457 = vperm.xlu0 %4280, %v4564_v21  }
  0x8f   :  { %v4626_v37 = vpop.permute.xlu1 %596 }
  0x90   :  { %4216 = vset.pattern.permute.xlu1 %v6604_v2 }
  0x91   :  { %485 = vperm.xlu1 %4216, %v4569_v22  }
  0x92   :  { %4217 = vset.pattern.permute.xlu2 %v6604_v2  ;;  %v4631_v38 = vpop.permute.xlu2 %278 }
  0x93   :  { %6633 = vst [vmem:[#allocation10_spill] sm:$0xff] %v4631_v38  ;;  %421 = vperm.xlu2 %4217, %v4470_v6  }
  0x95   :  { %v4634_v39 = vpop.permute.xlu0 %318 }
  0x96   :  { %6634 = vst [vmem:[#allocation11_spill] sm:$0xff] %v4634_v39  ;;  %4291 = vset.pattern.permute.xlu0 %v6608_v10 }
  0x97   :  { %632 = vperm.xlu0 %4291, %v4485_v9  }
  0x98   :  { %v4638_v40 = vpop.permute.xlu1 %437 }
  0x99   :  { %6635 = vst [vmem:[#allocation12_spill] sm:$0xff] %v4638_v40  ;;  %4218 = vset.pattern.permute.xlu1 %v6606_v14 }
  0x9a   :  { %731 = vperm.xlu1 %4218, %v4511_v13  }
  0x9b   :  { %4219 = vset.pattern.permute.xlu2 %v6606_v14  ;;  %v4643_v41 = vpop.permute.xlu2 %592 }
  0x9c   :  { %735 = vperm.xlu2 %4219, %v4462_v5  }
  0x9d   :  { %v4651_v43 = vpop.permute.xlu0 %310 }
  0x9e   :  { %6636 = vst [vmem:[#allocation13_spill] sm:$0xff] %v4651_v43 }
  0x9f   :  { %624 = vperm.xlu0 %4291, %v4649_v42  }
  0xa1   :  { %v4654_v44 = vpop.permute.xlu1 %751 }
  0xa2   :  { %4220 = vset.pattern.permute.xlu1 %v6602_v19 }
  0xa3   :  { %1041 = vperm.xlu1 %4220, %v4475_v7  }
  0xa4   :  { %4221 = vset.pattern.permute.xlu2 %v6602_v19  ;;  %v4664_v46 = vpop.permute.xlu2 %902 }
  0xa5   :  { %1045 = vperm.xlu2 %4221, %v4446_v1  }
  0xa6   :  { %v4667_v47 = vpop.permute.xlu0 %133 }
  0xa7   :  { %548 = vperm.xlu0 %4291, %v4662_v45  }
  0xaa   :  { %v4670_v48 = vpop.permute.xlu1 %118 }
  0xab   :  { %4222 = vset.pattern.permute.xlu1 %v6598_v49 }
  0xac   :  { %1355 = vperm.xlu1 %4222, %v4457_v4  }
  0xad   :  { %4223 = vset.pattern.permute.xlu2 %v6608_v10  ;;  %v4680_v51 = vpop.permute.xlu2 %739 }
  0xae   :  { %6637 = vst [vmem:[#allocation14_spill] sm:$0xff] %v4680_v51  ;;  %636 = vperm.xlu2 %4223, %v4569_v22   ;;  %v4683_v52 = vpop.permute.xlu0 %138 }
  0xaf   :  { %604 = vperm.xlu0 %4291, %v4677_v50  }
  0xb3   :  { %v4691_v54 = vpop.permute.xlu1 %588 }
  0xb4   :  { %6638 = vst [vmem:[#allocation15_spill] sm:$0xff] %v4691_v54  ;;  %4224 = vset.pattern.permute.xlu1 %v6596_v8  ;;  %v4843_v54 = vld [vmem:[%s6587_s1] sm:$0xff] }
  0xb5   :  { %93 = vperm.xlu1 %4224, %v4689_v53  }
  0xb6   :  { %4225 = vset.pattern.permute.xlu2 %v6596_v8  ;;  %v4701_v56 = vpop.permute.xlu0 %123  ;;  %v4703_v57 = vpop.permute.xlu2 %1049  ;;  %v4731_v8 = vld [vmem:[%s6586_s0] sm:$0xff] }
  0xb7   :  { %6639 = vst [vmem:[#allocation16_spill] sm:$0xff] %v4701_v56  ;;  %98 = vperm.xlu2 %4225, %v4697_v55   ;;  %4300 = vset.pattern.permute.xlu0 %v6606_v14  ;;  %v4862_v56 = vperm.slane %v4843_v54, 2 }
  0xb8   :  { %6640 = vst [vmem:[#allocation17_spill] sm:$0xff] %v4703_v57  ;;  %747 = vperm.xlu0 %4300, %v4441_v0  }
  0xb9   :  { %6645 = vst [vmem:[#allocation22_spill] sm:$0xff] %v4731_v8 }
  0xbc   :  { %v4708_v58 = vpop.permute.xlu1 %898 }
  0xbd   :  { %6641 = vst [vmem:[#allocation18_spill] sm:$0xff] %v4708_v58  ;;  %178 = vperm.xlu1 %4224, %v4485_v9  }
  0xbe   :  { %v4711_v59 = vpop.permute.xlu0 %173 }
  0xbf   :  { %4226 = vset.pattern.permute.xlu2 %v6600_v3 }
  0xc0   :  { %262 = vperm.xlu2 %4226, %v4689_v53   ;;  %715 = vperm.xlu0 %4300, %v4689_v53   ;;  %v4716_v60 = vpop.permute.xlu2 %334 }
  0xc1   :  { %6642 = vst [vmem:[#allocation19_spill] sm:$0xff] %v4716_v60  ;;  %v4770_v60 = vld [vmem:[%s6586_s0 + $0x98] sm:$0xff] }
  0xc2   :  { %6656 = vst [vmem:[#allocation31_spill] sm:$0xff] %v4770_v60 }
  0xc5   :  { %v4718_v61 = vpop.permute.xlu1 %433  ;;  %4227 = vset.pattern.permute.xlu1 %v6600_v3 }
  0xc6   :  { %266 = vperm.xlu1 %4227, %v4697_v55   ;;  %v4722_v62 = vpop.permute.xlu0 %88 }
  0xc7   :  { %6643 = vst [vmem:[#allocation20_spill] sm:$0xff] %v4722_v62 }
  0xc8   :  { %326 = vperm.xlu2 %4226, %v4534_v16   ;;  %775 = vperm.xlu0 %4300, %v4649_v42  }
  0xc9   :  { %v4726_v63 = vpop.permute.xlu2 %108 }
  0xca   :  { %6644 = vst [vmem:[#allocation21_spill] sm:$0xff] %v4726_v63 }
  0xce   :  { %v4733_v49 = vpop.permute.xlu1 %743  ;;  %4228 = vset.pattern.permute.xlu1 %v6608_v10 }
  0xcf   :  { %572 = vperm.xlu1 %4228, %v4470_v6   ;;  %v4737_v3 = vpop.permute.xlu0 %78 }
  0xd0   :  { %6646 = vst [vmem:[#allocation23_spill] sm:$0xff] %v4737_v3  ;;  %4229 = vset.pattern.permute.xlu2 %v6608_v10  ;;  %691 = vperm.xlu0 %4300, %v4731_v8   ;;  %v6659_v3 = vmov 2  }
  0xd1   :  { %576 = vperm.xlu2 %4229, %v4581_v24  }
  0xd2   :  { %v4742_v19 = vpop.permute.xlu2 %580 }
  0xd3   :  { %6647 = vst [vmem:[#allocation24_spill] sm:$0xff] %v4742_v19 }
  0xd7   :  { %v4744_v2 = vpop.permute.xlu1 %183  ;;  %4230 = vset.pattern.permute.xlu1 %v6612_v15  ;;  %v4747_v14 = vpop.permute.xlu0 %148 }
  0xd8   :  { %6648 = vst [vmem:[#allocation25_spill] sm:$0xff] %v4744_v2  ;;  %4305 = vset.pattern.permute.xlu0 %v6612_v15  ;;  %882 = vperm.xlu1 %4230, %v4511_v13   ;;  %v6653_v2 = vmov 7  }
  0xd9   :  { %6649 = vst [vmem:[#allocation26_spill] sm:$0xff] %v4747_v14  ;;  %4231 = vset.pattern.permute.xlu2 %v6612_v15  ;;  %894 = vperm.xlu0 %4305, %v4446_v1   ;;  %v6654_v14 = vmov 4  }
  0xda   :  { %886 = vperm.xlu2 %4231, %v4462_v5  }
  0xdb   :  { %v4754_v10 = vpop.permute.xlu2 %890 }
  0xdc   :  { %6650 = vst [vmem:[#allocation27_spill] sm:$0xff] %v4754_v10  ;;  %v6671_v10 = vmov 0  }
  0xdf   :  { %v4756_v34 = vpop.permute.xlu1 %103 }
  0xe0   :  { %6651 = vst [vmem:[#allocation28_spill] sm:$0xff] %v4756_v34  ;;  %v4758_v62 = vpop.permute.xlu0 %429  ;;  %4232 = vset.pattern.permute.xlu1 %v6653_v2 }
  0xe1   :  { %6652 = vst [vmem:[#allocation29_spill] sm:$0xff] %v4758_v62  ;;  %862 = vperm.xlu0 %4305, %v4542_v17   ;;  %1196 = vperm.xlu1 %4232, %v4446_v1  }
  0xe2   :  { %4233 = vset.pattern.permute.xlu2 %v6654_v14 }
  0xe3   :  { %787 = vperm.xlu2 %4233, %v4569_v22  }
  0xe4   :  { %v4765_v15 = vpop.permute.xlu2 %1204 }
  0xe5   :  { %6655 = vst [vmem:[#allocation30_spill] sm:$0xff] %v4765_v15  ;;  %v6662_v15 = vmov 6  }
  0xe8   :  { %v4772_v43 = vpop.permute.xlu1 %274  ;;  %v4774_v39 = vpop.permute.xlu0 %425 }
  0xe9   :  { %6657 = vst [vmem:[#allocation32_spill] sm:$0xff] %v4772_v43  ;;  %918 = vperm.xlu0 %4305, %v4770_v60   ;;  %4234 = vset.pattern.permute.xlu1 %v6659_v3  ;;  %v503_v60 = vmul.f32 %v4862_v56, %v4558_v20 }
  0xea   :  { %6658 = vst [vmem:[#allocation33_spill] sm:$0xff] %v4774_v39  ;;  %413 = vperm.xlu1 %4234, %v4689_v53  }
  0xeb   :  { %4235 = vset.pattern.permute.xlu2 %v6659_v3 }
  0xec   :  { %417 = vperm.xlu2 %4235, %v4697_v55  }
  0xed   :  { %v4781_v19 = vpop.permute.xlu2 %421 }
  0xee   :  { %6660 = vst [vmem:[#allocation34_spill] sm:$0xff] %v4781_v19 }
  0xf0   :  { %v478_v62 = vpop.permute.xlu0 %477 }
  0xf1   :  { %910 = vperm.xlu0 %4305, %v4564_v21   ;;  %v4784_v38 = vpop.permute.xlu1 %584  ;;  %v511_v43 = vmul.f32 %v4862_v56, %v478_v62  ;;  %v4887_v62 = vperm.slane %v4843_v54, 4 }
  0xf2   :  { %481 = vperm.xlu1 %4234, %v4485_v9  }
  0xf4   :  { %4236 = vset.pattern.permute.xlu2 %v6654_v14 }
  0xf5   :  { %723 = vperm.xlu2 %4236, %v4470_v6  }
  0xf6   :  { %v4789_v35 = vpop.permute.xlu2 %735 }
  0xf8   :  { %v4791_v57 = vpop.permute.xlu0 %461 }
  0xf9   :  { %6661 = vst [vmem:[#allocation35_spill] sm:$0xff] %v4791_v57  ;;  %4314 = vset.pattern.permute.xlu0 %v6662_v15 }
  0xfa   :  { %1053 = vperm.xlu0 %4314, %v4457_v4   ;;  %v4795_v58 = vpop.permute.xlu1 %1200  ;;  %4237 = vset.pattern.permute.xlu1 %v6654_v14 }
  0xfb   :  { %6663 = vst [vmem:[#allocation36_spill] sm:$0xff] %v4795_v58  ;;  %727 = vperm.xlu1 %4237, %v4581_v24  }
  0xfd   :  { %4238 = vset.pattern.permute.xlu2 %v6662_v15 }
  0xfe   :  { %1033 = vperm.xlu2 %4238, %v4511_v13  }
  0xff   :  { %v4801_v19 = vpop.permute.xlu2 %1045 }
 0x100   :  { %6664 = vst [vmem:[#allocation37_spill] sm:$0xff] %v4801_v19  ;;  %v4803_v34 = vpop.permute.xlu0 %457 }
 0x101   :  { %6665 = vst [vmem:[#allocation38_spill] sm:$0xff] %v4803_v34  ;;  %v6670_v34 = vmov 5  }
 0x102   :  { %1037 = vperm.xlu0 %4314, %v4462_v5  }
 0x103   :  { %v4806_v57 = vpop.permute.xlu1 %485  ;;  %4239 = vset.pattern.permute.xlu1 %v6667_v32 }
 0x104   :  { %6666 = vst [vmem:[#allocation39_spill] sm:$0xff] %v4806_v57  ;;  %1343 = vperm.xlu1 %4239, %v4475_v7   ;;  %v4824_v57 = vld [vmem:[%s6586_s0 + $0x20] sm:$0xff] }
 0x106   :  { %4240 = vset.pattern.permute.xlu2 %v6667_v32 }
 0x107   :  { %1347 = vperm.xlu2 %4240, %v4446_v1  }
 0x108   :  { %v4812_v4 = vpop.permute.xlu2 %636 }
 0x109   :  { %6668 = vst [vmem:[#allocation40_spill] sm:$0xff] %v4812_v4  ;;  %v4814_v58 = vpop.permute.xlu0 %632 }
 0x10a   :  { %1089 = vperm.xlu0 %4314, %v4569_v22  }
 0x10c   :  { %v4817_v19 = vpop.permute.xlu1 %731  ;;  %4241 = vset.pattern.permute.xlu1 %v6670_v34 }
 0x10d   :  { %6669 = vst [vmem:[#allocation41_spill] sm:$0xff] %v4817_v19  ;;  %938 = vperm.xlu1 %4241, %v4569_v22  }
 0x10f   :  { %4242 = vset.pattern.permute.xlu2 %v6671_v10 }
 0x110   :  { %83 = vperm.xlu2 %4242, %v4824_v57  }
 0x111   :  { %v4828_v1 = vpop.permute.xlu0 %624  ;;  %v4830_v4 = vpop.permute.xlu2 %98 }
 0x112   :  { %6672 = vst [vmem:[#allocation42_spill] sm:$0xff] %v4828_v1  ;;  %1029 = vperm.xlu0 %4314, %v4581_v24   ;;  %v4849_v1 = vperm.slane %v4843_v54, 1 }
 0x113   :  { %6673 = vst [vmem:[#allocation43_spill] sm:$0xff] %v4830_v4 }
 0x115   :  { %v4833_v19 = vpop.permute.xlu1 %1041  ;;  %4243 = vset.pattern.permute.xlu1 %v6671_v10 }
 0x116   :  { %6674 = vst [vmem:[#allocation44_spill] sm:$0xff] %v4833_v19  ;;  %163 = vperm.xlu1 %4243, %v4495_v11   ;;  %v4852_v19 = vperm.slane %v4843_v54, 0 }
 0x118   :  { %168 = vperm.xlu2 %4242, %v4649_v42   ;;  %v209_v39 = vmul.f32 %v4852_v19, %v4711_v59 }
 0x119   :  { %v4838_v51 = vpop.permute.xlu0 %548 }
 0x11a   :  { %6675 = vst [vmem:[#allocation45_spill] sm:$0xff] %v4838_v51  ;;  %1009 = vperm.xlu0 %4314, %v4824_v57   ;;  %v4846_v4 = vpop.permute.xlu2 %262  ;;  %v201_v51 = vmul.f32 %v4852_v19, %v4667_v47 }
 0x11b   :  { %6676 = vst [vmem:[#allocation46_spill] sm:$0xff] %v4846_v4  ;;  %v352_v4 = vmul.f32 %v4849_v1, %v4590_v26  ;;  %v4877_v26 = vperm.slane %v4843_v54, 3 }
 0x11d   :  { %v377_v63 = vadd.f32 %v352_v4, %v201_v51  ;;  %v654_v51 = vmul.f32 %v4877_v26, %v4626_v37  ;;  %v6682_v4 = vmov 3  }
 0x11e   :  { %v4854_v40 = vpop.permute.xlu1 %1355  ;;  %4244 = vset.pattern.permute.xlu1 %v6678_v25 }
 0x11f   :  { %6677 = vst [vmem:[#allocation47_spill] sm:$0xff] %v4854_v40  ;;  %254 = vperm.xlu1 %4244, %v4824_v57   ;;  %v528_v59 = vadd.f32 %v503_v60, %v377_v63 }
 0x120   :  { %4245 = vset.pattern.permute.xlu2 %v6678_v25 }
 0x121   :  { %258 = vperm.xlu2 %4245, %v4542_v17   ;;  %v4869_v40 = vpop.permute.xlu0 %604 }
 0x122   :  { %6679 = vst [vmem:[#allocation48_spill] sm:$0xff] %v4869_v40  ;;  %1005 = vperm.xlu0 %4314, %v4552_v18   ;;  %v327_v47 = vpop.permute.xlu2 %326 }
 0x123   :  { %v360_v25 = vmul.f32 %v4849_v1, %v327_v47 }
 0x125   :  { %v385_v12 = vadd.f32 %v360_v25, %v209_v39  ;;  %v679_v25 = vadd.f32 %v654_v51, %v528_v59 }
 0x127   :  { %v4879_v21 = vpop.permute.xlu1 %93  ;;  %322 = vperm.xlu1 %4244, %v4649_v42   ;;  %v4882_v40 = vadd.f32 %v511_v43, %v385_v12 }
 0x128   :  { %6680 = vst [vmem:[#allocation49_spill] sm:$0xff] %v4879_v21  ;;  %v804_v21 = vmul.f32 %v4887_v62, %v4733_v49 }
 0x129   :  { %6681 = vst [vmem:[#allocation50_spill] sm:$0xff] %v4882_v40  ;;  %4246 = vset.pattern.permute.xlu2 %v6682_v4 }
 0x12a   :  { %564 = vperm.xlu2 %4246, %v4689_v53   ;;  %v748_v20 = vpop.permute.xlu0 %747  ;;  %993 = vperm.xlu0 %4314, %v4731_v8  }
 0x12b   :  { %v805_v39 = vmul.f32 %v4887_v62, %v748_v20  ;;  %v4893_v60 = vpop.permute.xlu2 %576  ;;  %v200_v20 = vmul.f32 %v4852_v19, %v4615_v33 }
 0x12d   :  { %v4895_v12 = vadd.f32 %v805_v39, %v679_v25 }
 0x12f   :  { %v4897_v43 = vpop.permute.xlu1 %178  ;;  %4247 = vset.pattern.permute.xlu1 %v6682_v4 }
 0x130   :  { %568 = vperm.xlu1 %4247, %v4697_v55  }
 0x132   :  { %628 = vperm.xlu2 %4246, %v4534_v16   ;;  %4317 = vset.pattern.permute.xlu0 %v6653_v2  ;;  %v4903_v37 = vpop.permute.xlu0 %715 }
 0x133   :  { %6683 = vst [vmem:[#allocation51_spill] sm:$0xff] %v4903_v37  ;;  %1192 = vperm.xlu0 %4317, %v4475_v7   ;;  %v351_v7 = vmul.f32 %v4849_v1, %v4593_v27  ;;  %v653_v27 = vmul.f32 %v4877_v26, %v4643_v41 }
 0x134   :  { %v4906_v63 = vpop.permute.xlu2 %886 }
 0x135   :  { %v376_v40 = vadd.f32 %v351_v7, %v200_v20  ;;  %v202_v20 = vmul.f32 %v4852_v19, %v4683_v52 }
 0x138   :  { %v4908_v47 = vpop.permute.xlu1 %266  ;;  %4248 = vset.pattern.permute.xlu1 %v6670_v34 }
 0x139   :  { %6684 = vst [vmem:[#allocation52_spill] sm:$0xff] %v4908_v47  ;;  %874 = vperm.xlu1 %4248, %v4470_v6   ;;  %v502_v47 = vmul.f32 %v4862_v56, %v4609_v31 }
 0x13a   :  { %4249 = vset.pattern.permute.xlu2 %v6670_v34  ;;  %v4913_v59 = vpop.permute.xlu0 %775 }
 0x13b   :  { %878 = vperm.xlu2 %4249, %v4581_v24   ;;  %1176 = vperm.xlu0 %4317, %v4470_v6   ;;  %v527_v37 = vadd.f32 %v502_v47, %v376_v40 }
 0x13d   :  { %v4917_v51 = vpop.permute.xlu2 %787 }
 0x13e   :  { %6685 = vst [vmem:[#allocation53_spill] sm:$0xff] %v4917_v51  ;;  %v4941_v51 = vperm.slane %v4843_v54, 5 }
 0x141   :  { %v4923_v25 = vpop.permute.xlu1 %572  ;;  %4250 = vset.pattern.permute.xlu1 %v6653_v2 }
 0x142   :  { %1184 = vperm.xlu1 %4250, %v4511_v13   ;;  %v4927_v39 = vpop.permute.xlu0 %691 }
 0x143   :  { %6686 = vst [vmem:[#allocation54_spill] sm:$0xff] %v4927_v39  ;;  %4251 = vset.pattern.permute.xlu2 %v6653_v2  ;;  %1232 = vperm.xlu0 %4317, %v4534_v16   ;;  %v678_v39 = vadd.f32 %v653_v27, %v527_v37 }
 0x144   :  { %1188 = vperm.xlu2 %4251, %v4462_v5  }
 0x145   :  { %v829_v41 = vadd.f32 %v804_v21, %v678_v39  ;;  %v353_v39 = vmul.f32 %v4849_v1, %v4601_v29  ;;  %v361_v29 = vmul.f32 %v4849_v1, %v4623_v36  ;;  %v663_v36 = vmul.f32 %v4877_v26, %v4814_v58 }
 0x146   :  { %v4936_v33 = vpop.permute.xlu2 %417  ;;  %v957_v58 = vmul.f32 %v4941_v51, %v4664_v46  ;;  %v651_v46 = vmul.f32 %v4877_v26, %v4784_v38  ;;  %v953_v38 = vmul.f32 %v4941_v51, %v4906_v63 }
 0x147   :  { %6687 = vst [vmem:[#allocation55_spill] sm:$0xff] %v4936_v33  ;;  %v649_v33 = vmul.f32 %v4877_v26, %v4893_v60 }
 0x14a   :  { %v4943_v8 = vpop.permute.xlu1 %882  ;;  %4252 = vset.pattern.permute.xlu1 %v6659_v3 }
 0x14b   :  { %1208 = vperm.xlu0 %4317, %v4677_v50   ;;  %v895_v31 = vpop.permute.xlu0 %894  ;;  %405 = vperm.xlu1 %4252, %v4824_v57  }
 0x14c   :  { %v955_v7 = vmul.f32 %v4941_v51, %v895_v31  ;;  %4253 = vset.pattern.permute.xlu2 %v6659_v3 }
 0x14d   :  { %409 = vperm.xlu2 %4253, %v4542_v17  }
 0x14e   :  { %v4951_v40 = vadd.f32 %v955_v7, %v829_v41  ;;  %v210_v41 = vmul.f32 %v4852_v19, %v4897_v43  ;;  %v806_v43 = vmul.f32 %v4887_v62, %v4654_v44 }
 0x14f   :  { %v4953_v49 = vpop.permute.xlu2 %723 }
 0x153   :  { %4324 = vset.pattern.permute.xlu0 %v6667_v32  ;;  %v4956_v37 = vpop.permute.xlu1 %1196  ;;  %469 = vperm.xlu1 %4252, %v4495_v11   ;;  %v4959_v47 = vpop.permute.xlu0 %862 }
 0x154   :  { %6688 = vst [vmem:[#allocation56_spill] sm:$0xff] %v4959_v47  ;;  %1351 = vperm.xlu0 %4324, %v4441_v0   ;;  %v378_v0 = vadd.f32 %v353_v39, %v202_v20 }
 0x155   :  { %473 = vperm.xlu2 %4253, %v4649_v42   ;;  %v504_v42 = vmul.f32 %v4862_v56, %v4573_v23 }
 0x157   :  { %v529_v52 = vadd.f32 %v504_v42, %v378_v0  ;;  %v386_v0 = vadd.f32 %v361_v29, %v210_v41 }
 0x158   :  { %v4963_v21 = vpop.permute.xlu2 %1033 }
 0x15b   :  { %4254 = vset.pattern.permute.xlu1 %v6654_v14  ;;  %v4970_v27 = vpop.permute.xlu0 %918 }
 0x15c   :  { %6689 = vst [vmem:[#allocation57_spill] sm:$0xff] %v4970_v27  ;;  %1327 = vperm.xlu0 %4324, %v4470_v6   ;;  %v4973_v31 = vpop.permute.xlu1 %413  ;;  %719 = vperm.xlu1 %4254, %v4697_v55   ;;  %v655_v27 = vmul.f32 %v4877_v26, %v4598_v28 }
 0x15d   :  { %6690 = vst [vmem:[#allocation58_spill] sm:$0xff] %v4973_v31  ;;  %4255 = vset.pattern.permute.xlu2 %v6654_v14 }
 0x15e   :  { %779 = vperm.xlu2 %4255, %v4534_v16   ;;  %v680_v23 = vadd.f32 %v655_v27, %v529_v52  ;;  %v198_v27 = vmul.f32 %v4852_v19, %v4670_v48 }
 0x160   :  { %v831_v29 = vadd.f32 %v806_v43, %v680_v23 }
 0x161   :  { %v4984_v7 = vpop.permute.xlu2 %1347 }
 0x162   :  { %v982_v48 = vadd.f32 %v957_v58, %v831_v29 }
 0x163   :  { %v4988_v20 = vpop.permute.xlu0 %910 }
 0x164   :  { %6691 = vst [vmem:[#allocation59_spill] sm:$0xff] %v4988_v20  ;;  %v482_v39 = vpop.permute.xlu1 %481  ;;  %783 = vperm.xlu1 %4254, %v4485_v9   ;;  %1323 = vperm.xlu0 %4324, %v4697_v55   ;;  %v349_v20 = vmul.f32 %v4849_v1, %v4603_v30 }
 0x165   :  { %v512_v42 = vmul.f32 %v4862_v56, %v482_v39  ;;  %v5010_v39 = vperm.slane %v4843_v54, 6 }
 0x166   :  { %4256 = vset.pattern.permute.xlu2 %v6662_v15  ;;  %v374_v30 = vadd.f32 %v349_v20, %v198_v27 }
 0x167   :  { %v537_v28 = vadd.f32 %v512_v42, %v386_v0  ;;  %1025 = vperm.xlu2 %4256, %v4470_v6   ;;  %v500_v6 = vmul.f32 %v4862_v56, %v4718_v61  ;;  %v802_v42 = vmul.f32 %v4887_v62, %v4789_v35 }
 0x169   :  { %v5005_v52 = vadd.f32 %v663_v36, %v537_v28  ;;  %v525_v0 = vadd.f32 %v500_v6, %v374_v30  ;;  %v6694_v6 = vld [vmem:[#allocation6_spill] sm:$0xff]  ;;  %v6696_v30 = vld [vmem:[#allocation5_spill] sm:$0xff] }
 0x16a   :  { %v5007_v41 = vpop.permute.xlu2 %83 }
 0x16b   :  { %6692 = vst [vmem:[#allocation60_spill] sm:$0xff] %v5007_v41  ;;  %v676_v20 = vadd.f32 %v651_v46, %v525_v0  ;;  %v6697_v46 = vld [vmem:[#allocation31_spill] sm:$0xff]  ;;  %v6699_v0 = vmov 1  }
 0x16c   :  { %v1054_v44 = vpop.permute.xlu0 %1053  ;;  %4257 = vset.pattern.permute.xlu1 %v6667_v32  ;;  %1375 = vperm.xlu0 %4324, %v4495_v11  }
 0x16d   :  { %v1108_v23 = vmul.f32 %v5010_v39, %v1054_v44  ;;  %v728_v36 = vpop.permute.xlu1 %727  ;;  %1335 = vperm.xlu1 %4257, %v4511_v13   ;;  %v827_v28 = vadd.f32 %v802_v42, %v676_v20  ;;  %v6700_v20 = vld [vmem:[#allocation32_spill] sm:$0xff] }
 0x16f   :  { %v5022_v61 = vadd.f32 %v1108_v23, %v982_v48  ;;  %4258 = vset.pattern.permute.xlu2 %v6667_v32  ;;  %v978_v13 = vadd.f32 %v953_v38, %v827_v28  ;;  %v347_v38 = vmul.f32 %v4849_v1, %v6700_v20  ;;  %v6701_v28 = vld [vmem:[#allocation21_spill] sm:$0xff]  ;;  %v6706_v20 = vld [vmem:[#allocation16_spill] sm:$0xff] }
 0x170   :  { %1339 = vperm.xlu2 %4258, %v4462_v5  }
 0x172   :  { %v5028_v43 = vpop.permute.xlu2 %168 }
 0x174   :  { %v1038_v27 = vpop.permute.xlu0 %1037  ;;  %1307 = vperm.xlu0 %4324, %v4552_v18  }
 0x175   :  { %v1104_v58 = vmul.f32 %v5010_v39, %v1038_v27  ;;  %4259 = vset.pattern.permute.xlu1 %v6653_v2  ;;  %v196_v27 = vmul.f32 %v4852_v19, %v6701_v28  ;;  %v800_v28 = vmul.f32 %v4887_v62, %v728_v36 }
 0x176   :  { %v5033_v35 = vpop.permute.xlu1 %1343  ;;  %1240 = vperm.xlu1 %4259, %v4569_v22  }
 0x177   :  { %v5036_v5 = vadd.f32 %v1104_v58, %v978_v13 }
 0x178   :  { %4260 = vset.pattern.permute.xlu2 %v6671_v10 }
 0x179   :  { %73 = vperm.xlu2 %4260, %v4662_v45  }
 0x17b   :  { %v5040_v63 = vpop.permute.xlu2 %258 }
 0x17c   :  { %v5042_v29 = vpop.permute.xlu0 %1089  ;;  %1363 = vperm.xlu0 %4324, %v6694_v6   ;;  %v372_v6 = vadd.f32 %v347_v38, %v196_v27  ;;  %v6707_v38 = vld [vmem:[#allocation7_spill] sm:$0xff] }
 0x17d   :  { %6693 = vst [vmem:[#allocation61_spill] sm:$0xff] %v5042_v29  ;;  %v350_v27 = vmul.f32 %v4849_v1, %v6707_v38 }
 0x17e   :  { %4261 = vset.pattern.permute.xlu1 %v6671_v10 }
 0x17f   :  { %v5046_v44 = vpop.permute.xlu1 %938  ;;  %153 = vperm.xlu1 %4261, %v6696_v30   ;;  %v6704_v30 = vld [vmem:[#allocation33_spill] sm:$0xff] }
 0x180   :  { %6695 = vst [vmem:[#allocation6_spill] sm:$0xff] %v5046_v44  ;;  %v498_v47 = vmul.f32 %v4862_v56, %v6704_v30 }
 0x181   :  { %158 = vperm.xlu2 %4260, %v6697_v46  }
 0x182   :  { %v523_v31 = vadd.f32 %v498_v47, %v372_v6  ;;  %v6709_v47 = vld [vmem:[#allocation12_spill] sm:$0xff] }
 0x183   :  { %v501_v36 = vmul.f32 %v4862_v56, %v6709_v47  ;;  %v5109_v47 = vld [vmem:[%s6587_s1 + $0x8] ss:$0 sm:$0xff] }
 0x184   :  { %v5050_v48 = vpop.permute.xlu2 %564  ;;  %v1030_v23 = vpop.permute.xlu0 %1029  ;;  %v674_v30 = vadd.f32 %v649_v33, %v523_v31  ;;  %v6710_v31 = vld [vmem:[#allocation15_spill] sm:$0xff] }
 0x185   :  { %6698 = vst [vmem:[#allocation5_spill] sm:$0xff] %v5050_v48  ;;  %v199_v48 = vmul.f32 %v4852_v19, %v6706_v20 }
 0x186   :  { %v825_v29 = vadd.f32 %v800_v28, %v674_v30  ;;  %v6712_v28 = vld [vmem:[#allocation14_spill] sm:$0xff] }
 0x187   :  { %4262 = vset.pattern.permute.xlu1 %v6699_v0 }
 0x188   :  { %v5053_v42 = vpop.permute.xlu1 %163  ;;  %246 = vperm.xlu1 %4262, %v4662_v45  }
 0x189   :  { %4263 = vset.pattern.permute.xlu2 %v6699_v0 }
 0x18a   :  { %250 = vperm.xlu2 %4263, %v4552_v18  }
 0x18c   :  { %v5062_v13 = vpop.permute.xlu2 %628  ;;  %v5064_v58 = vpop.permute.xlu0 %1009 }
 0x18d   :  { %6702 = vst [vmem:[#allocation31_spill] sm:$0xff] %v5062_v13  ;;  %v375_v13 = vadd.f32 %v350_v27, %v199_v48  ;;  %v652_v48 = vmul.f32 %v4877_v26, %v6710_v31  ;;  %v803_v27 = vmul.f32 %v4887_v62, %v6712_v28 }
 0x18e   :  { %6703 = vst [vmem:[#allocation32_spill] sm:$0xff] %v5064_v58 }
 0x18f   :  { %v526_v38 = vadd.f32 %v501_v36, %v375_v13  ;;  %v6714_v13 = vld [vmem:[#allocation37_spill] sm:$0xff] }
 0x190   :  { %314 = vperm.xlu1 %4262, %v6697_v46  }
 0x191   :  { %v5071_v41 = vpop.permute.xlu1 %254  ;;  %v677_v30 = vadd.f32 %v652_v48, %v526_v38  ;;  %v1408_v48 = vmul.f32 %v5109_v47, %v4984_v7 }
 0x192   :  { %6705 = vst [vmem:[#allocation21_spill] sm:$0xff] %v5071_v41  ;;  %4265 = vset.pattern.permute.xlu2 %v6682_v4  ;;  %v1102_v41 = vmul.f32 %v5010_v39, %v1030_v23 }
 0x193   :  { %556 = vperm.xlu2 %4265, %v4824_v57  }
 0x194   :  { %v5080_v58 = vpop.permute.xlu0 %1005 }
 0x195   :  { %6708 = vst [vmem:[#allocation33_spill] sm:$0xff] %v5080_v58  ;;  %v879_v60 = vpop.permute.xlu2 %878  ;;  %v6752_v58 = vld [vmem:[#allocation51_spill] sm:$0xff] }
 0x196   :  { %v951_v20 = vmul.f32 %v4941_v51, %v879_v60 }
 0x198   :  { %v976_v6 = vadd.f32 %v951_v20, %v825_v29  ;;  %4266 = vset.pattern.permute.xlu1 %v6682_v4  ;;  %v5098_v29 = vperm.slane %v4843_v54, 7  ;;  %v6713_v20 = vld [vmem:[#allocation27_spill] sm:$0xff]  ;;  %v828_v54 = vadd.f32 %v803_v27, %v677_v30  ;;  %v5127_v30 = vld [vmem:[%s6588_s2] ss:$0 sm:$0xff] }
 0x199   :  { %v323_v44 = vpop.permute.xlu1 %322  ;;  %560 = vperm.xlu1 %4266, %v4542_v17  }
 0x19a   :  { %v5088_v33 = vadd.f32 %v1102_v41, %v976_v6  ;;  %v954_v41 = vmul.f32 %v4941_v51, %v6713_v20  ;;  %v1257_v36 = vmul.f32 %v5098_v29, %v4956_v37  ;;  %v6715_v6 = vld [vmem:[#allocation44_spill] sm:$0xff] }
 0x19b   :  { %620 = vperm.xlu2 %4265, %v4495_v11   ;;  %v1106_v11 = vmul.f32 %v5010_v39, %v6714_v13  ;;  %v1105_v38 = vmul.f32 %v5010_v39, %v6715_v6  ;;  %v1407_v6 = vmul.f32 %v5109_v47, %v5033_v35 }
 0x19c   :  { %v5093_v23 = vpop.permute.xlu0 %993  ;;  %v979_v20 = vadd.f32 %v954_v41, %v828_v54 }
 0x19d   :  { %6711 = vst [vmem:[#allocation16_spill] sm:$0xff] %v5093_v23  ;;  %v1131_v31 = vadd.f32 %v1106_v11, %v4951_v40 }
 0x19e   :  { %v5100_v60 = vpop.permute.xlu2 %1188  ;;  %v1130_v27 = vadd.f32 %v1105_v38, %v979_v20  ;;  %v359_v38 = vmul.f32 %v4849_v1, %v323_v44  ;;  %v812_v44 = vmul.f32 %v4887_v62, %v4913_v59 }
 0x19f   :  { %v1282_v13 = vadd.f32 %v1257_v36, %v1131_v31 }
 0x1a1   :  { %4267 = vset.pattern.permute.xlu1 %v6670_v34  ;;  %v1433_v40 = vadd.f32 %v1408_v48, %v1282_v13  ;;  %v208_v13 = vmul.f32 %v4852_v19, %v5028_v43 }
 0x1a2   :  { %v5119_v28 = vpop.permute.xlu1 %568  ;;  %866 = vperm.xlu1 %4267, %v4689_v53  }
 0x1a3   :  { %4268 = vset.pattern.permute.xlu2 %v6670_v34  ;;  %v1462_v41 = vadd.f32 %v5127_v30, %v1433_v40 }
 0x1a4   :  { %870 = vperm.xlu2 %4268, %v4697_v55  }
 0x1a5   :  { %v1193_v37 = vpop.permute.xlu0 %1192  ;;  %v1487_v20 = vmax.f32 %v1462_v41, 0.0 }
 0x1a6   :  { %v1256_v7 = vmul.f32 %v5098_v29, %v1193_v37 }
 0x1a7   :  { %v5130_v11 = vpop.permute.xlu2 %409 }
 0x1a8   :  { %v1281_v23 = vadd.f32 %v1256_v7, %v1130_v27  ;;  %v6716_v27 = vld [vmem:[#allocation42_spill] sm:$0xff] }
 0x1a9   :  { %v661_v40 = vmul.f32 %v4877_v26, %v6716_v27  ;;  %v648_v27 = vmul.f32 %v4877_v26, %v4923_v25 }
 0x1aa   :  { %v1432_v36 = vadd.f32 %v1407_v6, %v1281_v23  ;;  %930 = vperm.xlu1 %4267, %v4534_v16   ;;  %v384_v23 = vadd.f32 %v359_v38, %v208_v13  ;;  %v6721_v13 = vld [vmem:[#allocation34_spill] sm:$0xff] }
 0x1ab   :  { %v875_v54 = vpop.permute.xlu1 %874 }
 0x1ac   :  { %v1461_v31 = vadd.f32 %v5127_v30, %v1432_v36  ;;  %934 = vperm.xlu2 %4268, %v4485_v9   ;;  %v6718_v36 = vld [vmem:[#allocation8_spill] sm:$0xff]  ;;  %v950_v25 = vmul.f32 %v4941_v51, %v875_v54  ;;  %v6726_v54 = vld [vmem:[#allocation47_spill] sm:$0xff] }
 0x1ad   :  { %v1177_v48 = vpop.permute.xlu0 %1176  ;;  %v346_v38 = vmul.f32 %v4849_v1, %v6718_v36  ;;  %v6724_v36 = vld [vmem:[#allocation30_spill] sm:$0xff] }
 0x1ae   :  { %v1486_v37 = vmax.f32 %v1461_v31, 0.0  ;;  %v6719_v31 = vld [vmem:[#allocation28_spill] sm:$0xff] }
 0x1af   :  { %v474_v35 = vpop.permute.xlu2 %473  ;;  %v195_v59 = vmul.f32 %v4852_v19, %v6719_v31  ;;  %v6725_v31 = vld [vmem:[#allocation17_spill] sm:$0xff] }
 0x1b0   :  { %v5143_v7 = vpack.c.bf16 %v1487_v20, %v1486_v37  ;;  %v510_v16 = vmul.f32 %v4862_v56, %v474_v35 }
 0x1b1   :  { %v371_v35 = vadd.f32 %v346_v38, %v195_v59  ;;  %v1259_v38 = vmul.f32 %v5098_v29, %v6724_v36  ;;  %v1107_v59 = vmul.f32 %v5010_v39, %v6725_v31 }
 0x1b2   :  { %6717 = vst [vmem:[#allocation7_spill] sm:$0xff] %v5143_v7  ;;  %v535_v6 = vadd.f32 %v510_v16, %v384_v23  ;;  %4269 = vset.pattern.permute.xlu1 %v6653_v2  ;;  %v6722_v23 = vld [vmem:[#allocation18_spill] sm:$0xff] }
 0x1b3   :  { %1180 = vperm.xlu1 %4269, %v4581_v24   ;;  %v497_v24 = vmul.f32 %v4862_v56, %v6721_v13  ;;  %v956_v16 = vmul.f32 %v4941_v51, %v6722_v23  ;;  %v1284_v13 = vadd.f32 %v1259_v38, %v5022_v61  ;;  %v1252_v23 = vmul.f32 %v5098_v29, %v1177_v48 }
 0x1b4   :  { %v686_v9 = vadd.f32 %v661_v40, %v535_v6  ;;  %4270 = vset.pattern.permute.xlu2 %v6667_v32  ;;  %v5151_v43 = vpop.permute.xlu1 %1184  ;;  %v799_v40 = vmul.f32 %v4887_v62, %v4953_v49 }
 0x1b5   :  { %1391 = vperm.xlu2 %4270, %v4569_v22   ;;  %v5154_v41 = vpop.permute.xlu0 %1232  ;;  %v522_v22 = vadd.f32 %v497_v24, %v371_v35  ;;  %v981_v49 = vadd.f32 %v956_v16, %v4895_v12  ;;  %v6727_v12 = vld [vmem:[#allocation36_spill] sm:$0xff] }
 0x1b6   :  { %v5160_v20 = vadd.f32 %v812_v44, %v686_v9 }
 0x1b7   :  { %v673_v9 = vadd.f32 %v648_v27, %v522_v22  ;;  %v1132_v22 = vadd.f32 %v1107_v59, %v981_v49 }
 0x1b8   :  { %6720 = vst [vmem:[#allocation12_spill] sm:$0xff] %v5160_v20  ;;  %v5164_v37 = vpop.permute.xlu2 %779 }
 0x1bb   :  { %4271 = vset.pattern.permute.xlu1 %v6659_v3 }
 0x1bc   :  { %397 = vperm.xlu1 %4271, %v4662_v45   ;;  %v824_v45 = vadd.f32 %v799_v40, %v673_v9  ;;  %v1258_v40 = vmul.f32 %v5098_v29, %v6727_v12 }
 0x1bd   :  { %4272 = vset.pattern.permute.xlu2 %v6659_v3  ;;  %v5175_v44 = vpop.permute.xlu1 %405  ;;  %v5177_v6 = vpop.permute.xlu0 %1208 }
 0x1be   :  { %6723 = vst [vmem:[#allocation15_spill] sm:$0xff] %v5177_v6  ;;  %401 = vperm.xlu2 %4272, %v4552_v18   ;;  %v975_v35 = vadd.f32 %v950_v25, %v824_v45  ;;  %v1410_v18 = vmul.f32 %v5109_v47, %v6726_v54  ;;  %v1283_v48 = vadd.f32 %v1258_v40, %v1132_v22  ;;  %v6731_v22 = vld [vmem:[#allocation29_spill] sm:$0xff] }
 0x1c0   :  { %v1435_v16 = vadd.f32 %v1410_v18, %v1284_v13  ;;  %v5216_v18 = vld [vmem:[%s6586_s0 + $0xa0] sm:$0xff] }
 0x1c1   :  { %v1026_v24 = vpop.permute.xlu2 %1025 }
 0x1c2   :  { %v1101_v27 = vmul.f32 %v5010_v39, %v1026_v24  ;;  %v1464_v38 = vadd.f32 %v5127_v30, %v1435_v16  ;;  %v6728_v24 = vld [vmem:[#allocation9_spill] sm:$0xff]  ;;  %v6732_v16 = vld [vmem:[#allocation24_spill] sm:$0xff] }
 0x1c4   :  { %v1126_v6 = vadd.f32 %v1101_v27, %v975_v35  ;;  %465 = vperm.xlu1 %4271, %v6697_v46   ;;  %v1489_v59 = vmax.f32 %v1464_v38, 0.0  ;;  %v6729_v35 = vld [vmem:[#allocation10_spill] sm:$0xff] }
 0x1c5   :  { %v5194_v9 = vpop.permute.xlu1 %469 }
 0x1c6   :  { %4273 = vset.pattern.permute.xlu2 %v6654_v14  ;;  %v1352_v61 = vpop.permute.xlu0 %1351  ;;  %v5197_v25 = vadd.f32 %v1252_v23, %v1126_v6  ;;  %v197_v6 = vmul.f32 %v4852_v19, %v6728_v24  ;;  %v348_v23 = vmul.f32 %v4849_v1, %v6729_v35  ;;  %v1255_v24 = vmul.f32 %v5098_v29, %v5100_v60 }
 0x1c7   :  { %v1409_v36 = vmul.f32 %v5109_v47, %v1352_v61  ;;  %707 = vperm.xlu2 %4273, %v4824_v57   ;;  %v650_v61 = vmul.f32 %v4877_v26, %v6732_v16 }
 0x1c8   :  { %v373_v12 = vadd.f32 %v348_v23, %v197_v6  ;;  %v1103_v23 = vmul.f32 %v5010_v39, %v4963_v21 }
 0x1c9   :  { %v1434_v49 = vadd.f32 %v1409_v36, %v1283_v48  ;;  %v6733_v36 = vld [vmem:[#allocation41_spill] sm:$0xff] }
 0x1ca   :  { %v1340_v31 = vpop.permute.xlu2 %1339  ;;  %v801_v38 = vmul.f32 %v4887_v62, %v6733_v36 }
 0x1cb   :  { %v1463_v45 = vadd.f32 %v5127_v30, %v1434_v49 }
 0x1cc   :  { %4274 = vset.pattern.permute.xlu1 %v6654_v14 }
 0x1cd   :  { %v1488_v13 = vmax.f32 %v1463_v45, 0.0  ;;  %711 = vperm.xlu1 %4274, %v4542_v17   ;;  %v499_v17 = vmul.f32 %v4862_v56, %v6731_v22 }
 0x1ce   :  { %v5209_v27 = vpop.permute.xlu1 %719 }
 0x1cf   :  { %v5211_v54 = vpack.c.bf16 %v1489_v59, %v1488_v13  ;;  %771 = vperm.xlu2 %4273, %v5216_v18   ;;  %v524_v48 = vadd.f32 %v499_v17, %v373_v12  ;;  %v952_v13 = vmul.f32 %v4941_v51, %v4943_v8  ;;  %v1280_v12 = vadd.f32 %v1255_v24, %v5036_v5  ;;  %v5261_v5 = vld [vmem:[%s6586_s0 + $0xb8] sm:$0xff] }
 0x1d0   :  { %v1254_v8 = vmul.f32 %v5098_v29, %v5151_v43 }
 0x1d1   :  { %6730 = vst [vmem:[#allocation14_spill] sm:$0xff] %v5211_v54  ;;  %1569 = vmatpush.bf16.msra.mxu0 %v5211_v54  ;;  %1684 = vmatpush.bf16.msra.mxu2 %v5211_v54  ;;  %v675_v59 = vadd.f32 %v650_v61, %v524_v48  ;;  %v6734_v48 = vld [vmem:[#allocation23_spill] sm:$0xff] }
 0x1d2   :  { %v190_v36 = vmul.f32 %v4852_v19, %v6734_v48 }
 0x1d3   :  { %v5223_v40 = vpop.permute.xlu2 %73  ;;  %v826_v35 = vadd.f32 %v801_v38, %v675_v59 }
 0x1d5   :  { %1570 = vmatpush.bf16.msra.mxu0 %v5143_v7  ;;  %1685 = vmatpush.bf16.msra.mxu2 %v5143_v7  ;;  %v977_v17 = vadd.f32 %v952_v13, %v826_v35 }
 0x1d6   :  { %4275 = vset.pattern.permute.xlu1 %v6662_v15  ;;  %v784_v49 = vpop.permute.xlu1 %783 }
 0x1d7   :  { %v814_v45 = vmul.f32 %v4887_v62, %v784_v49  ;;  %1017 = vperm.xlu1 %4275, %v4689_v53   ;;  %4276 = vset.pattern.permute.xlu2 %v6662_v15  ;;  %v1406_v53 = vmul.f32 %v5109_v47, %v1340_v31  ;;  %v1128_v60 = vadd.f32 %v1103_v23, %v977_v17  ;;  %v4336_v23 = vld [vmem:[%s6586_s0 + $0x48] sm:$0xff] }
 0x1d8   :  { %1021 = vperm.xlu2 %4276, %v4697_v55   ;;  %v5254_v55 = vld [vmem:[%s6586_s0 + $0xb0] sm:$0xff] }
 0x1d9   :  { %v5241_v6 = vadd.f32 %v814_v45, %v5005_v52  ;;  %v1431_v16 = vadd.f32 %v1406_v53, %v1280_v12  ;;  %v1279_v52 = vadd.f32 %v1254_v8, %v1128_v60  ;;  %v6736_v17 = vld [vmem:[#allocation22_spill] sm:$0xff]  ;;  %v6737_v60 = vld [vmem:[#allocation11_spill] sm:$0xff] }
 0x1da   :  { %v5288_v8 = vld [vmem:[%s6586_s0 + $0x8] sm:$0xff] }
 0x1db   :  { %v5246_v22 = vpop.permute.xlu2 %158  ;;  %v1460_v43 = vadd.f32 %v5127_v30, %v1431_v16  ;;  %v358_v16 = vmul.f32 %v4849_v1, %v6737_v60 }
 0x1dd   :  { %v1485_v59 = vmax.f32 %v1460_v43, 0.0 }
 0x1df   :  { %1081 = vperm.xlu1 %4275, %v5254_v55   ;;  %v1336_v21 = vpop.permute.xlu1 %1335 }
 0x1e0   :  { %v1405_v31 = vmul.f32 %v5109_v47, %v1336_v21  ;;  %1085 = vperm.xlu2 %4276, %v5261_v5   ;;  %v6738_v21 = vld [vmem:[#allocation13_spill] sm:$0xff] }
 0x1e2   :  { %v1430_v61 = vadd.f32 %v1405_v31, %v1279_v52  ;;  %v356_v52 = vmul.f32 %v4849_v1, %v6738_v21  ;;  %v207_v31 = vmul.f32 %v4852_v19, %v5053_v42 }
 0x1e4   :  { %v1459_v38 = vadd.f32 %v5127_v30, %v1430_v61  ;;  %v251_v49 = vpop.permute.xlu2 %250  ;;  %v6739_v61 = vld [vmem:[#allocation35_spill] sm:$0xff] }
 0x1e5   :  { %v341_v45 = vmul.f32 %v4849_v1, %v251_v49  ;;  %v507_v48 = vmul.f32 %v4862_v56, %v6739_v61  ;;  %v383_v49 = vadd.f32 %v358_v16, %v207_v31  ;;  %v189_v16 = vmul.f32 %v4852_v19, %v5223_v40  ;;  %v6740_v31 = vld [vmem:[#allocation19_spill] sm:$0xff]  ;;  %v6741_v61 = vld [vmem:[#allocation25_spill] sm:$0xff] }
 0x1e6   :  { %v1484_v13 = vmax.f32 %v1459_v38, 0.0  ;;  %v5332_v40 = vld [vmem:[%s6586_s0 + $0x88] sm:$0xff] }
 0x1e7   :  { %v5269_v24 = vadd.f32 %v341_v45, %v190_v36  ;;  %4277 = vset.pattern.permute.xlu1 %v6667_v32  ;;  %v509_v36 = vmul.f32 %v4862_v56, %v5194_v9 }
 0x1e8   :  { %v5272_v35 = vpack.c.bf16 %v1485_v59, %v1484_v13  ;;  %1331 = vperm.xlu1 %4277, %v4336_v23   ;;  %4278 = vset.pattern.permute.xlu2 %v6671_v10  ;;  %v5278_v53 = vpop.permute.xlu1 %1240 }
 0x1e9   :  { %63 = vperm.xlu2 %4278, %v6736_v17   ;;  %v534_v13 = vadd.f32 %v509_v36, %v383_v49  ;;  %v6743_v49 = vld [vmem:[#allocation40_spill] sm:$0xff] }
 0x1ea   :  { %6735 = vst [vmem:[#allocation27_spill] sm:$0xff] %v5272_v35  ;;  %1571 = vmatpush.bf16.msra.mxu0 %v5272_v35  ;;  %1686 = vmatpush.bf16.msra.mxu2 %v5272_v35 }
 0x1ed   :  { %v5283_v12 = vpop.permute.xlu2 %556 }
 0x1f0   :  { %4279 = vset.pattern.permute.xlu1 %v6671_v10 }
 0x1f1   :  { %68 = vperm.xlu1 %4279, %v5288_v8   ;;  %143 = vperm.xlu2 %4278, %v4677_v50   ;;  %v154_v43 = vpop.permute.xlu1 %153 }
 0x1f2   :  { %v205_v38 = vmul.f32 %v4852_v19, %v154_v43  ;;  %v362_v43 = vmul.f32 %v4849_v1, %v6740_v31 }
 0x1f4   :  { %v381_v45 = vadd.f32 %v356_v52, %v205_v38 }
 0x1f5   :  { %v621_v59 = vpop.permute.xlu2 %620 }
 0x1f6   :  { %v660_v42 = vmul.f32 %v4877_v26, %v621_v59  ;;  %v5305_v23 = vadd.f32 %v507_v48, %v381_v45  ;;  %v211_v48 = vmul.f32 %v4852_v19, %v6741_v61  ;;  %v664_v45 = vmul.f32 %v4877_v26, %v6743_v49 }
 0x1f8   :  { %v5307_v60 = vadd.f32 %v660_v42, %v534_v13  ;;  %v387_v38 = vadd.f32 %v362_v43, %v211_v48  ;;  %v206_v13 = vmul.f32 %v4852_v19, %v5246_v22  ;;  %v343_v48 = vmul.f32 %v4849_v1, %v5040_v63 }
 0x1f9   :  { %4281 = vset.pattern.permute.xlu1 %v6699_v0  ;;  %4282 = vset.pattern.permute.xlu2 %v6699_v0  ;;  %v6742_v0 = vld [vmem:[#allocation39_spill] sm:$0xff] }
 0x1fa   :  { %238 = vperm.xlu1 %4281, %v6736_v17   ;;  %242 = vperm.xlu2 %4282, %v5288_v8   ;;  %v247_v9 = vpop.permute.xlu1 %246  ;;  %v513_v17 = vmul.f32 %v4862_v56, %v6742_v0  ;;  %v6746_v0 = vld [vmem:[#allocation6_spill] sm:$0xff] }
 0x1fb   :  { %v340_v21 = vmul.f32 %v4849_v1, %v247_v9  ;;  %v966_v49 = vmul.f32 %v4941_v51, %v6746_v0 }
 0x1fc   :  { %v538_v9 = vadd.f32 %v513_v17, %v387_v38  ;;  %v494_v17 = vmul.f32 %v4862_v56, %v5130_v11  ;;  %v6747_v38 = vld [vmem:[#allocation46_spill] sm:$0xff] }
 0x1fd   :  { %v5316_v52 = vadd.f32 %v340_v21, %v189_v16  ;;  %v6744_v16 = vld [vmem:[#allocation53_spill] sm:$0xff] }
 0x1fe   :  { %v5322_v36 = vpop.permute.xlu2 %870  ;;  %v815_v21 = vmul.f32 %v4887_v62, %v6744_v16  ;;  %v689_v61 = vadd.f32 %v664_v45, %v538_v9  ;;  %v6749_v9 = vld [vmem:[#allocation61_spill] sm:$0xff] }
 0x202   :  { %302 = vperm.xlu1 %4281, %v4677_v50   ;;  %306 = vperm.xlu2 %4282, %v5332_v40   ;;  %v315_v59 = vpop.permute.xlu1 %314  ;;  %v6745_v50 = vld [vmem:[#allocation20_spill] sm:$0xff] }
 0x203   :  { %v357_v42 = vmul.f32 %v4849_v1, %v315_v59  ;;  %v192_v43 = vmul.f32 %v4852_v19, %v6745_v50  ;;  %v840_v59 = vadd.f32 %v815_v21, %v689_v61  ;;  %v1117_v50 = vmul.f32 %v5010_v39, %v6749_v9  ;;  %v5367_v21 = vld [vmem:[%s6586_s0 + $0x18] sm:$0xff] }
 0x205   :  { %v5340_v31 = vadd.f32 %v357_v42, %v206_v13  ;;  %v344_v13 = vmul.f32 %v4849_v1, %v6747_v38  ;;  %v6748_v42 = vld [vmem:[#allocation49_spill] sm:$0xff]  ;;  %v368_v63 = vadd.f32 %v343_v48, %v192_v43  ;;  %v991_v0 = vadd.f32 %v966_v49, %v840_v59 }
 0x206   :  { %v935_v10 = vpop.permute.xlu2 %934  ;;  %v193_v16 = vmul.f32 %v4852_v19, %v6748_v42  ;;  %v1268_v48 = vmul.f32 %v5098_v29, %v5278_v53  ;;  %v6751_v59 = vld [vmem:[#allocation5_spill] sm:$0xff] }
 0x207   :  { %v965_v22 = vmul.f32 %v4941_v51, %v935_v10  ;;  %v6750_v10 = vld [vmem:[#allocation58_spill] sm:$0xff]  ;;  %v519_v61 = vadd.f32 %v494_v17, %v368_v63  ;;  %v646_v38 = vmul.f32 %v4877_v26, %v6751_v59  ;;  %v1142_v42 = vadd.f32 %v1117_v50, %v991_v0  ;;  %v6756_v59 = vld [vmem:[#allocation60_spill] sm:$0xff] }
 0x208   :  { %v495_v11 = vmul.f32 %v4862_v56, %v6750_v10  ;;  %v797_v17 = vmul.f32 %v4887_v62, %v6752_v58 }
 0x209   :  { %v5356_v45 = vadd.f32 %v965_v22, %v5241_v6  ;;  %v5373_v6 = vld [vmem:[%s6586_s0 + $0x90] sm:$0xff]  ;;  %v369_v22 = vadd.f32 %v344_v13, %v193_v16  ;;  %v1293_v7 = vadd.f32 %v1268_v48, %v1142_v42  ;;  %v5416_v42 = vld [vmem:[%s6586_s0 + $0xa8] sm:$0xff] }
 0x20a   :  { %4283 = vset.pattern.permute.xlu1 %v6682_v4  ;;  %4284 = vset.pattern.permute.xlu2 %v6682_v4  ;;  %v6755_v48 = vld [vmem:[#allocation50_spill] sm:$0xff] }
 0x20b   :  { %552 = vperm.xlu1 %4283, %v5367_v21   ;;  %612 = vperm.xlu2 %4284, %v5373_v6   ;;  %v561_v43 = vpop.permute.xlu1 %560  ;;  %v520_v10 = vadd.f32 %v495_v11, %v369_v22  ;;  %v6753_v11 = vld [vmem:[#allocation31_spill] sm:$0xff] }
 0x20c   :  { %v645_v49 = vmul.f32 %v4877_v26, %v561_v43  ;;  %v6754_v43 = vld [vmem:[#allocation21_spill] sm:$0xff] }
 0x20d   :  { %v671_v63 = vadd.f32 %v646_v38, %v520_v10  ;;  %v191_v38 = vmul.f32 %v4852_v19, %v6756_v59 }
 0x20e   :  { %v5381_v9 = vadd.f32 %v645_v49, %v519_v61 }
 0x20f   :  { %v1392_v35 = vpop.permute.xlu2 %1391  ;;  %v822_v16 = vadd.f32 %v797_v17, %v671_v63 }
 0x210   :  { %v1419_v54 = vmul.f32 %v5109_v47, %v1392_v35  ;;  %v662_v35 = vmul.f32 %v4877_v26, %v6753_v11 }
 0x212   :  { %v1444_v20 = vadd.f32 %v1419_v54, %v1293_v7  ;;  %v687_v49 = vadd.f32 %v662_v35, %v6755_v48  ;;  %v4341_v35 = vld [vmem:[%s6586_s0 + $0x38] sm:$0xff] }
 0x213   :  { %616 = vperm.xlu1 %4283, %v6697_v46   ;;  %4285 = vset.pattern.permute.xlu2 %v6670_v34  ;;  %v813_v46 = vmul.f32 %v4887_v62, %v5164_v37  ;;  %v493_v37 = vmul.f32 %v4862_v56, %v5175_v44 }
 0x214   :  { %v1473_v53 = vadd.f32 %v5127_v30, %v1444_v20  ;;  %858 = vperm.xlu2 %4285, %v4824_v57   ;;  %v867_v13 = vpop.permute.xlu1 %866  ;;  %v342_v57 = vmul.f32 %v4849_v1, %v6754_v43 }
 0x215   :  { %v948_v50 = vmul.f32 %v4941_v51, %v867_v13  ;;  %v838_v10 = vadd.f32 %v813_v46, %v687_v49 }
 0x216   :  { %v1498_v0 = vmax.f32 %v1473_v53, 0.0  ;;  %v367_v63 = vadd.f32 %v342_v57, %v191_v38  ;;  %v644_v53 = vmul.f32 %v4877_v26, %v5283_v12  ;;  %v5438_v12 = vld [vmem:[%s6586_s0 + $0x30] sm:$0xff] }
 0x217   :  { %v5393_v58 = vadd.f32 %v948_v50, %v822_v16  ;;  %v6759_v57 = vld [vmem:[#allocation55_spill] sm:$0xff] }
 0x218   :  { %v1511_v7 = vpack.c.bf16 %v1498_v0, %v1498_v0  ;;  %v402_v54 = vpop.permute.xlu2 %401  ;;  %v518_v13 = vadd.f32 %v493_v37, %v367_v63  ;;  %v496_v48 = vmul.f32 %v4862_v56, %v6759_v57  ;;  %v647_v37 = vmul.f32 %v4877_v26, %v5119_v28  ;;  %v5460_v63 = vld [vmem:[%s6586_s0] sm:$0xff] }
 0x219   :  { %v492_v20 = vmul.f32 %v4862_v56, %v402_v54  ;;  %v6757_v54 = vld [vmem:[#allocation52_spill] sm:$0xff]  ;;  %v6760_v28 = vld [vmem:[#allocation45_spill] sm:$0xff] }
 0x21a   :  { %v5400_v61 = vsel %vm1565_vm0, %v1511_v7, 0  ;;  %v669_v50 = vadd.f32 %v644_v53, %v518_v13  ;;  %v345_v46 = vmul.f32 %v4849_v1, %v6757_v54  ;;  %v5478_v57 = vld [vmem:[%s6586_s0 + $0x80] sm:$0xff] }
 0x21b   :  { %v5404_v22 = vadd.f32 %v492_v20, %v5269_v24  ;;  %1600 = vmatpush.bf16.msra.mxu1 %v5400_v61  ;;  %1715 = vmatpush.bf16.msra.mxu3 %v5400_v61  ;;  %v6758_v20 = vld [vmem:[#allocation43_spill] sm:$0xff] }
 0x21c   :  { %4286 = vset.pattern.permute.xlu1 %v6670_v34  ;;  %926 = vperm.xlu2 %4285, %v5416_v42   ;;  %v931_v24 = vpop.permute.xlu1 %930  ;;  %v194_v43 = vmul.f32 %v4852_v19, %v6758_v20 }
 0x21d   :  { %922 = vperm.xlu1 %4286, %v5216_v18   ;;  %v964_v17 = vmul.f32 %v4941_v51, %v931_v24 }
 0x21e   :  { %v370_v38 = vadd.f32 %v345_v46, %v194_v43 }
 0x21f   :  { %v5423_v44 = vadd.f32 %v964_v17, %v838_v10  ;;  %v798_v17 = vmul.f32 %v4887_v62, %v5209_v27 }
 0x220   :  { %v521_v10 = vadd.f32 %v496_v48, %v370_v38 }
 0x221   :  { %v708_v16 = vpop.permute.xlu2 %707 }
 0x222   :  { %v795_v0 = vmul.f32 %v4887_v62, %v708_v16  ;;  %v672_v13 = vadd.f32 %v647_v37, %v521_v10  ;;  %v949_v16 = vmul.f32 %v4941_v51, %v5322_v36  ;;  %v6761_v37 = vld [vmem:[#allocation56_spill] sm:$0xff] }
 0x223   :  { %v947_v10 = vmul.f32 %v4941_v51, %v6761_v37 }
 0x224   :  { %v5426_v11 = vadd.f32 %v795_v0, %v669_v50  ;;  %4288 = vset.pattern.permute.xlu2 %v6653_v2  ;;  %v823_v50 = vadd.f32 %v798_v17, %v672_v13 }
 0x225   :  { %4287 = vset.pattern.permute.xlu1 %v6653_v2  ;;  %1172 = vperm.xlu2 %4288, %v4341_v35   ;;  %v5433_v7 = vpop.permute.xlu1 %1180 }
 0x226   :  { %1168 = vperm.xlu1 %4287, %v5438_v12   ;;  %v974_v54 = vadd.f32 %v949_v16, %v823_v50 }
 0x229   :  { %v772_v49 = vpop.permute.xlu2 %771 }
 0x22a   :  { %v811_v59 = vmul.f32 %v4887_v62, %v772_v49 }
 0x22c   :  { %v5451_v24 = vadd.f32 %v811_v59, %v5307_v60  ;;  %v642_v60 = vmul.f32 %v4877_v26, %v6760_v28 }
 0x22d   :  { %4289 = vset.pattern.permute.xlu2 %v6659_v3 }
 0x22e   :  { %1236 = vperm.xlu1 %4287, %v5261_v5   ;;  %389 = vperm.xlu2 %4289, %v5460_v63   ;;  %v398_v53 = vpop.permute.xlu1 %397 }
 0x22f   :  { %v491_v27 = vmul.f32 %v4862_v56, %v398_v53 }
 0x231   :  { %v516_v0 = vadd.f32 %v491_v27, %v5316_v52 }
 0x232   :  { %v1022_v35 = vpop.permute.xlu2 %1021 }
 0x233   :  { %v1100_v46 = vmul.f32 %v5010_v39, %v1022_v35  ;;  %v5470_v20 = vadd.f32 %v642_v60, %v516_v0  ;;  %v5508_v60 = vld [vmem:[%s6586_s0 + $0x98] sm:$0xff]  ;;  %v1266_v35 = vmul.f32 %v5098_v29, %v5154_v41 }
 0x235   :  { %v5472_v43 = vadd.f32 %v1100_v46, %v974_v54  ;;  %v1328_v54 = vpop.permute.xlu0 %1327 }
 0x236   :  { %4290 = vset.pattern.permute.xlu1 %v6659_v3  ;;  %453 = vperm.xlu2 %4289, %v5478_v57   ;;  %v466_v36 = vpop.permute.xlu1 %465 }
 0x237   :  { %393 = vperm.xlu1 %4290, %v5288_v8   ;;  %v508_v52 = vmul.f32 %v4862_v56, %v466_v36 }
 0x239   :  { %v5484_v48 = vadd.f32 %v508_v52, %v5340_v31  ;;  %v5498_v31 = vld [vmem:[%s6586_s0 + $0x10] sm:$0xff]  ;;  %v1403_v52 = vmul.f32 %v5109_v47, %v1328_v54 }
 0x23a   :  { %v1086_v49 = vpop.permute.xlu2 %1085 }
 0x23b   :  { %v1116_v59 = vmul.f32 %v5010_v39, %v1086_v49 }
 0x23d   :  { %v5488_v3 = vadd.f32 %v1116_v59, %v5356_v45  ;;  %v1253_v59 = vmul.f32 %v5098_v29, %v5433_v7 }
 0x23e   :  { %4293 = vset.pattern.permute.xlu2 %v6654_v14 }
 0x23f   :  { %4292 = vset.pattern.permute.xlu1 %v6654_v14  ;;  %703 = vperm.xlu2 %4293, %v5367_v21   ;;  %v712_v38 = vpop.permute.xlu1 %711  ;;  %v1278_v37 = vadd.f32 %v1253_v59, %v5088_v33 }
 0x240   :  { %699 = vperm.xlu1 %4292, %v5498_v31   ;;  %v796_v45 = vmul.f32 %v4887_v62, %v712_v38  ;;  %v1428_v38 = vadd.f32 %v1403_v52, %v5197_v25 }
 0x242   :  { %v821_v17 = vadd.f32 %v796_v45, %v5381_v9  ;;  %v5524_v9 = vld [vmem:[%s6586_s0 + $0x28] sm:$0xff] }
 0x243   :  { %v64_v53 = vpop.permute.xlu2 %63 }
 0x244   :  { %v5503_v28 = vadd.f32 %v947_v10, %v821_v17  ;;  %v6762_v10 = vld [vmem:[#allocation26_spill] sm:$0xff] }
 0x245   :  { %v204_v45 = vmul.f32 %v4852_v19, %v6762_v10 }
 0x247   :  { %767 = vperm.xlu2 %4293, %v5508_v60  }
 0x248   :  { %763 = vperm.xlu1 %4292, %v5373_v6  }
 0x249   :  { %v1018_v13 = vpop.permute.xlu1 %1017 }
 0x24a   :  { %v1099_v16 = vmul.f32 %v5010_v39, %v1018_v13  ;;  %v6763_v13 = vld [vmem:[#allocation38_spill] sm:$0xff] }
 0x24b   :  { %v5513_v27 = vpop.permute.xlu2 %143  ;;  %v506_v7 = vmul.f32 %v4862_v56, %v6763_v13 }
 0x24c   :  { %v5516_v50 = vadd.f32 %v1099_v16, %v5393_v58  ;;  %v1457_v16 = vadd.f32 %v5127_v30, %v1428_v38 }
 0x24e   :  { %v1482_v54 = vmax.f32 %v1457_v16, 0.0 }
 0x24f   :  { %4295 = vset.pattern.permute.xlu2 %v6662_v15 }
 0x250   :  { %4294 = vset.pattern.permute.xlu1 %v6662_v15  ;;  %1073 = vperm.xlu2 %4295, %v5216_v18  }
 0x251   :  { %1013 = vperm.xlu1 %4294, %v5524_v9   ;;  %v1082_v0 = vpop.permute.xlu1 %1081 }
 0x252   :  { %v1115_v58 = vmul.f32 %v5010_v39, %v1082_v0 }
 0x254   :  { %v1140_v46 = vadd.f32 %v1115_v58, %v5423_v44  ;;  %v243_v36 = vpop.permute.xlu2 %242 }
 0x256   :  { %v5532_v49 = vadd.f32 %v1266_v35, %v1140_v46  ;;  %v339_v46 = vmul.f32 %v4849_v1, %v243_v36  ;;  %v187_v36 = vmul.f32 %v4852_v19, %v64_v53 }
 0x258   :  { %4296 = vset.pattern.permute.xlu2 %v6667_v32 }
 0x259   :  { %1077 = vperm.xlu1 %4294, %v5416_v42   ;;  %1319 = vperm.xlu2 %4296, %v5438_v12  }
 0x25a   :  { %v1332_v41 = vpop.permute.xlu1 %1331 }
 0x25b   :  { %v1404_v44 = vmul.f32 %v5109_v47, %v1332_v41 }
 0x25c   :  { %v307_v17 = vpop.permute.xlu2 %306 }
 0x25d   :  { %v1429_v0 = vadd.f32 %v1404_v44, %v1278_v37  ;;  %v355_v25 = vmul.f32 %v4849_v1, %v307_v17  ;;  %v6764_v17 = vld [vmem:[#allocation32_spill] sm:$0xff] }
 0x25e   :  { %v1097_v13 = vmul.f32 %v5010_v39, %v6764_v17 }
 0x25f   :  { %v1458_v35 = vadd.f32 %v5127_v30, %v1429_v0  ;;  %v380_v12 = vadd.f32 %v355_v25, %v204_v45  ;;  %v203_v0 = vmul.f32 %v4852_v19, %v5513_v27 }
 0x261   :  { %v1483_v58 = vmax.f32 %v1458_v35, 0.0  ;;  %4297 = vset.pattern.permute.xlu1 %v6667_v32  ;;  %1387 = vperm.xlu2 %4296, %v5261_v5   ;;  %v5551_v33 = vadd.f32 %v506_v7, %v380_v12 }
 0x262   :  { %1383 = vperm.xlu1 %4297, %v5254_v55  }
 0x263   :  { %v5555_v52 = vpack.c.bf16 %v1483_v58, %v1482_v54  ;;  %v69_v59 = vpop.permute.xlu1 %68  ;;  %v6765_v58 = vld [vmem:[#allocation12_spill] sm:$0xff] }
 0x264   :  { %v188_v38 = vmul.f32 %v4852_v19, %v69_v59 }
 0x265   :  { %1572 = vmatpush.bf16.msra.mxu0 %v5555_v52  ;;  %1687 = vmatpush.bf16.msra.mxu2 %v5555_v52  ;;  %v613_v41 = vpop.permute.xlu2 %612 }
 0x266   :  { %v5560_v37 = vadd.f32 %v339_v46, %v188_v38  ;;  %v658_v5 = vmul.f32 %v4877_v26, %v613_v41 }
 0x268   :  { %v5564_v44 = vadd.f32 %v658_v5, %v5305_v23 }
 0x269   :  { %4299 = vset.pattern.permute.xlu2 %v6682_v4 }
 0x26a   :  { %4298 = vset.pattern.permute.xlu1 %v6682_v4  ;;  %544 = vperm.xlu2 %4299, %v5288_v8  }
 0x26b   :  { %540 = vperm.xlu1 %4298, %v5460_v63  }
 0x26c   :  { %v239_v55 = vpop.permute.xlu1 %238 }
 0x26d   :  { %v338_v10 = vmul.f32 %v4849_v1, %v239_v55 }
 0x26e   :  { %v859_v45 = vpop.permute.xlu2 %858 }
 0x26f   :  { %v363_v7 = vadd.f32 %v338_v10, %v187_v36  ;;  %v946_v23 = vmul.f32 %v4941_v51, %v859_v45 }
 0x271   :  { %v971_v16 = vadd.f32 %v946_v23, %v5426_v11 }
 0x272   :  { %4301 = vset.pattern.permute.xlu2 %v6670_v34 }
 0x273   :  { %608 = vperm.xlu1 %4298, %v5332_v40   ;;  %850 = vperm.xlu2 %4301, %v5498_v31   ;;  %v5579_v4 = vadd.f32 %v1097_v13, %v971_v16  ;;  %v6766_v13 = vld [vmem:[#allocation48_spill] sm:$0xff] }
 0x274   :  { %v303_v53 = vpop.permute.xlu1 %302  ;;  %v656_v23 = vmul.f32 %v4877_v26, %v6766_v13 }
 0x275   :  { %v354_v25 = vmul.f32 %v4849_v1, %v303_v53  ;;  %v4348_v1 = vld [vmem:[%s6586_s0 + $0x20] sm:$0xff] }
 0x276   :  { %v927_v35 = vpop.permute.xlu2 %926 }
 0x277   :  { %v379_v12 = vadd.f32 %v354_v25, %v203_v0  ;;  %v963_v54 = vmul.f32 %v4941_v51, %v927_v35 }
 0x279   :  { %v5586_v11 = vadd.f32 %v963_v54, %v6765_v58 }
 0x27b   :  { %4302 = vset.pattern.permute.xlu1 %v6670_v34  ;;  %914 = vperm.xlu2 %4301, %v5373_v6  }
 0x27c   :  { %854 = vperm.xlu1 %4302, %v5367_v21  }
 0x27d   :  { %v553_v46 = vpop.permute.xlu1 %552 }
 0x27e   :  { %v643_v59 = vmul.f32 %v4877_v26, %v553_v46 }
 0x27f   :  { %v1173_v38 = vpop.permute.xlu2 %1172 }
 0x280   :  { %v668_v19 = vadd.f32 %v643_v59, %v5404_v22 }
 0x283   :  { %4304 = vset.pattern.permute.xlu2 %v6653_v2 }
 0x284   :  { %4303 = vset.pattern.permute.xlu1 %v6653_v2  ;;  %1164 = vperm.xlu2 %4304, %v5524_v9  }
 0x285   :  { %1160 = vperm.xlu1 %4303, %v4348_v1   ;;  %v617_v27 = vpop.permute.xlu1 %616 }
 0x286   :  { %v659_v41 = vmul.f32 %v4877_v26, %v617_v27  ;;  %v1251_v27 = vmul.f32 %v5098_v29, %v1173_v38 }
 0x288   :  { %v684_v5 = vadd.f32 %v659_v41, %v5484_v48  ;;  %v390_v55 = vpop.permute.xlu2 %389 }
 0x289   :  { %v489_v36 = vmul.f32 %v4862_v56, %v390_v55 }
 0x28b   :  { %v5602_v22 = vadd.f32 %v489_v36, %v363_v7  ;;  %v1324_v36 = vpop.permute.xlu0 %1323 }
 0x28c   :  { %1228 = vperm.xlu2 %4304, %v5416_v42   ;;  %v1402_v13 = vmul.f32 %v5109_v47, %v1324_v36 }
 0x28d   :  { %1224 = vperm.xlu1 %4303, %v5216_v18  }
 0x28f   :  { %v923_v10 = vpop.permute.xlu1 %922 }
 0x290   :  { %v962_v45 = vmul.f32 %v4941_v51, %v923_v10  ;;  %v454_v17 = vpop.permute.xlu2 %453 }
 0x291   :  { %v505_v16 = vmul.f32 %v4862_v56, %v454_v17  ;;  %v1276_v17 = vadd.f32 %v1251_v27, %v5472_v43 }
 0x292   :  { %v987_v48 = vadd.f32 %v962_v45, %v5451_v24 }
 0x293   :  { %v530_v53 = vadd.f32 %v505_v16, %v379_v12  ;;  %v6767_v12 = vld [vmem:[#allocation57_spill] sm:$0xff]  ;;  %v1427_v38 = vadd.f32 %v1402_v13, %v1276_v17 }
 0x294   :  { %4307 = vset.pattern.permute.xlu2 %v6654_v14  ;;  %v961_v54 = vmul.f32 %v4941_v51, %v6767_v12 }
 0x295   :  { %4306 = vset.pattern.permute.xlu1 %v6654_v14  ;;  %755 = vperm.xlu2 %4307, %v5478_v57   ;;  %v5614_v7 = vadd.f32 %v656_v23, %v530_v53 }
 0x296   :  { %695 = vperm.xlu1 %4306, %v5288_v8  }
 0x298   :  { %v1169_v18 = vpop.permute.xlu1 %1168 }
 0x299   :  { %v704_v0 = vpop.permute.xlu2 %703 }
 0x29a   :  { %v794_v25 = vmul.f32 %v4887_v62, %v704_v0  ;;  %v1456_v0 = vadd.f32 %v5127_v30, %v1427_v38 }
 0x29c   :  { %v5618_v35 = vadd.f32 %v794_v25, %v668_v19 }
 0x29d   :  { %4308 = vset.pattern.permute.xlu2 %v6662_v15 }
 0x29e   :  { %759 = vperm.xlu1 %4306, %v5332_v40   ;;  %1001 = vperm.xlu2 %4308, %v5498_v31  }
 0x2a0   :  { %v1237_v24 = vpop.permute.xlu1 %1236 }
 0x2a1   :  { %v768_v14 = vpop.permute.xlu2 %767 }
 0x2a2   :  { %v810_v58 = vmul.f32 %v4887_v62, %v768_v14 }
 0x2a4   :  { %v835_v46 = vadd.f32 %v810_v58, %v684_v5 }
 0x2a6   :  { %4309 = vset.pattern.permute.xlu1 %v6662_v15  ;;  %1069 = vperm.xlu2 %4308, %v5508_v60   ;;  %v5628_v59 = vadd.f32 %v961_v54, %v835_v46 }
 0x2a7   :  { %1065 = vperm.xlu1 %4309, %v5373_v6  }
 0x2a9   :  { %v394_v19 = vpop.permute.xlu1 %393 }
 0x2aa   :  { %v490_v41 = vmul.f32 %v4862_v56, %v394_v19  ;;  %v1074_v55 = vpop.permute.xlu2 %1073  ;;  %v1250_v56 = vmul.f32 %v5098_v29, %v1169_v18 }
 0x2ab   :  { %v1113_v10 = vmul.f32 %v5010_v39, %v1074_v55  ;;  %v1267_v55 = vmul.f32 %v5098_v29, %v1237_v24 }
 0x2ac   :  { %v515_v45 = vadd.f32 %v490_v41, %v5560_v37 }
 0x2ad   :  { %v5635_v5 = vadd.f32 %v1113_v10, %v987_v48  ;;  %v1275_v48 = vadd.f32 %v1250_v56, %v5516_v50  ;;  %v1292_v13 = vadd.f32 %v1267_v55, %v5488_v3 }
 0x2ae   :  { %4311 = vset.pattern.permute.xlu2 %v6667_v32 }
 0x2af   :  { %4310 = vset.pattern.permute.xlu1 %v6667_v32  ;;  %1315 = vperm.xlu2 %4311, %v5524_v9  }
 0x2b0   :  { %1311 = vperm.xlu1 %4310, %v4348_v1   ;;  %v1481_v1 = vmax.f32 %v1456_v0, 0.0 }
 0x2b2   :  { %v700_v23 = vpop.permute.xlu1 %699 }
 0x2b3   :  { %v793_v16 = vmul.f32 %v4887_v62, %v700_v23  ;;  %v1320_v37 = vpop.permute.xlu2 %1319 }
 0x2b4   :  { %v1401_v43 = vmul.f32 %v5109_v47, %v1320_v37 }
 0x2b5   :  { %v818_v53 = vadd.f32 %v793_v16, %v5470_v20 }
 0x2b6   :  { %v1426_v25 = vadd.f32 %v1401_v43, %v1275_v48 }
 0x2b7   :  { %4312 = vset.pattern.permute.xlu2 %v6670_v34 }
 0x2b8   :  { %v1455_v9 = vadd.f32 %v5127_v30, %v1426_v25  ;;  %1379 = vperm.xlu1 %4310, %v5416_v42   ;;  %842 = vperm.xlu2 %4312, %v5460_v63  }
 0x2ba   :  { %v1480_v18 = vmax.f32 %v1455_v9, 0.0  ;;  %v764_v14 = vpop.permute.xlu1 %763 }
 0x2bb   :  { %v809_v50 = vmul.f32 %v4887_v62, %v764_v14  ;;  %v1388_v12 = vpop.permute.xlu2 %1387 }
 0x2bc   :  { %v5653_v54 = vpack.c.bf16 %v1481_v1, %v1480_v18 }
 0x2bd   :  { %v834_v20 = vadd.f32 %v809_v50, %v5564_v44 }
 0x2be   :  { %1573 = vmatpush.bf16.msra.mxu0 %v5653_v54  ;;  %1688 = vmatpush.bf16.msra.mxu2 %v5653_v54 }
 0x2c0   :  { %4313 = vset.pattern.permute.xlu1 %v6670_v34  ;;  %906 = vperm.xlu2 %4312, %v5478_v57  }
 0x2c1   :  { %846 = vperm.xlu1 %4313, %v5288_v8  }
 0x2c3   :  { %v1014_v42 = vpop.permute.xlu1 %1013 }
 0x2c4   :  { %v1098_v58 = vmul.f32 %v5010_v39, %v1014_v42  ;;  %v545_v46 = vpop.permute.xlu2 %544 }
 0x2c5   :  { %v641_v19 = vmul.f32 %v4877_v26, %v545_v46 }
 0x2c6   :  { %v5664_v27 = vadd.f32 %v1098_v58, %v5503_v28 }
 0x2c7   :  { %v5666_v44 = vadd.f32 %v641_v19, %v515_v45  ;;  %v1418_v45 = vmul.f32 %v5109_v47, %v1388_v12  ;;  %v6769_v12 = vld [vmem:[#allocation33_spill] sm:$0xff] }
 0x2c8   :  { %4316 = vset.pattern.permute.xlu2 %v6653_v2 }
 0x2c9   :  { %4315 = vset.pattern.permute.xlu1 %v6653_v2  ;;  %1156 = vperm.xlu2 %4316, %v5367_v21   ;;  %v1443_v21 = vadd.f32 %v1418_v45, %v1292_v13  ;;  %v6770_v45 = vld [vmem:[#allocation59_spill] sm:$0xff] }
 0x2ca   :  { %1152 = vperm.xlu1 %4315, %v5498_v31  }
 0x2cb   :  { %v1078_v34 = vpop.permute.xlu1 %1077  ;;  %v1472_v23 = vadd.f32 %v5127_v30, %v1443_v21 }
 0x2cc   :  { %v1114_v41 = vmul.f32 %v5010_v39, %v1078_v34 }
 0x2cd   :  { %v851_v36 = vpop.permute.xlu2 %850  ;;  %v1497_v3 = vmax.f32 %v1472_v23, 0.0 }
 0x2ce   :  { %v5675_v10 = vadd.f32 %v1114_v41, %v5586_v11  ;;  %v944_v28 = vmul.f32 %v4941_v51, %v851_v36 }
 0x2d0   :  { %v5679_v17 = vadd.f32 %v944_v28, %v818_v53 }
 0x2d1   :  { %1220 = vperm.xlu2 %4316, %v5508_v60  }
 0x2d2   :  { %1216 = vperm.xlu1 %4315, %v5373_v6  }
 0x2d4   :  { %v1384_v56 = vpop.permute.xlu1 %1383 }
 0x2d5   :  { %v1417_v24 = vmul.f32 %v5109_v47, %v1384_v56  ;;  %v915_v38 = vpop.permute.xlu2 %914 }
 0x2d6   :  { %v960_v11 = vmul.f32 %v4941_v51, %v915_v38 }
 0x2d7   :  { %v1442_v16 = vadd.f32 %v1417_v24, %v5532_v49 }
 0x2d8   :  { %v5688_v37 = vadd.f32 %v960_v11, %v834_v20  ;;  %v1096_v20 = vmul.f32 %v5010_v39, %v6769_v12 }
 0x2d9   :  { %v1471_v48 = vadd.f32 %v5127_v30, %v1442_v16  ;;  %4319 = vset.pattern.permute.xlu2 %v6662_v15  ;;  %v6768_v30 = vld [vmem:[#allocation54_spill] sm:$0xff] }
 0x2da   :  { %4318 = vset.pattern.permute.xlu1 %v6662_v15  ;;  %1057 = vperm.xlu2 %4319, %v5478_v57   ;;  %v791_v25 = vmul.f32 %v4887_v62, %v6768_v30 }
 0x2db   :  { %v1496_v43 = vmax.f32 %v1471_v48, 0.0  ;;  %997 = vperm.xlu1 %4318, %v5288_v8   ;;  %v5760_v48 = vld [vmem:[%s6587_s1 + $0x8] ss:$0 sm:$0xff] }
 0x2dd   :  { %v5695_v47 = vpack.c.bf16 %v1497_v3, %v1496_v43  ;;  %v541_v53 = vpop.permute.xlu1 %540 }
 0x2de   :  { %v640_v0 = vmul.f32 %v4877_v26, %v541_v53  ;;  %v1165_v49 = vpop.permute.xlu2 %1164 }
 0x2df   :  { %1601 = vmatpush.bf16.msra.mxu1 %v5695_v47  ;;  %1716 = vmatpush.bf16.msra.mxu3 %v5695_v47 }
 0x2e0   :  { %v665_v15 = vadd.f32 %v640_v0, %v5602_v22 }
 0x2e2   :  { %4320 = vset.pattern.permute.xlu2 %v6667_v32  ;;  %v816_v9 = vadd.f32 %v791_v25, %v665_v15  ;;  %v1376_v25 = vpop.permute.xlu0 %1375 }
 0x2e3   :  { %1061 = vperm.xlu1 %4318, %v5332_v40   ;;  %1303 = vperm.xlu2 %4320, %v5498_v31  }
 0x2e5   :  { %v609_v1 = vpop.permute.xlu1 %608 }
 0x2e6   :  { %v657_v18 = vmul.f32 %v4877_v26, %v609_v1  ;;  %v5707_v14 = vpop.permute.xlu2 %1228 }
 0x2e8   :  { %v682_v50 = vadd.f32 %v657_v18, %v5551_v33 }
 0x2eb   :  { %4321 = vset.pattern.permute.xlu1 %v6667_v32  ;;  %1371 = vperm.xlu2 %4320, %v5508_v60  }
 0x2ec   :  { %1367 = vperm.xlu1 %4321, %v5373_v6  }
 0x2ee   :  { %v855_v22 = vpop.permute.xlu1 %854 }
 0x2ef   :  { %v945_v42 = vmul.f32 %v4941_v51, %v855_v22  ;;  %v756_v31 = vpop.permute.xlu2 %755 }
 0x2f0   :  { %v807_v58 = vmul.f32 %v4887_v62, %v756_v31 }
 0x2f1   :  { %v970_v26 = vadd.f32 %v945_v42, %v5618_v35 }
 0x2f2   :  { %v832_v46 = vadd.f32 %v807_v58, %v5614_v7 }
 0x2f3   :  { %4323 = vset.pattern.permute.xlu2 %v6653_v2  ;;  %v5720_v33 = vadd.f32 %v1096_v20, %v970_v26  ;;  %v1265_v20 = vmul.f32 %v5098_v29, %v5707_v14 }
 0x2f4   :  { %4322 = vset.pattern.permute.xlu1 %v6653_v2  ;;  %1148 = vperm.xlu2 %4323, %v5288_v8  }
 0x2f5   :  { %1144 = vperm.xlu1 %4322, %v5460_v63  }
 0x2f7   :  { %v1161_v6 = vpop.permute.xlu1 %1160 }
 0x2f8   :  { %v5725_v60 = vpop.permute.xlu2 %1001  ;;  %v1248_v0 = vmul.f32 %v5098_v29, %v1161_v6 }
 0x2fc   :  { %4325 = vset.pattern.permute.xlu2 %v6667_v32 }
 0x2fd   :  { %1212 = vperm.xlu1 %4322, %v5332_v40   ;;  %1295 = vperm.xlu2 %4325, %v5460_v63  }
 0x2ff   :  { %v1225_v7 = vpop.permute.xlu1 %1224 }
 0x300   :  { %v1070_v35 = vpop.permute.xlu2 %1069  ;;  %v1264_v30 = vmul.f32 %v5098_v29, %v1225_v7 }
 0x301   :  { %v1112_v19 = vmul.f32 %v5010_v39, %v1070_v35 }
 0x302   :  { %v1289_v18 = vadd.f32 %v1264_v30, %v5635_v5  ;;  %v1290_v5 = vadd.f32 %v1265_v20, %v5675_v10 }
 0x303   :  { %v5732_v34 = vadd.f32 %v1112_v19, %v5628_v59  ;;  %v959_v59 = vmul.f32 %v4941_v51, %v6770_v45  ;;  %v1308_v45 = vpop.permute.xlu0 %1307 }
 0x305   :  { %4326 = vset.pattern.permute.xlu1 %v6667_v32  ;;  %1359 = vperm.xlu2 %4325, %v5478_v57   ;;  %v6771_v57 = vld [vmem:[#allocation16_spill] sm:$0xff] }
 0x306   :  { %1299 = vperm.xlu1 %4326, %v5288_v8   ;;  %v1093_v8 = vmul.f32 %v5010_v39, %v6771_v57  ;;  %v1095_v57 = vmul.f32 %v5010_v39, %v5725_v60 }
 0x308   :  { %v696_v2 = vpop.permute.xlu1 %695 }
 0x309   :  { %v792_v41 = vmul.f32 %v4887_v62, %v696_v2  ;;  %v1316_v55 = vpop.permute.xlu2 %1315 }
 0x30a   :  { %v1400_v3 = vmul.f32 %v5760_v48, %v1316_v55 }
 0x30b   :  { %v5739_v40 = vadd.f32 %v792_v41, %v5666_v44 }
 0x310   :  { %v760_v63 = vpop.permute.xlu1 %759 }
 0x311   :  { %v808_v36 = vmul.f32 %v4887_v62, %v760_v63  ;;  %v1249_v62 = vmul.f32 %v5098_v29, %v1165_v49 }
 0x312   :  { %v843_v28 = vpop.permute.xlu2 %842 }
 0x313   :  { %v833_v13 = vadd.f32 %v808_v36, %v682_v50  ;;  %v942_v32 = vmul.f32 %v4941_v51, %v843_v28  ;;  %v1274_v53 = vadd.f32 %v1249_v62, %v5664_v27  ;;  %v1415_v50 = vmul.f32 %v5760_v48, %v1376_v25  ;;  %v5773_v27 = vld [vmem:[%s6588_s2] ss:$0 sm:$0xff] }
 0x315   :  { %v967_v21 = vadd.f32 %v942_v32, %v816_v9  ;;  %v5747_v56 = vadd.f32 %v959_v59, %v833_v13  ;;  %v1425_v49 = vadd.f32 %v1400_v3, %v1274_v53  ;;  %v1440_v42 = vadd.f32 %v1415_v50, %v1289_v18  ;;  %v6772_v59 = vld [vmem:[#allocation15_spill] sm:$0xff] }
 0x316   :  { %v1260_v13 = vmul.f32 %v5098_v29, %v6772_v59 }
 0x317   :  { %v5749_v24 = vadd.f32 %v1093_v8, %v967_v21  ;;  %v1454_v22 = vadd.f32 %v5773_v27, %v1425_v49  ;;  %v1469_v35 = vadd.f32 %v5773_v27, %v1440_v42  ;;  %v1398_v21 = vmul.f32 %v5760_v48, %v1308_v45 }
 0x319   :  { %v1066_v44 = vpop.permute.xlu1 %1065  ;;  %v1479_v31 = vmax.f32 %v1454_v22, 0.0  ;;  %v1494_v2 = vmax.f32 %v1469_v35, 0.0 }
 0x31a   :  { %v1111_v38 = vmul.f32 %v5010_v39, %v1066_v44  ;;  %v907_v11 = vpop.permute.xlu2 %906 }
 0x31b   :  { %v958_v23 = vmul.f32 %v4941_v51, %v907_v11  ;;  %v1120_v11 = vadd.f32 %v1095_v57, %v5679_v17 }
 0x31c   :  { %v5755_v16 = vadd.f32 %v1111_v38, %v5688_v37  ;;  %v1273_v37 = vadd.f32 %v1248_v0, %v5579_v4 }
 0x31d   :  { %v983_v43 = vadd.f32 %v958_v23, %v832_v46 }
 0x322   :  { %v1312_v15 = vpop.permute.xlu1 %1311 }
 0x323   :  { %v1399_v9 = vmul.f32 %v5760_v48, %v1312_v15  ;;  %v1157_v1 = vpop.permute.xlu2 %1156 }
 0x324   :  { %v1247_v36 = vmul.f32 %v5098_v29, %v1157_v1 }
 0x325   :  { %v1424_v12 = vadd.f32 %v1399_v9, %v1273_v37 }
 0x326   :  { %v1272_v8 = vadd.f32 %v1247_v36, %v5720_v33 }
 0x327   :  { %v1453_v4 = vadd.f32 %v5773_v27, %v1424_v12 }
 0x328   :  { %v1423_v62 = vadd.f32 %v1398_v21, %v1272_v8 }
 0x329   :  { %v1478_v58 = vmax.f32 %v1453_v4, 0.0 }
 0x32a   :  { %v1380_v26 = vpop.permute.xlu1 %1379 }
 0x32b   :  { %v5780_v46 = vpack.c.bf16 %v1479_v31, %v1478_v58  ;;  %v1416_v6 = vmul.f32 %v5760_v48, %v1380_v26  ;;  %v1221_v7 = vpop.permute.xlu2 %1220 }
 0x32c   :  { %v1263_v18 = vmul.f32 %v5098_v29, %v1221_v7 }
 0x32d   :  { %v1441_v19 = vadd.f32 %v1416_v6, %v1290_v5  ;;  %1574 = vmatpush.bf16.msra.mxu0 %v5780_v46  ;;  %1689 = vmatpush.bf16.msra.mxu2 %v5780_v46 }
 0x32e   :  { %v1288_v22 = vadd.f32 %v1263_v18, %v5732_v34 }
 0x32f   :  { %v1470_v14 = vadd.f32 %v5773_v27, %v1441_v19 }
 0x331   :  { %v1495_v41 = vmax.f32 %v1470_v14, 0.0 }
 0x333   :  { %v5787_v55 = vpack.c.bf16 %v1495_v41, %v1494_v2  ;;  %v847_v63 = vpop.permute.xlu1 %846 }
 0x334   :  { %v1058_v10 = vpop.permute.xlu2 %1057  ;;  %v943_v41 = vmul.f32 %v4941_v51, %v847_v63 }
 0x335   :  { %1602 = vmatpush.bf16.msra.mxu1 %v5787_v55  ;;  %1717 = vmatpush.bf16.msra.mxu3 %v5787_v55  ;;  %v1109_v28 = vmul.f32 %v5010_v39, %v1058_v10  ;;  %v1364_v10 = vpop.permute.xlu0 %1363 }
 0x336   :  { %v1412_v57 = vmul.f32 %v5760_v48, %v1364_v10  ;;  %v968_v21 = vadd.f32 %v943_v41, %v5739_v40  ;;  %v3580_v40 = vld [vmem:[%s6589_s3 + $0x8] sm:$0xf0]  ;;  %v4104_v41 = vld [vmem:[%s6589_s3 + $0x4c] sm:$0xf0] }
 0x337   :  { %v1134_v32 = vadd.f32 %v1109_v28, %v983_v43  ;;  %v1452_v43 = vadd.f32 %v5773_v27, %v1423_v62 }
 0x339   :  { %v1285_v44 = vadd.f32 %v1260_v13, %v1134_v32  ;;  %v1477_v33 = vmax.f32 %v1452_v43, 0.0 }
 0x33c   :  { %v1153_v38 = vpop.permute.xlu1 %1152 }
 0x33d   :  { %v1246_v23 = vmul.f32 %v5098_v29, %v1153_v38  ;;  %v1304_v3 = vpop.permute.xlu2 %1303 }
 0x33e   :  { %v1397_v53 = vmul.f32 %v5760_v48, %v1304_v3 }
 0x33f   :  { %v1271_v0 = vadd.f32 %v1246_v23, %v1120_v11 }
 0x341   :  { %v1422_v30 = vadd.f32 %v1397_v53, %v1271_v0  ;;  %v4101_v0 = vld [vmem:[%s6589_s3 + $0x3c] sm:$0xf] }
 0x343   :  { %v1451_v60 = vadd.f32 %v5773_v27, %v1422_v30 }
 0x344   :  { %v1217_v49 = vpop.permute.xlu1 %1216 }
 0x345   :  { %v1476_v25 = vmax.f32 %v1451_v60, 0.0  ;;  %v1372_v17 = vpop.permute.xlu2 %1371  ;;  %v1262_v12 = vmul.f32 %v5098_v29, %v1217_v49  ;;  %v4100_v60 = vld [vmem:[%s6590_s4] sm:$0xff] }
 0x346   :  { %v1414_v50 = vmul.f32 %v5760_v48, %v1372_v17 }
 0x347   :  { %v5804_v15 = vpack.c.bf16 %v1477_v33, %v1476_v25  ;;  %v1287_v42 = vadd.f32 %v1262_v12, %v5755_v16  ;;  %v6773_v12 = vld [vmem:[#allocation14_spill] sm:$0xff] }
 0x348   :  { %v1439_v20 = vadd.f32 %v1414_v50, %v1288_v22  ;;  %v3613_v22 = vld [vmem:[%s6589_s3 + $0x38] sm:$0xf] }
 0x349   :  { %1575 = vmatpush.bf16.msra.mxu0 %v5804_v15  ;;  %1690 = vmatpush.bf16.msra.mxu2 %v5804_v15 }
 0x34a   :  { %v1468_v26 = vadd.f32 %v5773_v27, %v1439_v20 }
 0x34c   :  { %v1493_v35 = vmax.f32 %v1468_v26, 0.0  ;;  %v3588_v26 = vld [vmem:[%s6589_s3 + $0x18] sm:$0xf0] }
 0x34d   :  { %v998_v37 = vpop.permute.xlu1 %997 }
 0x34e   :  { %v1149_v9 = vpop.permute.xlu2 %1148  ;;  %v1094_v32 = vmul.f32 %v5010_v39, %v998_v37 }
 0x350   :  { %v1119_v62 = vadd.f32 %v1094_v32, %v968_v21  ;;  %v3631_v32 = vld [vmem:[%s6589_s3 + $0x60] sm:$0xf0]  ;;  %v3594_v21 = vld [vmem:[%s6589_s3 + $0x20] sm:$0xf] }
 0x355   :  { %v1062_v1 = vpop.permute.xlu1 %1061 }
 0x356   :  { %v1110_v16 = vmul.f32 %v5010_v39, %v1062_v1  ;;  %v4094_v39 = vld [vmem:[%s6589_s3 + $0x4] sm:$0xf]  ;;  %v4095_v1 = vld [vmem:[%s6589_s3 + $0x4] sm:$0xf0] }
 0x357   :  { %v1296_v31 = vpop.permute.xlu2 %1295  ;;  %v3583_v17 = vor.u32 %v4094_v39, %v3580_v40 }
 0x358   :  { %v1135_v45 = vadd.f32 %v1110_v16, %v5747_v56  ;;  %v1395_v38 = vmul.f32 %v5760_v48, %v1296_v31  ;;  %v1245_v56 = vmul.f32 %v5098_v29, %v1149_v9  ;;  %v6774_v31 = vld [vmem:[#allocation7_spill] sm:$0xff] }
 0x359   :  { %v4097_v16 = vld [vmem:[%s6589_s3 + $0x14] sm:$0xf0] }
 0x35a   :  { %v1270_v43 = vadd.f32 %v1245_v56, %v1119_v62  ;;  %v1518_v56 = vld [vmem:[%s6589_s3 + $0x30] sm:$0x11] }
 0x35e   :  { %v1368_v4 = vpop.permute.xlu1 %1367 }
 0x35f   :  { %v1413_v58 = vmul.f32 %v5760_v48, %v1368_v4  ;;  %v1360_v34 = vpop.permute.xlu2 %1359 }
 0x360   :  { %v1411_v2 = vmul.f32 %v5760_v48, %v1360_v34  ;;  %v3586_v34 = vld [vmem:[%s6589_s3 + $0x10] sm:$0xf] }
 0x361   :  { %v1438_v5 = vadd.f32 %v1413_v58, %v1287_v42  ;;  %v4096_v58 = vld [vmem:[%s6589_s3 + $0x14] sm:$0xf]  ;;  %v3587_v10 = vor.u32 %v4097_v16, %v3586_v34  ;;  %v4107_v34 = vld [vmem:[%s6590_s4 + $0x8] sm:$0xff] }
 0x362   :  { %v1436_v59 = vadd.f32 %v1411_v2, %v1285_v44  ;;  %v3621_v2 = vld [vmem:[%s6589_s3 + $0x48] sm:$0xf] }
 0x363   :  { %v1467_v6 = vadd.f32 %v5773_v27, %v1438_v5  ;;  %v4103_v5 = vld [vmem:[%s6589_s3 + $0x4c] sm:$0xf] }
 0x364   :  { %v1465_v63 = vadd.f32 %v5773_v27, %v1436_v59  ;;  %v3596_v59 = vld [vmem:[%s6589_s3 + $0x28] sm:$0xf0] }
 0x365   :  { %v1492_v7 = vmax.f32 %v1467_v6, 0.0  ;;  %v3623_v6 = vld [vmem:[%s6589_s3 + $0x50] sm:$0xf0] }
 0x366   :  { %v1490_v3 = vmax.f32 %v1465_v63, 0.0  ;;  %v4106_v63 = vld [vmem:[%s6589_s3 + $0x5c] sm:$0xf0] }
 0x367   :  { %v5816_v19 = vpack.c.bf16 %v1493_v35, %v1492_v7  ;;  %v1145_v14 = vpop.permute.xlu1 %1144  ;;  %v6775_v35 = vld [vmem:[#allocation27_spill] sm:$0xff]  ;;  %v3591_v7 = vor.u32 %v4096_v58, %v3588_v26 }
 0x368   :  { %v1244_v36 = vmul.f32 %v5098_v29, %v1145_v14  ;;  %v3626_v14 = vor.u32 %v4103_v5, %v3623_v6  ;;  %v4128_v5 = vld [vmem:[%s6590_s4 + $0x20] sm:$0xff] }
 0x369   :  { %1603 = vmatpush.bf16.msra.mxu1 %v5816_v19  ;;  %1718 = vmatpush.bf16.msra.mxu3 %v5816_v19  ;;  %v3663_v6 = vld [vmem:[%s6589_s3 + $0xa0] sm:$0x11] }
 0x36a   :  { %v1269_v51 = vadd.f32 %v1244_v36, %v5749_v24  ;;  %v3622_v36 = vor.u32 %v4104_v41, %v3621_v2  ;;  %v4114_v41 = vld [vmem:[%s6590_s4 + $0x10] sm:$0xff] }
 0x36c   :  { %v1420_v23 = vadd.f32 %v1395_v38, %v1269_v51  ;;  %v4099_v38 = vld [vmem:[%s6589_s3 + $0x24] sm:$0xf0]  ;;  %v3629_v51 = vld [vmem:[%s6589_s3 + $0x58] sm:$0xf] }
 0x36d   :  { %v3630_v62 = vor.u32 %v4106_v63, %v3629_v51 }
 0x36e   :  { %v1449_v33 = vadd.f32 %v5773_v27, %v1420_v23  ;;  %v1539_v23 = vunpack.c.h.b16 %v1518_v56 }
 0x36f   :  { %v1213_v28 = vpop.permute.xlu1 %1212 }
 0x370   :  { %v1261_v13 = vmul.f32 %v5098_v29, %v1213_v28  ;;  %v3615_v29 = vld [vmem:[%s6589_s3 + $0x40] sm:$0xf0]  ;;  %v1474_v18 = vmax.f32 %v1449_v33, 0.0  ;;  %v4121_v28 = vld [vmem:[%s6590_s4 + $0x18] sm:$0xff]  ;;  %v1547_v40 = vpack.c.b16 %v1539_v23, %v1539_v23 }
 0x371   :  { %v3618_v37 = vor.u32 %v4101_v0, %v3615_v29  ;;  %v3668_v33 = vld [vmem:[%s6589_s3 + $0x78] sm:$0xf0] }
 0x372   :  { %v1286_v8 = vadd.f32 %v1261_v13, %v1135_v45  ;;  %v4098_v45 = vld [vmem:[%s6589_s3 + $0x24] sm:$0xf]  ;;  %v4105_v13 = vld [vmem:[%s6589_s3 + $0x5c] sm:$0xf] }
 0x374   :  { %v1437_v11 = vadd.f32 %v1412_v57, %v1286_v8  ;;  %v3599_v57 = vor.u32 %v4098_v45, %v3596_v59  ;;  %v3634_v8 = vor.u32 %v4105_v13, %v3631_v32 }
 0x376   :  { %v1466_v44 = vadd.f32 %v5773_v27, %v1437_v11  ;;  %v3595_v11 = vor.u32 %v4099_v38, %v3594_v21 }
 0x378   :  { %v1491_v53 = vmax.f32 %v1466_v44, 0.0  ;;  %v1300_v24 = vpop.permute.xlu1 %1299  ;;  %v3610_v44 = vld [vmem:[%s6589_s3 + $0x68] sm:$0x11] }
 0x379   :  { %v1396_v30 = vmul.f32 %v5760_v48, %v1300_v24  ;;  %v3578_v48 = vld [vmem:[%s6589_s3] sm:$0xf]  ;;  %v1659_v39 = vunpack.c.h.b16 %v3610_v44  ;;  %v1658_v24 = vunpack.c.l.b16 %v3610_v44 }
 0x37a   :  { %v5850_v49 = vpack.c.bf16 %v1491_v53, %v1490_v3  ;;  %v3579_v4 = vor.u32 %v4095_v1, %v3578_v48  ;;  %v1538_v53 = vunpack.c.l.b16 %v1518_v56  ;;  %v4110_v48 = vld [vmem:[%s6589_s3 + $0x84] sm:$0xf]  ;;  %v3676_v1 = vld [vmem:[%s6589_s3 + $0x88] sm:$0xf0] }
 0x37b   :  { %v1421_v25 = vadd.f32 %v1396_v30, %v1270_v43  ;;  %v1667_v3 = vpack.c.b16 %v1659_v39, %v1659_v39  ;;  %v1666_v29 = vpack.c.b16 %v1658_v24, %v1658_v24  ;;  %v3666_v43 = vld [vmem:[%s6589_s3 + $0x70] sm:$0xf]  ;;  %v4109_v30 = vld [vmem:[%s6589_s3 + $0x74] sm:$0xf0] }
 0x37c   :  { %1604 = vmatpush.bf16.msra.mxu1 %v5850_v49  ;;  %1719 = vmatpush.bf16.msra.mxu3 %v5850_v49  ;;  %v1546_v0 = vpack.c.b16 %v1538_v53, %v1538_v53 }
 0x37d   :  { %v1450_v9 = vadd.f32 %v5773_v27, %v1421_v25  ;;  %v4102_v27 = vld [vmem:[%s6589_s3 + $0x3c] sm:$0xf0]  ;;  %v3667_v25 = vor.u32 %v4109_v30, %v3666_v43 }
 0x37e   :  { %v3614_v42 = vor.u32 %v4102_v27, %v3613_v22  ;;  %v3682_v22 = vld [vmem:[%s6589_s3 + $0x90] sm:$0xf]  ;;  %v4113_v27 = vld [vmem:[%s6589_s3 + $0x94] sm:$0xf0] }
 0x37f   :  { %v1475_v50 = vmax.f32 %v1450_v9, 0.0  ;;  %3600 = vmatmul.msk.bf16.vlgmr.msra.gmra.mxu1 %vm1552_vm1, %v3583_v17  ;;  %3635 = vmatmul.msk.bf16.vlgmr.msra.gmra.mxu3 %vm1552_vm1, %v3618_v37  ;;  %v3674_v37 = vld [vmem:[%s6589_s3 + $0x80] sm:$0xf]  ;;  %v4111_v9 = vld [vmem:[%s6589_s3 + $0x84] sm:$0xf0]  ;;  %v3683_v58 = vor.u32 %v4113_v27, %v3682_v22 }
 0x380   :  { %1819 = vmatpush.bf16.msrb.mxu3 %v4100_v60  ;;  %v4108_v60 = vld [vmem:[%s6589_s3 + $0x74] sm:$0xf]  ;;  %1773 = vmatpush.bf16.msrb.mxu1 %v4107_v34 }
 0x381   :  { %v5871_v20 = vpack.c.bf16 %v1475_v50, %v1474_v18  ;;  %v3671_v17 = vor.u32 %v4108_v60, %v3668_v33  ;;  %v3675_v18 = vor.u32 %v4111_v9, %v3674_v37  ;;  %v3679_v50 = vor.u32 %v4110_v48, %v3676_v1 }
 0x383   :  { %1576 = vmatpush.bf16.msra.mxu0 %v5871_v20  ;;  %1691 = vmatpush.bf16.msra.mxu2 %v5871_v20 }
 0x384   :  { %2062 = vmatpush.bf16.msra.mxu3 %v6773_v12  ;;  %1981 = vmatpush.bf16.msra.mxu1 %v4114_v41 }
 0x386   :  { %1577 = vmatmul.bf16.vlgmr.msra.gmra.mxu0 %v3579_v4  ;;  %1692 = vmatmul.bf16.vlgmr.msra.gmra.mxu2 %v3614_v42  ;;  %v4112_v4 = vld [vmem:[%s6589_s3 + $0x94] sm:$0xf]  ;;  %v3684_v42 = vld [vmem:[%s6589_s3 + $0x98] sm:$0xf0] }
 0x387   :  { %1893 = vmatpush.bf16.msrb.mxu0 %v6773_v12  ;;  %1924 = vmatpush.bf16.msrb.mxu2 %v5400_v61  ;;  %v3687_v26 = vor.u32 %v4112_v4, %v3684_v42 }
 0x388   :  { %2063 = vmatpush.bf16.msra.mxu3 %v6774_v31 }
 0x38b   :  { %1894 = vmatpush.bf16.msrb.mxu0 %v6774_v31  ;;  %1925 = vmatpush.bf16.msrb.mxu2 %v5695_v47 }
 0x38c   :  { %2064 = vmatpush.bf16.msra.mxu3 %v6775_v35 }
 0x38f   :  { %1895 = vmatpush.bf16.msrb.mxu0 %v6775_v35  ;;  %1926 = vmatpush.bf16.msrb.mxu2 %v5787_v55 }
 0x390   :  { %2065 = vmatpush.bf16.msra.mxu3 %v5555_v52  ;;  %3601 = vmatmul.msk.bf16.gmra.mxu1 %vm1552_vm1, %v3591_v7  ;;  %v1867_v7 = vunpack.c.l.b16 %v3663_v6 }
 0x391   :  { %3636 = vmatmul.msk.bf16.gmra.mxu3 %vm1552_vm1, %v3626_v14  ;;  %v1868_v14 = vunpack.c.h.b16 %v3663_v6 }
 0x392   :  { %v1875_v16 = vpack.c.b16 %v1867_v7, %v1867_v7 }
 0x393   :  { %1896 = vmatpush.bf16.msrb.mxu0 %v5555_v52  ;;  %1927 = vmatpush.bf16.msrb.mxu2 %v5816_v19  ;;  %v1876_v2 = vpack.c.b16 %v1868_v14, %v1868_v14 }
 0x394   :  { %2066 = vmatpush.bf16.msra.mxu3 %v5653_v54 }
 0x396   :  { %1582 = vmatmul.bf16.gmra.mxu0 %v3587_v10  ;;  %1697 = vmatmul.bf16.gmra.mxu2 %v3622_v36  ;;  %v4115_v36 = vld [vmem:[%s6589_s3 + $0xac] sm:$0xf] }
 0x397   :  { %1897 = vmatpush.bf16.msrb.mxu0 %v5653_v54  ;;  %1928 = vmatpush.bf16.msrb.mxu2 %v5850_v49 }
 0x398   :  { %2067 = vmatpush.bf16.msra.mxu3 %v5780_v46 }
 0x39b   :  { %1898 = vmatpush.bf16.msrb.mxu0 %v5780_v46  ;;  %2150 = vmatpush.bf16.msra.mxu2 %v4121_v28  ;;  %v3713_v28 = vld [vmem:[%s6589_s3 + $0xb0] sm:$0xf0] }
 0x39c   :  { %2068 = vmatpush.bf16.msra.mxu3 %v5804_v15  ;;  %v3716_v45 = vor.u32 %v4115_v36, %v3713_v28  ;;  %v4117_v28 = vld [vmem:[%s6589_s3 + $0xbc] sm:$0xf] }
 0x39f   :  { %1899 = vmatpush.bf16.msrb.mxu0 %v5804_v15 }
 0x3a0   :  { %2069 = vmatpush.bf16.msra.mxu3 %v5871_v20  ;;  %3602 = vmatmul.msk.bf16.gmra.mxu1 %vm1552_vm1, %v3599_v57 }
 0x3a1   :  { %3637 = vmatmul.msk.bf16.gmra.mxu3 %vm1552_vm1, %v3634_v8 }
 0x3a3   :  { %1900 = vmatpush.bf16.msrb.mxu0 %v5871_v20 }
 0x3a6   :  { %1587 = vmatmul.bf16.gmra.mxu0 %v3595_v11  ;;  %1702 = vmatmul.bf16.gmra.mxu2 %v3630_v62 }
 0x3a7   :  { %2093 = vmatpush.bf16.msra.mxu0 %v5400_v61 }
 0x3ab   :  { %2094 = vmatpush.bf16.msra.mxu0 %v5695_v47 }
 0x3af   :  { %2095 = vmatpush.bf16.msra.mxu0 %v5787_v55 }
 0x3b0   :  { %3603 = vmatmul.msk.bf16.gmra.mxu1 %vm1552_vm1, %v1547_v40 }
 0x3b1   :  { %3638 = vmatmul.msk.bf16.gmra.mxu3 %vm1552_vm1, %v1667_v3 }
 0x3b3   :  { %2096 = vmatpush.bf16.msra.mxu0 %v5816_v19 }
 0x3b6   :  { %1592 = vmatmul.bf16.gmra.mxu0 %v1546_v0  ;;  %1707 = vmatmul.bf16.gmra.mxu2 %v1666_v29 }
 0x3b7   :  { %2097 = vmatpush.bf16.msra.mxu0 %v5850_v49 }
 0x3c6   :  { %1901 = vmatmul.bf16.vlgmr.msrb.gmra.mxu0 %v3667_v25  ;;  %3688 = vmatmul.msk.bf16.vlgmr.msrb.gmra.mxu2 %vm1552_vm1, %v3671_v17 }
 0x3c7   :  { %2400 = vmatpush.bf16.msrb.mxu2 %v6773_v12  ;;  %2319 = vmatpush.bf16.msrb.mxu0 %v4128_v5 }
 0x3cb   :  { %2401 = vmatpush.bf16.msrb.mxu2 %v6774_v31 }
 0x3cf   :  { %2402 = vmatpush.bf16.msrb.mxu2 %v6775_v35 }
 0x3d3   :  { %2403 = vmatpush.bf16.msrb.mxu2 %v5555_v52 }
 0x3d6   :  { %1906 = vmatmul.bf16.gmra.mxu0 %v3675_v18  ;;  %3689 = vmatmul.msk.bf16.gmra.mxu2 %vm1552_vm1, %v3679_v50 }
 0x3d7   :  { %2404 = vmatpush.bf16.msrb.mxu2 %v5653_v54 }
 0x3db   :  { %2405 = vmatpush.bf16.msrb.mxu2 %v5780_v46 }
 0x3df   :  { %2406 = vmatpush.bf16.msrb.mxu2 %v5804_v15 }
 0x3e3   :  { %2407 = vmatpush.bf16.msrb.mxu2 %v5871_v20 }
 0x3e6   :  { %1911 = vmatmul.bf16.gmra.mxu0 %v3683_v58  ;;  %3690 = vmatmul.msk.bf16.gmra.mxu2 %vm1552_vm1, %v3687_v26 }
 0x3f6   :  { %1916 = vmatmul.bf16.gmra.mxu0 %v1875_v16  ;;  %3691 = vmatmul.msk.bf16.gmra.mxu2 %vm1552_vm1, %v1876_v2 }
 0x3fc   :  { %v1606_v10 = vpop.f32.mrf.mxu1 }
 0x402   :  { %v1721_v59 = vpop.f32.mrf.mxu3 }
 0x403   :  { %v1578_v13 = vpop.f32.mrf.mxu0 }
 0x404   :  { %v1608_v32 = vpop.f32.mrf.mxu1  ;;  %v1607_v38 = vadd.f32 %v1606_v10, %v1578_v13 }
 0x406   :  { %3733 = vmatmul.msk.bf16.vlgmr.msra.gmra.mxu0 %vm1552_vm1, %v3716_v45  ;;  %v3721_v45 = vld [vmem:[%s6589_s3 + $0xc0] sm:$0xf0] }
 0x407   :  { %2569 = vmatpush.bf16.msra.mxu0 %v6773_v12  ;;  %v3724_v13 = vor.u32 %v4117_v28, %v3721_v45  ;;  %v4122_v45 = vld [vmem:[%s6589_s3 + $0xe4] sm:$0xf] }
 0x409   :  { %v1693_v57 = vpop.f32.mrf.mxu2 }
 0x40a   :  { %v1723_v8 = vpop.f32.mrf.mxu3  ;;  %v1722_v62 = vadd.f32 %v1721_v59, %v1693_v57 }
 0x40b   :  { %2570 = vmatpush.bf16.msra.mxu0 %v6774_v31  ;;  %v1580_v21 = vpop.f32.mrf.mxu0 }
 0x40c   :  { %v1609_v51 = vadd.f32 %v1608_v32, %v1580_v21 }
 0x40d   :  { %v1611_v63 = vpop.f32.mrf.mxu1 }
 0x40e   :  { %v1625_v11 = vpack.c.bf16 %v1609_v51, %v1607_v38  ;;  %v3711_v51 = vld [vmem:[%s6589_s3 + $0xa8] sm:$0xf] }
 0x40f   :  { %2571 = vmatpush.bf16.msra.mxu0 %v6775_v35 }
 0x410   :  { %3653 = vmatmul.msk.bf16.vlgmr.msrb.gmra.mxu3 %vm1753_vm2, %v1625_v11  ;;  %v4119_v11 = vld [vmem:[%s6589_s3 + $0xcc] sm:$0xf] }
 0x411   :  { %2262 = vmatpush.bf16.msrb.mxu3 %v5400_v61  ;;  %v1695_v56 = vpop.f32.mrf.mxu2 }
 0x412   :  { %v1724_v44 = vadd.f32 %v1723_v8, %v1695_v56 }
 0x413   :  { %2572 = vmatpush.bf16.msra.mxu0 %v5555_v52  ;;  %v1583_v39 = vpop.f32.mrf.mxu0 }
 0x414   :  { %v1726_v23 = vpop.f32.mrf.mxu3  ;;  %v1740_v40 = vpack.c.bf16 %v1724_v44, %v1722_v62  ;;  %v1612_v29 = vadd.f32 %v1611_v63, %v1583_v39  ;;  %v4116_v63 = vld [vmem:[%s6589_s3 + $0xac] sm:$0xf0]  ;;  %v3729_v62 = vld [vmem:[%s6589_s3 + $0xd0] sm:$0xf0] }
 0x415   :  { %v1613_v3 = vpop.f32.mrf.mxu1  ;;  %2263 = vmatpush.bf16.msrb.mxu3 %v5695_v47  ;;  %v3732_v44 = vor.u32 %v4119_v11, %v3729_v62  ;;  %v3766_v11 = vld [vmem:[%s6589_s3 + $0xf8] sm:$0xf0] }
 0x416   :  { %3645 = vmatmul.msk.bf16.vlgmr.msrb.gmra.mxu1 %vm1753_vm2, %v1740_v40  ;;  %3734 = vmatmul.msk.bf16.gmra.mxu0 %vm1552_vm1, %v3724_v13 }
 0x417   :  { %2231 = vmatpush.bf16.msrb.mxu1 %v6773_v12  ;;  %2573 = vmatpush.bf16.msra.mxu0 %v5653_v54 }
 0x419   :  { %2264 = vmatpush.bf16.msrb.mxu3 %v5787_v55  ;;  %v1698_v53 = vpop.f32.mrf.mxu2 }
 0x41a   :  { %v1727_v33 = vadd.f32 %v1726_v23, %v1698_v53  ;;  %v3712_v23 = vor.u32 %v4116_v63, %v3711_v51  ;;  %v4124_v63 = vld [vmem:[%s6589_s3 + $0xf4] sm:$0xf] }
 0x41b   :  { %2232 = vmatpush.bf16.msrb.mxu1 %v6774_v31  ;;  %2574 = vmatpush.bf16.msra.mxu0 %v5780_v46  ;;  %v1585_v0 = vpop.f32.mrf.mxu0 }
 0x41c   :  { %v1728_v24 = vpop.f32.mrf.mxu3  ;;  %v1614_v43 = vadd.f32 %v1613_v3, %v1585_v0 }
 0x41d   :  { %v1616_v30 = vpop.f32.mrf.mxu1  ;;  %2265 = vmatpush.bf16.msrb.mxu3 %v5816_v19 }
 0x41e   :  { %v1626_v60 = vpack.c.bf16 %v1614_v43, %v1612_v29  ;;  %v3719_v29 = vld [vmem:[%s6589_s3 + $0xb8] sm:$0xf]  ;;  %v4118_v43 = vld [vmem:[%s6589_s3 + $0xbc] sm:$0xf0] }
 0x41f   :  { %2233 = vmatpush.bf16.msrb.mxu1 %v6775_v35  ;;  %2575 = vmatpush.bf16.msra.mxu0 %v5804_v15 }
 0x420   :  { %3654 = vmatmul.msk.bf16.gmra.mxu3 %vm1753_vm2, %v1626_v60  ;;  %v3720_v60 = vor.u32 %v4118_v43, %v3719_v29  ;;  %v3774_v29 = vld [vmem:[%s6589_s3 + $0x108] sm:$0xf0] }
 0x421   :  { %2266 = vmatpush.bf16.msrb.mxu3 %v5850_v49  ;;  %v1700_v25 = vpop.f32.mrf.mxu2 }
 0x422   :  { %v1729_v17 = vadd.f32 %v1728_v24, %v1700_v25  ;;  %v3708_v25 = vld [vmem:[%s6589_s3 + $0xd8] sm:$0x11] }
 0x423   :  { %2234 = vmatpush.bf16.msrb.mxu1 %v5555_v52  ;;  %2576 = vmatpush.bf16.msra.mxu0 %v5871_v20  ;;  %v1588_v9 = vpop.f32.mrf.mxu0 }
 0x424   :  { %v1731_v37 = vpop.f32.mrf.mxu3  ;;  %v1741_v48 = vpack.c.bf16 %v1729_v17, %v1727_v33  ;;  %v1617_v27 = vadd.f32 %v1616_v30, %v1588_v9 }
 0x425   :  { %v1618_v1 = vpop.f32.mrf.mxu1 }
 0x426   :  { %3646 = vmatmul.msk.bf16.gmra.mxu1 %vm1753_vm2, %v1741_v48  ;;  %3735 = vmatmul.msk.bf16.gmra.mxu0 %vm1552_vm1, %v3732_v44  ;;  %v3769_v44 = vor.u32 %v4124_v63, %v3766_v11 }
 0x427   :  { %2235 = vmatpush.bf16.msrb.mxu1 %v5653_v54 }
 0x429   :  { %v1703_v18 = vpop.f32.mrf.mxu2 }
 0x42a   :  { %v1732_v26 = vadd.f32 %v1731_v37, %v1703_v18  ;;  %v2037_v37 = vunpack.c.h.b16 %v3708_v25 }
 0x42b   :  { %2236 = vmatpush.bf16.msrb.mxu1 %v5780_v46  ;;  %v1590_v22 = vpop.f32.mrf.mxu0 }
 0x42c   :  { %v1733_v50 = vpop.f32.mrf.mxu3  ;;  %v1619_v4 = vadd.f32 %v1618_v1, %v1590_v22  ;;  %v2045_v18 = vpack.c.b16 %v2037_v37, %v2037_v37 }
 0x42d   :  { %v1621_v42 = vpop.f32.mrf.mxu1 }
 0x42e   :  { %v1627_v58 = vpack.c.bf16 %v1619_v4, %v1617_v27  ;;  %v3727_v27 = vld [vmem:[%s6589_s3 + $0xc8] sm:$0xf]  ;;  %v4120_v4 = vld [vmem:[%s6589_s3 + $0xcc] sm:$0xf0] }
 0x42f   :  { %2237 = vmatpush.bf16.msrb.mxu1 %v5804_v15 }
 0x430   :  { %3655 = vmatmul.msk.bf16.gmra.mxu3 %vm1753_vm2, %v1627_v58  ;;  %v3728_v58 = vor.u32 %v4120_v4, %v3727_v27 }
 0x431   :  { %v1705_v5 = vpop.f32.mrf.mxu2 }
 0x432   :  { %v1734_v6 = vadd.f32 %v1733_v50, %v1705_v5  ;;  %v4135_v50 = vld [vmem:[%s6590_s4 + $0x28] sm:$0xff] }
 0x433   :  { %2238 = vmatpush.bf16.msrb.mxu1 %v5871_v20  ;;  %v1593_v14 = vpop.f32.mrf.mxu0 }
 0x434   :  { %v1736_v7 = vpop.f32.mrf.mxu3  ;;  %v1742_v34 = vpack.c.bf16 %v1734_v6, %v1732_v26  ;;  %v1622_v2 = vadd.f32 %v1621_v42, %v1593_v14 }
 0x435   :  { %v1623_v16 = vpop.f32.mrf.mxu1 }
 0x436   :  { %3647 = vmatmul.msk.bf16.gmra.mxu1 %vm1753_vm2, %v1742_v34  ;;  %v1628_v59 = vpack.c.bf16 %v1622_v2, %v1622_v2  ;;  %3736 = vmatmul.msk.bf16.gmra.mxu0 %vm1552_vm1, %v2045_v18  ;;  %v2036_v34 = vunpack.c.l.b16 %v3708_v25  ;;  %v3772_v25 = vld [vmem:[%s6589_s3 + $0x100] sm:$0xf] }
 0x439   :  { %v1708_v41 = vpop.f32.mrf.mxu2 }
 0x43a   :  { %v1737_v32 = vadd.f32 %v1736_v7, %v1708_v41  ;;  %v2044_v41 = vpack.c.b16 %v2036_v34, %v2036_v34 }
 0x43b   :  { %v1595_v36 = vpop.f32.mrf.mxu0 }
 0x43c   :  { %v1738_v10 = vpop.f32.mrf.mxu3  ;;  %v1743_v8 = vpack.c.bf16 %v1737_v32, %v1737_v32  ;;  %v3756_v32 = vld [vmem:[%s6589_s3 + $0xe0] sm:$0xf] }
 0x440   :  { %3656 = vmatmul.msk.bf16.gmra.mxu3 %vm1753_vm2, %v1628_v59  ;;  %v3758_v59 = vld [vmem:[%s6589_s3 + $0xe8] sm:$0xf0] }
 0x441   :  { %v1710_v57 = vpop.f32.mrf.mxu2  ;;  %v3761_v13 = vor.u32 %v4122_v45, %v3758_v59 }
 0x442   :  { %v4123_v57 = vld [vmem:[%s6589_s3 + $0xe4] sm:$0xf0] }
 0x443   :  { %v1902_v21 = vpop.f32.mrf.mxu0 }
 0x446   :  { %3648 = vmatmul.msk.bf16.gmra.mxu1 %vm1753_vm2, %v1743_v8  ;;  %v3757_v8 = vor.u32 %v4123_v57, %v3756_v32 }
 0x449   :  { %v1930_v38 = vpop.f32.mrf.mxu2 }
 0x44a   :  { %v1931_v39 = vadd.f32 %v1930_v38, %v1902_v21 }
 0x44b   :  { %v1904_v56 = vpop.f32.mrf.mxu0 }
 0x450   :  { %2070 = vmatmul.bf16.vlgmr.msra.gmra.mxu3 %v3712_v23  ;;  %v3764_v23 = vld [vmem:[%s6589_s3 + $0xf0] sm:$0xf] }
 0x451   :  { %v1932_v40 = vpop.f32.mrf.mxu2  ;;  %2488 = vmatpush.bf16.msra.mxu3 %v4135_v50  ;;  %v4142_v50 = vld [vmem:[%s6590_s4 + $0x30] sm:$0xff] }
 0x452   :  { %v1933_v3 = vadd.f32 %v1932_v40, %v1904_v56 }
 0x453   :  { %v1907_v53 = vpop.f32.mrf.mxu0 }
 0x454   :  { %v1949_v24 = vpack.c.bf16 %v1933_v3, %v1931_v39  ;;  %v4125_v39 = vld [vmem:[%s6589_s3 + $0xf4] sm:$0xf0] }
 0x455   :  { %v3765_v40 = vor.u32 %v4125_v39, %v3764_v23 }
 0x456   :  { %3698 = vmatmul.msk.bf16.vlgmr.msra.gmra.mxu1 %vm1753_vm2, %v1949_v24 }
 0x457   :  { %2431 = vmatpush.bf16.msra.mxu1 %v5400_v61 }
 0x459   :  { %v1935_v0 = vpop.f32.mrf.mxu2 }
 0x45a   :  { %v1936_v33 = vadd.f32 %v1935_v0, %v1907_v53  ;;  %v4126_v0 = vld [vmem:[%s6589_s3 + $0x104] sm:$0xf] }
 0x45b   :  { %2432 = vmatpush.bf16.msra.mxu1 %v5695_v47  ;;  %v1909_v30 = vpop.f32.mrf.mxu0 }
 0x45f   :  { %2433 = vmatpush.bf16.msra.mxu1 %v5787_v55 }
 0x460   :  { %2075 = vmatmul.bf16.gmra.mxu3 %v3720_v60  ;;  %v3777_v60 = vor.u32 %v4126_v0, %v3774_v29 }
 0x461   :  { %v1937_v17 = vpop.f32.mrf.mxu2 }
 0x462   :  { %v1938_v9 = vadd.f32 %v1937_v17, %v1909_v30  ;;  %v4127_v17 = vld [vmem:[%s6589_s3 + $0x104] sm:$0xf0] }
 0x463   :  { %2434 = vmatpush.bf16.msra.mxu1 %v5816_v19  ;;  %v1912_v48 = vpop.f32.mrf.mxu0  ;;  %v3773_v37 = vor.u32 %v4127_v17, %v3772_v25 }
 0x464   :  { %v1950_v1 = vpack.c.bf16 %v1938_v9, %v1936_v33 }
 0x466   :  { %3699 = vmatmul.msk.bf16.gmra.mxu1 %vm1753_vm2, %v1950_v1 }
 0x467   :  { %2435 = vmatpush.bf16.msra.mxu1 %v5850_v49 }
 0x469   :  { %v1940_v22 = vpop.f32.mrf.mxu2 }
 0x46a   :  { %v1941_v26 = vadd.f32 %v1940_v22, %v1912_v48  ;;  %v3753_v22 = vld [vmem:[%s6589_s3 + $0x110] sm:$0x11] }
 0x46b   :  { %v1914_v42 = vpop.f32.mrf.mxu0  ;;  %v2206_v27 = vunpack.c.h.b16 %v3753_v22 }
 0x470   :  { %2080 = vmatmul.bf16.gmra.mxu3 %v3728_v58  ;;  %v2214_v58 = vpack.c.b16 %v2206_v27, %v2206_v27 }
 0x471   :  { %v1942_v5 = vpop.f32.mrf.mxu2 }
 0x472   :  { %v1943_v6 = vadd.f32 %v1942_v5, %v1914_v42 }
 0x473   :  { %v1917_v7 = vpop.f32.mrf.mxu0 }
 0x474   :  { %v1951_v14 = vpack.c.bf16 %v1943_v6, %v1941_v26  ;;  %v2205_v26 = vunpack.c.l.b16 %v3753_v22 }
 0x476   :  { %3700 = vmatmul.msk.bf16.gmra.mxu1 %vm1753_vm2, %v1951_v14  ;;  %v2213_v6 = vpack.c.b16 %v2205_v26, %v2205_v26  ;;  %v4130_v26 = vld [vmem:[%s6589_s3 + $0x11c] sm:$0xf0] }
 0x479   :  { %v1945_v16 = vpop.f32.mrf.mxu2 }
 0x47a   :  { %v1946_v10 = vadd.f32 %v1945_v16, %v1917_v7 }
 0x47b   :  { %v1919_v2 = vpop.f32.mrf.mxu0 }
 0x47c   :  { %v1952_v28 = vpack.c.bf16 %v1946_v10, %v1946_v10  ;;  %v4129_v10 = vld [vmem:[%s6589_s3 + $0x11c] sm:$0xf] }
 0x480   :  { %2085 = vmatmul.bf16.gmra.mxu3 %v2044_v41 }
 0x481   :  { %v1947_v36 = vpop.f32.mrf.mxu2 }
 0x482   :  { %v3803_v36 = vld [vmem:[%s6589_s3 + $0x120] sm:$0xf0] }
 0x483   :  { %v2099_v33 = vpop.f32.mrf.mxu0 }
 0x486   :  { %3701 = vmatmul.msk.bf16.gmra.mxu1 %vm1753_vm2, %v1952_v28  ;;  %v3806_v28 = vor.u32 %v4129_v10, %v3803_v36 }
 0x48b   :  { %v2101_v18 = vpop.f32.mrf.mxu0 }
 0x490   :  { %3778 = vmatmul.msk.bf16.vlgmr.msrb.gmra.mxu3 %vm1552_vm1, %v3761_v13 }
 0x491   :  { %2738 = vmatpush.bf16.msrb.mxu3 %v6773_v12 }
 0x493   :  { %v1775_v21 = vpop.f32.mrf.mxu1  ;;  %v1821_v38 = vpop.f32.mrf.mxu3 }
 0x494   :  { %v1822_v51 = vadd.f32 %v1821_v38, %v1775_v21  ;;  %v2104_v5 = vpop.f32.mrf.mxu0 }
 0x495   :  { %2739 = vmatpush.bf16.msrb.mxu3 %v6774_v31 }
 0x496   :  { %2239 = vmatmul.bf16.vlgmr.msrb.gmra.mxu1 %v3757_v8 }
 0x497   :  { %2657 = vmatpush.bf16.msrb.mxu1 %v4142_v50 }
 0x499   :  { %2740 = vmatpush.bf16.msrb.mxu3 %v6775_v35 }
 0x49b   :  { %v6129_v62 = vpop.f32.mrf.mxu1  ;;  %v6131_v56 = vpop.f32.mrf.mxu3 }
 0x49c   :  { %v2106_v16 = vpop.f32.mrf.mxu0 }
 0x49d   :  { %2741 = vmatpush.bf16.msrb.mxu3 %v5555_v52 }
 0x4a0   :  { %3779 = vmatmul.msk.bf16.gmra.mxu3 %vm1552_vm1, %v3769_v44 }
 0x4a1   :  { %2742 = vmatpush.bf16.msrb.mxu3 %v5653_v54 }
 0x4a3   :  { %v1780_v3 = vpop.f32.mrf.mxu1  ;;  %v1826_v53 = vpop.f32.mrf.mxu3 }
 0x4a4   :  { %v1827_v24 = vadd.f32 %v1826_v53, %v1780_v3  ;;  %v2109_v45 = vpop.f32.mrf.mxu0 }
 0x4a5   :  { %2743 = vmatpush.bf16.msrb.mxu3 %v5780_v46 }
 0x4a6   :  { %2244 = vmatmul.bf16.gmra.mxu1 %v3765_v40 }
 0x4a9   :  { %2744 = vmatpush.bf16.msrb.mxu3 %v5804_v15 }
 0x4ab   :  { %v6150_v43 = vpop.f32.mrf.mxu1  ;;  %v6152_v30 = vpop.f32.mrf.mxu3 }
 0x4ac   :  { %v2111_v63 = vpop.f32.mrf.mxu0 }
 0x4ad   :  { %2745 = vmatpush.bf16.msrb.mxu3 %v5871_v20 }
 0x4b0   :  { %3780 = vmatmul.msk.bf16.gmra.mxu3 %vm1552_vm1, %v3777_v60 }
 0x4b3   :  { %v1785_v9 = vpop.f32.mrf.mxu1  ;;  %v1831_v48 = vpop.f32.mrf.mxu3 }
 0x4b4   :  { %v1832_v1 = vadd.f32 %v1831_v48, %v1785_v9 }
 0x4b6   :  { %2249 = vmatmul.bf16.gmra.mxu1 %v3773_v37 }
 0x4bb   :  { %v6168_v4 = vpop.f32.mrf.mxu1  ;;  %v6170_v42 = vpop.f32.mrf.mxu3 }
 0x4c0   :  { %3781 = vmatmul.msk.bf16.gmra.mxu3 %vm1552_vm1, %v2214_v58  ;;  %v3801_v58 = vld [vmem:[%s6589_s3 + $0x118] sm:$0xf] }
 0x4c3   :  { %v1790_v7 = vpop.f32.mrf.mxu1  ;;  %v1836_v14 = vpop.f32.mrf.mxu3 }
 0x4c4   :  { %v1837_v34 = vadd.f32 %v1836_v14, %v1790_v7 }
 0x4c6   :  { %2254 = vmatmul.bf16.gmra.mxu1 %v2213_v6 }
 0x4cb   :  { %v1792_v2 = vpop.f32.mrf.mxu1  ;;  %v1838_v41 = vpop.f32.mrf.mxu3 }
 0x4cc   :  { %v3819_v2 = vld [vmem:[%s6589_s3 + $0x140] sm:$0xf0] }
 0x4d3   :  { %v1983_v59 = vpop.f32.mrf.mxu1  ;;  %v2071_v13 = vpop.f32.mrf.mxu3 }
 0x4d4   :  { %v6179_v32 = vadd.f32 %v1983_v59, %v1822_v51  ;;  %v2100_v21 = vadd.f32 %v2099_v33, %v2071_v13  ;;  %v4132_v59 = vld [vmem:[%s6589_s3 + $0x12c] sm:$0xf0] }
 0x4d6   :  { %3823 = vmatmul.msk.bf16.vlgmr.msra.gmra.mxu1 %vm1552_vm1, %v3806_v28 }
 0x4d7   :  { %2907 = vmatpush.bf16.msra.mxu1 %v6773_v12 }
 0x4db   :  { %2908 = vmatpush.bf16.msra.mxu1 %v6774_v31  ;;  %v6184_v57 = vpop.f32.mrf.mxu1  ;;  %v2073_v8 = vpop.f32.mrf.mxu3 }
 0x4dc   :  { %v2102_v38 = vadd.f32 %v2101_v18, %v2073_v8  ;;  %v2114_v31 = vpop.f32.mrf.mxu0  ;;  %v3811_v18 = vld [vmem:[%s6589_s3 + $0x130] sm:$0xf0] }
 0x4de   :  { %v2118_v11 = vpack.c.bf16 %v2102_v38, %v2100_v21 }
 0x4df   :  { %2909 = vmatpush.bf16.msra.mxu1 %v6775_v35 }
 0x4e0   :  { %3743 = vmatmul.msk.bf16.vlgmr.msra.gmra.mxu2 %vm1753_vm2, %v2118_v11 }
 0x4e1   :  { %2600 = vmatpush.bf16.msra.mxu2 %v5400_v61 }
 0x4e3   :  { %2910 = vmatpush.bf16.msra.mxu1 %v5555_v52  ;;  %v1988_v51 = vpop.f32.mrf.mxu1  ;;  %v2076_v44 = vpop.f32.mrf.mxu3 }
 0x4e4   :  { %v6190_v12 = vadd.f32 %v1988_v51, %v1827_v24  ;;  %v2105_v39 = vadd.f32 %v2104_v5, %v2076_v44  ;;  %v2116_v3 = vpop.f32.mrf.mxu0  ;;  %v3798_v51 = vld [vmem:[%s6589_s3 + $0x148] sm:$0x11] }
 0x4e5   :  { %2601 = vmatpush.bf16.msra.mxu2 %v5695_v47  ;;  %v2375_v44 = vunpack.c.h.b16 %v3798_v51  ;;  %v4134_v3 = vld [vmem:[%s6589_s3 + $0x13c] sm:$0xf0] }
 0x4e7   :  { %2911 = vmatpush.bf16.msra.mxu1 %v5653_v54 }
 0x4e9   :  { %2602 = vmatpush.bf16.msra.mxu2 %v5787_v55 }
 0x4eb   :  { %2912 = vmatpush.bf16.msra.mxu1 %v5780_v46  ;;  %v6196_v35 = vpop.f32.mrf.mxu1  ;;  %v2078_v23 = vpop.f32.mrf.mxu3 }
 0x4ec   :  { %v2107_v40 = vadd.f32 %v2106_v16, %v2078_v23  ;;  %v4133_v16 = vld [vmem:[%s6589_s3 + $0x13c] sm:$0xf] }
 0x4ed   :  { %2603 = vmatpush.bf16.msra.mxu2 %v5816_v19  ;;  %v3822_v41 = vor.u32 %v4133_v16, %v3819_v2  ;;  %v4139_v16 = vld [vmem:[%s6589_s3 + $0x164] sm:$0xf0] }
 0x4ee   :  { %v2119_v52 = vpack.c.bf16 %v2107_v40, %v2105_v39  ;;  %v3817_v40 = vld [vmem:[%s6589_s3 + $0x138] sm:$0xf] }
 0x4ef   :  { %2913 = vmatpush.bf16.msra.mxu1 %v5804_v15 }
 0x4f0   :  { %3744 = vmatmul.msk.bf16.gmra.mxu2 %vm1753_vm2, %v2119_v52 }
 0x4f1   :  { %2604 = vmatpush.bf16.msra.mxu2 %v5850_v49 }
 0x4f3   :  { %2914 = vmatpush.bf16.msra.mxu1 %v5871_v20  ;;  %v1993_v54 = vpop.f32.mrf.mxu1  ;;  %v2081_v53 = vpop.f32.mrf.mxu3 }
 0x4f4   :  { %v6203_v46 = vadd.f32 %v1993_v54, %v1832_v1  ;;  %v2110_v29 = vadd.f32 %v2109_v45, %v2081_v53  ;;  %v4131_v1 = vld [vmem:[%s6589_s3 + $0x12c] sm:$0xf]  ;;  %v3809_v45 = vld [vmem:[%s6589_s3 + $0x128] sm:$0xf] }
 0x4f5   :  { %v3814_v50 = vor.u32 %v4131_v1, %v3811_v18  ;;  %v4136_v18 = vld [vmem:[%s6589_s3 + $0x154] sm:$0xf] }
 0x4f7   :  { %3824 = vmatmul.msk.bf16.gmra.mxu1 %vm1552_vm1, %v3814_v50  ;;  %v3848_v50 = vld [vmem:[%s6589_s3 + $0x158] sm:$0xf0] }
 0x4fb   :  { %v6205_v24 = vpop.f32.mrf.mxu1  ;;  %v2083_v0 = vpop.f32.mrf.mxu3 }
 0x4fc   :  { %v2112_v60 = vadd.f32 %v2111_v63, %v2083_v0  ;;  %v3810_v63 = vor.u32 %v4132_v59, %v3809_v45  ;;  %v3864_v45 = vld [vmem:[%s6589_s3 + $0x178] sm:$0xf0]  ;;  %v3862_v59 = vld [vmem:[%s6589_s3 + $0x170] sm:$0xf] }
 0x4fe   :  { %v2120_v33 = vpack.c.bf16 %v2112_v60, %v2110_v29  ;;  %v3818_v29 = vor.u32 %v4134_v3, %v3817_v40 }
 0x500   :  { %3745 = vmatmul.msk.bf16.gmra.mxu2 %vm1753_vm2, %v2120_v33 }
 0x503   :  { %v1998_v25 = vpop.f32.mrf.mxu1  ;;  %v2086_v15 = vpop.f32.mrf.mxu3 }
 0x504   :  { %v6208_v17 = vadd.f32 %v1998_v25, %v1837_v34  ;;  %v2115_v37 = vadd.f32 %v2114_v31, %v2086_v15  ;;  %v3802_v34 = vor.u32 %v4130_v26, %v3801_v58  ;;  %v2383_v31 = vpack.c.b16 %v2375_v44, %v2375_v44  ;;  %v3843_v44 = vld [vmem:[%s6589_s3 + $0x180] sm:$0x11] }
 0x505   :  { %v3851_v58 = vor.u32 %v4136_v18, %v3848_v50 }
 0x506   :  { %v2121_v20 = vpack.c.bf16 %v2115_v37, %v2115_v37  ;;  %v2374_v37 = vunpack.c.l.b16 %v3798_v51 }
 0x507   :  { %3825 = vmatmul.msk.bf16.gmra.mxu1 %vm1552_vm1, %v3822_v41 }
 0x508   :  { %v2382_v1 = vpack.c.b16 %v2374_v37, %v2374_v37 }
 0x50b   :  { %v2000_v9 = vpop.f32.mrf.mxu1  ;;  %v2088_v48 = vpop.f32.mrf.mxu3 }
 0x510   :  { %3746 = vmatmul.msk.bf16.gmra.mxu2 %vm1753_vm2, %v2121_v20 }
 0x513   :  { %v2240_v22 = vpop.f32.mrf.mxu1  ;;  %v2268_v27 = vpop.f32.mrf.mxu3 }
 0x514   :  { %v2269_v5 = vadd.f32 %v2268_v27, %v2240_v22  ;;  %v3846_v22 = vld [vmem:[%s6589_s3 + $0x150] sm:$0xf]  ;;  %v4137_v27 = vld [vmem:[%s6589_s3 + $0x154] sm:$0xf0] }
 0x515   :  { %v3847_v26 = vor.u32 %v4137_v27, %v3846_v22 }
 0x517   :  { %3826 = vmatmul.msk.bf16.gmra.mxu1 %vm1552_vm1, %v2383_v31  ;;  %v2544_v31 = vunpack.c.h.b16 %v3843_v44 }
 0x519   :  { %v2552_v40 = vpack.c.b16 %v2544_v31, %v2544_v31 }
 0x51b   :  { %v2242_v6 = vpop.f32.mrf.mxu1  ;;  %v2270_v7 = vpop.f32.mrf.mxu3 }
 0x51c   :  { %v2271_v14 = vadd.f32 %v2270_v7, %v2242_v6  ;;  %v4138_v7 = vld [vmem:[%s6589_s3 + $0x164] sm:$0xf] }
 0x51e   :  { %v2287_v10 = vpack.c.bf16 %v2271_v14, %v2269_v5  ;;  %v3856_v14 = vld [vmem:[%s6589_s3 + $0x168] sm:$0xf0] }
 0x51f   :  { %v3859_v41 = vor.u32 %v4138_v7, %v3856_v14 }
 0x520   :  { %3788 = vmatmul.msk.bf16.vlgmr.msrb.gmra.mxu0 %vm1753_vm2, %v2287_v10  ;;  %2408 = vmatmul.bf16.vlgmr.msrb.gmra.mxu2 %v3802_v34  ;;  %v3854_v34 = vld [vmem:[%s6589_s3 + $0x160] sm:$0xf] }
 0x521   :  { %2769 = vmatpush.bf16.msrb.mxu0 %v5400_v61 }
 0x523   :  { %v2245_v36 = vpop.f32.mrf.mxu1  ;;  %v2273_v28 = vpop.f32.mrf.mxu3 }
 0x524   :  { %v2274_v13 = vadd.f32 %v2273_v28, %v2245_v36  ;;  %v4140_v28 = vld [vmem:[%s6589_s3 + $0x174] sm:$0xf] }
 0x525   :  { %2770 = vmatpush.bf16.msrb.mxu0 %v5695_v47 }
 0x529   :  { %2771 = vmatpush.bf16.msrb.mxu0 %v5787_v55 }
 0x52b   :  { %v2247_v8 = vpop.f32.mrf.mxu1  ;;  %v2275_v21 = vpop.f32.mrf.mxu3 }
 0x52c   :  { %v2276_v38 = vadd.f32 %v2275_v21, %v2247_v8 }
 0x52d   :  { %2772 = vmatpush.bf16.msrb.mxu0 %v5816_v19 }
 0x52e   :  { %v2288_v11 = vpack.c.bf16 %v2276_v38, %v2274_v13  ;;  %v4141_v13 = vld [vmem:[%s6589_s3 + $0x174] sm:$0xf0] }
 0x52f   :  { %v3863_v38 = vor.u32 %v4141_v13, %v3862_v59 }
 0x530   :  { %3789 = vmatmul.msk.bf16.gmra.mxu0 %vm1753_vm2, %v2288_v11  ;;  %2413 = vmatmul.bf16.gmra.mxu2 %v3810_v63 }
 0x531   :  { %2773 = vmatpush.bf16.msrb.mxu0 %v5850_v49 }
 0x533   :  { %v2250_v23 = vpop.f32.mrf.mxu1  ;;  %v2278_v39 = vpop.f32.mrf.mxu3 }
 0x534   :  { %v2279_v52 = vadd.f32 %v2278_v39, %v2250_v23  ;;  %v2543_v23 = vunpack.c.l.b16 %v3843_v44 }
 0x536   :  { %v2551_v3 = vpack.c.b16 %v2543_v23, %v2543_v23  ;;  %v3891_v23 = vld [vmem:[%s6589_s3 + $0x188] sm:$0xf] }
 0x53b   :  { %v2252_v54 = vpop.f32.mrf.mxu1  ;;  %v2280_v53 = vpop.f32.mrf.mxu3 }
 0x53c   :  { %v2281_v0 = vadd.f32 %v2280_v53, %v2252_v54 }
 0x53e   :  { %v2289_v60 = vpack.c.bf16 %v2281_v0, %v2279_v52 }
 0x540   :  { %3790 = vmatmul.msk.bf16.gmra.mxu0 %vm1753_vm2, %v2289_v60  ;;  %2418 = vmatmul.bf16.gmra.mxu2 %v3818_v29 }
 0x543   :  { %v2255_v33 = vpop.f32.mrf.mxu1  ;;  %v2283_v25 = vpop.f32.mrf.mxu3 }
 0x544   :  { %v2284_v15 = vadd.f32 %v2283_v25, %v2255_v33 }
 0x546   :  { %v2290_v20 = vpack.c.bf16 %v2284_v15, %v2284_v15 }
 0x54b   :  { %v2257_v9 = vpop.f32.mrf.mxu1  ;;  %v2285_v48 = vpop.f32.mrf.mxu3 }
 0x550   :  { %3791 = vmatmul.msk.bf16.gmra.mxu0 %vm1753_vm2, %v2290_v20  ;;  %2423 = vmatmul.bf16.gmra.mxu2 %v2382_v1 }
 0x553   :  { %v2437_v21 = vpop.f32.mrf.mxu1 }
 0x55b   :  { %v2439_v51 = vpop.f32.mrf.mxu1 }
 0x560   :  { %3868 = vmatmul.msk.bf16.vlgmr.msra.gmra.mxu2 %vm1552_vm1, %v3851_v58  ;;  %2577 = vmatmul.bf16.vlgmr.msra.gmra.mxu0 %v3847_v26 }
 0x563   :  { %v2152_v5 = vpop.f32.mrf.mxu2 }
 0x564   :  { %v2171_v6 = vadd.f32 %v2152_v5, %v6179_v32  ;;  %v3855_v32 = vor.u32 %v4139_v16, %v3854_v34 }
 0x56b   :  { %v6282_v2 = vpop.f32.mrf.mxu2 }
 0x570   :  { %3869 = vmatmul.msk.bf16.gmra.mxu2 %vm1552_vm1, %v3859_v41  ;;  %2582 = vmatmul.bf16.gmra.mxu0 %v3855_v32 }
 0x573   :  { %v2157_v10 = vpop.f32.mrf.mxu2 }
 0x574   :  { %v2173_v36 = vadd.f32 %v2157_v10, %v6190_v12  ;;  %v3867_v12 = vor.u32 %v4140_v28, %v3864_v45  ;;  %v2442_v52 = vpop.f32.mrf.mxu1  ;;  %v4143_v28 = vld [vmem:[%s6589_s3 + $0x18c] sm:$0xf] }
 0x57b   :  { %v6298_v8 = vpop.f32.mrf.mxu2 }
 0x57c   :  { %v2444_v0 = vpop.f32.mrf.mxu1 }
 0x580   :  { %3870 = vmatmul.msk.bf16.gmra.mxu2 %vm1552_vm1, %v3867_v12  ;;  %2587 = vmatmul.bf16.gmra.mxu0 %v3863_v38 }
 0x583   :  { %v2162_v63 = vpop.f32.mrf.mxu2 }
 0x584   :  { %v2175_v11 = vadd.f32 %v2162_v63, %v6203_v46  ;;  %v2447_v33 = vpop.f32.mrf.mxu1 }
 0x58b   :  { %v6305_v39 = vpop.f32.mrf.mxu2 }
 0x58c   :  { %v2449_v9 = vpop.f32.mrf.mxu1 }
 0x590   :  { %3871 = vmatmul.msk.bf16.gmra.mxu2 %vm1552_vm1, %v2552_v40  ;;  %2592 = vmatmul.bf16.gmra.mxu0 %v2551_v3  ;;  %v4144_v40 = vld [vmem:[%s6589_s3 + $0x18c] sm:$0xf0] }
 0x593   :  { %v2167_v54 = vpop.f32.mrf.mxu2 }
 0x594   :  { %v2177_v53 = vadd.f32 %v2167_v54, %v6208_v17  ;;  %v2452_v22 = vpop.f32.mrf.mxu1 }
 0x59b   :  { %v2169_v46 = vpop.f32.mrf.mxu2 }
 0x59c   :  { %v2454_v26 = vpop.f32.mrf.mxu1 }
 0x59d   :  { %v2321_v29 = vpop.f32.mrf.mxu0 }
 0x59e   :  { %v6309_v60 = vadd.f32 %v2321_v29, %v2171_v6  ;;  %v4147_v29 = vld [vmem:[%s6589_s3 + $0x1ac] sm:$0xf] }
 0x5a3   :  { %v2409_v25 = vpop.f32.mrf.mxu2 }
 0x5a4   :  { %v2438_v48 = vadd.f32 %v2437_v21, %v2409_v25 }
 0x5a5   :  { %v6311_v15 = vpop.f32.mrf.mxu0 }
 0x5ab   :  { %v2411_v37 = vpop.f32.mrf.mxu2 }
 0x5ac   :  { %v2440_v20 = vadd.f32 %v2439_v51, %v2411_v37  ;;  %v3901_v51 = vld [vmem:[%s6589_s3 + $0x1a0] sm:$0xf0] }
 0x5ad   :  { %v2326_v1 = vpop.f32.mrf.mxu0 }
 0x5ae   :  { %v2456_v18 = vpack.c.bf16 %v2440_v20, %v2438_v48  ;;  %v6313_v50 = vadd.f32 %v2326_v1, %v2173_v36  ;;  %v3899_v48 = vld [vmem:[%s6589_s3 + $0x198] sm:$0xf]  ;;  %v4146_v20 = vld [vmem:[%s6589_s3 + $0x19c] sm:$0xf0] }
 0x5b0   :  { %3833 = vmatmul.msk.bf16.vlgmr.msra.gmra.mxu3 %vm1753_vm2, %v2456_v18 }
 0x5b1   :  { %2938 = vmatpush.bf16.msra.mxu3 %v5400_v61 }
 0x5b3   :  { %v2414_v17 = vpop.f32.mrf.mxu2 }
 0x5b4   :  { %v2443_v5 = vadd.f32 %v2442_v52, %v2414_v17 }
 0x5b5   :  { %2939 = vmatpush.bf16.msra.mxu3 %v5695_v47  ;;  %v6318_v27 = vpop.f32.mrf.mxu0 }
 0x5b9   :  { %2940 = vmatpush.bf16.msra.mxu3 %v5787_v55 }
 0x5bb   :  { %v2416_v58 = vpop.f32.mrf.mxu2 }
 0x5bc   :  { %v2445_v6 = vadd.f32 %v2444_v0, %v2416_v58 }
 0x5bd   :  { %2941 = vmatpush.bf16.msra.mxu3 %v5816_v19  ;;  %v2331_v7 = vpop.f32.mrf.mxu0 }
 0x5be   :  { %v2457_v14 = vpack.c.bf16 %v2445_v6, %v2443_v5  ;;  %v6322_v34 = vadd.f32 %v2331_v7, %v2175_v11  ;;  %v4145_v11 = vld [vmem:[%s6589_s3 + $0x19c] sm:$0xf] }
 0x5bf   :  { %v3904_v31 = vor.u32 %v4145_v11, %v3901_v51  ;;  %v3888_v5 = vld [vmem:[%s6589_s3 + $0x1b8] sm:$0x11]  ;;  %v3936_v11 = vld [vmem:[%s6589_s3 + $0x1c0] sm:$0xf]  ;;  %v4151_v51 = vld [vmem:[%s6589_s3 + $0x1c4] sm:$0xf0] }
 0x5c0   :  { %3834 = vmatmul.msk.bf16.gmra.mxu3 %vm1753_vm2, %v2457_v14  ;;  %v2713_v6 = vunpack.c.h.b16 %v3888_v5 }
 0x5c1   :  { %2942 = vmatpush.bf16.msra.mxu3 %v5850_v49  ;;  %v3893_v49 = vld [vmem:[%s6589_s3 + $0x190] sm:$0xf0] }
 0x5c2   :  { %v3896_v59 = vor.u32 %v4143_v28, %v3893_v49  ;;  %v2721_v14 = vpack.c.b16 %v2713_v6, %v2713_v6 }
 0x5c3   :  { %v2419_v61 = vpop.f32.mrf.mxu2 }
 0x5c4   :  { %v2448_v41 = vadd.f32 %v2447_v33, %v2419_v61  ;;  %3913 = vmatmul.msk.bf16.vlgmr.msrb.gmra.mxu0 %vm1552_vm1, %v3896_v59  ;;  %v3909_v33 = vld [vmem:[%s6589_s3 + $0x1b0] sm:$0xf0] }
 0x5c5   :  { %v6326_v47 = vpop.f32.mrf.mxu0  ;;  %v3912_v37 = vor.u32 %v4147_v29, %v3909_v33 }
 0x5cb   :  { %v2421_v16 = vpop.f32.mrf.mxu2 }
 0x5cc   :  { %v2450_v55 = vadd.f32 %v2449_v9, %v2421_v16  ;;  %v3907_v16 = vld [vmem:[%s6589_s3 + $0x1a8] sm:$0xf] }
 0x5cd   :  { %v2336_v32 = vpop.f32.mrf.mxu0 }
 0x5ce   :  { %v2458_v10 = vpack.c.bf16 %v2450_v55, %v2448_v41  ;;  %v6328_v36 = vadd.f32 %v2336_v32, %v2177_v53  ;;  %v3892_v53 = vor.u32 %v4144_v40, %v3891_v23  ;;  %v4148_v41 = vld [vmem:[%s6589_s3 + $0x1ac] sm:$0xf0]  ;;  %v3937_v23 = vor.u32 %v4151_v51, %v3936_v11 }
 0x5d0   :  { %3835 = vmatmul.msk.bf16.gmra.mxu3 %vm1753_vm2, %v2458_v10 }
 0x5d3   :  { %v2424_v19 = vpop.f32.mrf.mxu2 }
 0x5d4   :  { %v2453_v13 = vadd.f32 %v2452_v22, %v2424_v19  ;;  %3914 = vmatmul.msk.bf16.gmra.mxu0 %vm1552_vm1, %v3904_v31  ;;  %v3900_v22 = vor.u32 %v4146_v20, %v3899_v48  ;;  %v3908_v19 = vor.u32 %v4148_v41, %v3907_v16  ;;  %v3938_v31 = vld [vmem:[%s6589_s3 + $0x1c8] sm:$0xf0]  ;;  %v4155_v48 = vld [vmem:[%s6589_s3 + $0x1e4] sm:$0xf0]  ;;  %v4154_v20 = vld [vmem:[%s6589_s3 + $0x1e4] sm:$0xf] }
 0x5d5   :  { %v2338_v45 = vpop.f32.mrf.mxu0 }
 0x5d6   :  { %v2459_v38 = vpack.c.bf16 %v2453_v13, %v2453_v13 }
 0x5db   :  { %v2426_v21 = vpop.f32.mrf.mxu2 }
 0x5dc   :  { %v2712_v21 = vunpack.c.l.b16 %v3888_v5  ;;  %v3933_v5 = vld [vmem:[%s6589_s3 + $0x1f0] sm:$0x11] }
 0x5dd   :  { %v2578_v12 = vpop.f32.mrf.mxu0  ;;  %v2882_v6 = vunpack.c.h.b16 %v3933_v5 }
 0x5e0   :  { %3836 = vmatmul.msk.bf16.gmra.mxu3 %vm1753_vm2, %v2459_v38 }
 0x5e3   :  { %v2606_v63 = vpop.f32.mrf.mxu2 }
 0x5e4   :  { %v2607_v52 = vadd.f32 %v2606_v63, %v2578_v12  ;;  %3915 = vmatmul.msk.bf16.gmra.mxu0 %vm1552_vm1, %v3912_v37  ;;  %v2720_v63 = vpack.c.b16 %v2712_v21, %v2712_v21 }
 0x5e5   :  { %v2580_v44 = vpop.f32.mrf.mxu0 }
 0x5eb   :  { %v2608_v3 = vpop.f32.mrf.mxu2 }
 0x5ec   :  { %v2609_v54 = vadd.f32 %v2608_v3, %v2580_v44  ;;  %v4150_v44 = vld [vmem:[%s6589_s3 + $0x1c4] sm:$0xf] }
 0x5ed   :  { %v2583_v0 = vpop.f32.mrf.mxu0  ;;  %v3941_v40 = vor.u32 %v4150_v44, %v3938_v31 }
 0x5ee   :  { %v2625_v46 = vpack.c.bf16 %v2609_v54, %v2607_v52  ;;  %v3944_v54 = vld [vmem:[%s6589_s3 + $0x1d0] sm:$0xf] }
 0x5f0   :  { %3878 = vmatmul.msk.bf16.vlgmr.msrb.gmra.mxu1 %vm1753_vm2, %v2625_v46  ;;  %2746 = vmatmul.bf16.vlgmr.msrb.gmra.mxu3 %v3892_v53  ;;  %v4153_v53 = vld [vmem:[%s6589_s3 + $0x1d4] sm:$0xf0]  ;;  %v3946_v46 = vld [vmem:[%s6589_s3 + $0x1d8] sm:$0xf0] }
 0x5f1   :  { %v3945_v33 = vor.u32 %v4153_v53, %v3944_v54 }
 0x5f3   :  { %v2611_v25 = vpop.f32.mrf.mxu2 }
 0x5f4   :  { %v2612_v18 = vadd.f32 %v2611_v25, %v2583_v0  ;;  %3916 = vmatmul.msk.bf16.gmra.mxu0 %vm1552_vm1, %v2721_v14  ;;  %v4152_v0 = vld [vmem:[%s6589_s3 + $0x1d4] sm:$0xf] }
 0x5f5   :  { %v2585_v9 = vpop.f32.mrf.mxu0  ;;  %v3949_v25 = vor.u32 %v4152_v0, %v3946_v46 }
 0x5fb   :  { %v2613_v1 = vpop.f32.mrf.mxu2 }
 0x5fc   :  { %v2614_v17 = vadd.f32 %v2613_v1, %v2585_v9  ;;  %v3952_v9 = vld [vmem:[%s6589_s3 + $0x1e0] sm:$0xf]  ;;  %v3954_v1 = vld [vmem:[%s6589_s3 + $0x1e8] sm:$0xf0] }
 0x5fd   :  { %v2588_v58 = vpop.f32.mrf.mxu0 }
 0x5fe   :  { %v2626_v26 = vpack.c.bf16 %v2614_v17, %v2612_v18  ;;  %v3953_v17 = vor.u32 %v4155_v48, %v3952_v9 }
 0x600   :  { %3879 = vmatmul.msk.bf16.gmra.mxu1 %vm1753_vm2, %v2626_v26  ;;  %2751 = vmatmul.bf16.gmra.mxu3 %v3900_v22 }
 0x603   :  { %v2616_v7 = vpop.f32.mrf.mxu2 }
 0x604   :  { %v2617_v32 = vadd.f32 %v2616_v7, %v2588_v58  ;;  %v2881_v7 = vunpack.c.l.b16 %v3933_v5 }
 0x605   :  { %v2590_v61 = vpop.f32.mrf.mxu0 }
 0x606   :  { %v2889_v16 = vpack.c.b16 %v2881_v7, %v2881_v7 }
 0x60b   :  { %v2618_v55 = vpop.f32.mrf.mxu2 }
 0x60c   :  { %v2619_v10 = vadd.f32 %v2618_v55, %v2590_v61  ;;  %v2890_v61 = vpack.c.b16 %v2882_v6, %v2882_v6  ;;  %v4149_v55 = vld [vmem:[%s6590_s4 + $0x38] sm:$0xff] }
 0x60d   :  { %v2593_v28 = vpop.f32.mrf.mxu0  ;;  %2826 = vmatpush.bf16.msrb.mxu2 %v4149_v55 }
 0x60e   :  { %v2627_v49 = vpack.c.bf16 %v2619_v10, %v2617_v32 }
 0x610   :  { %3880 = vmatmul.msk.bf16.gmra.mxu1 %vm1753_vm2, %v2627_v49  ;;  %2756 = vmatmul.bf16.gmra.mxu3 %v3908_v19 }
 0x613   :  { %v2621_v45 = vpop.f32.mrf.mxu2 }
 0x614   :  { %v2622_v13 = vadd.f32 %v2621_v45, %v2593_v28  ;;  %v1824_v28 = vadd.f32 %v6131_v56, %v6129_v62 }
 0x615   :  { %v2595_v59 = vpop.f32.mrf.mxu0 }
 0x616   :  { %v2628_v38 = vpack.c.bf16 %v2622_v13, %v2622_v13  ;;  %v2003_v59 = vadd.f32 %v6184_v57, %v1824_v28 }
 0x618   :  { %v2172_v21 = vadd.f32 %v6282_v2, %v2003_v59 }
 0x61b   :  { %v2623_v12 = vpop.f32.mrf.mxu2 }
 0x61c   :  { %v2341_v12 = vadd.f32 %v6311_v15, %v2172_v21 }
 0x620   :  { %3881 = vmatmul.msk.bf16.gmra.mxu1 %vm1753_vm2, %v2628_v38  ;;  %2761 = vmatmul.bf16.gmra.mxu3 %v2720_v63 }
 0x630   :  { %2915 = vmatmul.bf16.vlgmr.msra.gmra.mxu1 %v3937_v23  ;;  %3958 = vmatmul.msk.bf16.vlgmr.msra.gmra.mxu3 %vm1552_vm1, %v3941_v40 }
 0x633   :  { %v2490_v3 = vpop.f32.mrf.mxu3 }
 0x634   :  { %v2509_v52 = vadd.f32 %v2490_v3, %v6309_v60 }
 0x63b   :  { %v2492_v29 = vpop.f32.mrf.mxu3 }
 0x63c   :  { %v2510_v63 = vadd.f32 %v2492_v29, %v2341_v12 }
 0x640   :  { %2920 = vmatmul.bf16.gmra.mxu1 %v3945_v33  ;;  %3959 = vmatmul.msk.bf16.gmra.mxu3 %vm1552_vm1, %v3949_v25  ;;  %v4156_v25 = vld [vmem:[%s6590_s4 + $0x40] sm:$0xff] }
 0x641   :  { %v2775_v26 = vpop.f32.mrf.mxu0  ;;  %2995 = vmatpush.bf16.msra.mxu0 %v4156_v25 }
 0x643   :  { %v2495_v60 = vpop.f32.mrf.mxu3 }
 0x644   :  { %v2511_v37 = vadd.f32 %v2495_v60, %v6313_v50  ;;  %v3957_v50 = vor.u32 %v4154_v20, %v3954_v1 }
 0x649   :  { %v2777_v41 = vpop.f32.mrf.mxu0 }
 0x64b   :  { %v6419_v18 = vpop.f32.mrf.mxu3 }
 0x650   :  { %2925 = vmatmul.bf16.gmra.mxu1 %v3953_v17  ;;  %3960 = vmatmul.msk.bf16.gmra.mxu3 %vm1552_vm1, %v3957_v50 }
 0x651   :  { %v2780_v10 = vpop.f32.mrf.mxu0 }
 0x653   :  { %v2500_v22 = vpop.f32.mrf.mxu3 }
 0x654   :  { %v2513_v58 = vadd.f32 %v2500_v22, %v6322_v34 }
 0x659   :  { %v2782_v49 = vpop.f32.mrf.mxu0 }
 0x65b   :  { %v6426_v14 = vpop.f32.mrf.mxu3 }
 0x660   :  { %3961 = vmatmul.msk.bf16.gmra.mxu3 %vm1552_vm1, %v2890_v61  ;;  %2930 = vmatmul.bf16.gmra.mxu1 %v2889_v16 }
 0x661   :  { %v2785_v11 = vpop.f32.mrf.mxu0 }
 0x663   :  { %v2505_v34 = vpop.f32.mrf.mxu3 }
 0x664   :  { %v2515_v32 = vadd.f32 %v2505_v34, %v6328_v36 }
 0x669   :  { %v2787_v62 = vpop.f32.mrf.mxu0 }
 0x66b   :  { %v2507_v19 = vpop.f32.mrf.mxu3 }
 0x66d   :  { %v2659_v45 = vpop.f32.mrf.mxu1 }
 0x66e   :  { %v6436_v13 = vadd.f32 %v2659_v45, %v2509_v52 }
 0x671   :  { %v2790_v2 = vpop.f32.mrf.mxu0 }
 0x673   :  { %v2747_v38 = vpop.f32.mrf.mxu3 }
 0x674   :  { %v2776_v31 = vadd.f32 %v2775_v26, %v2747_v38 }
 0x675   :  { %v2661_v51 = vpop.f32.mrf.mxu1 }
 0x676   :  { %v6440_v36 = vadd.f32 %v2661_v51, %v2510_v63 }
 0x679   :  { %v2792_v0 = vpop.f32.mrf.mxu0 }
 0x67b   :  { %v2749_v44 = vpop.f32.mrf.mxu3 }
 0x67c   :  { %v2778_v23 = vadd.f32 %v2777_v41, %v2749_v44 }
 0x67d   :  { %v2664_v56 = vpop.f32.mrf.mxu1 }
 0x67e   :  { %v2794_v40 = vpack.c.bf16 %v2778_v23, %v2776_v31  ;;  %v6442_v3 = vadd.f32 %v2664_v56, %v2511_v37 }
 0x680   :  { %3923 = vmatmul.msk.bf16.vlgmr.msrb.gmra.mxu2 %vm1753_vm2, %v2794_v40 }
 0x683   :  { %v2752_v57 = vpop.f32.mrf.mxu3 }
 0x684   :  { %v2781_v54 = vadd.f32 %v2780_v10, %v2752_v57 }
 0x685   :  { %v6445_v52 = vpop.f32.mrf.mxu1 }
 0x68b   :  { %v2754_v15 = vpop.f32.mrf.mxu3 }
 0x68c   :  { %v2783_v53 = vadd.f32 %v2782_v49, %v2754_v15 }
 0x68d   :  { %v2669_v46 = vpop.f32.mrf.mxu1 }
 0x68e   :  { %v2795_v29 = vpack.c.bf16 %v2783_v53, %v2781_v54  ;;  %v6447_v33 = vadd.f32 %v2669_v46, %v2513_v58  ;;  %v1829_v46 = vadd.f32 %v6152_v30, %v6150_v43 }
 0x690   :  { %3924 = vmatmul.msk.bf16.gmra.mxu2 %vm1753_vm2, %v2795_v29  ;;  %v2005_v29 = vadd.f32 %v6196_v35, %v1829_v46  ;;  %v4165_v46 = vld [vmem:[%s6592_s6 + $0x20] sm:$0xff] }
 0x693   :  { %v2757_v60 = vpop.f32.mrf.mxu3 }
 0x694   :  { %v2786_v48 = vadd.f32 %v2785_v11, %v2757_v60  ;;  %v2174_v60 = vadd.f32 %v6298_v8, %v2005_v29  ;;  %v4167_v29 = vld [vmem:[%s6592_s6 + $0x28] sm:$0xff] }
 0x695   :  { %v6453_v37 = vpop.f32.mrf.mxu1 }
 0x69b   :  { %v2759_v9 = vpop.f32.mrf.mxu3 }
 0x69c   :  { %v2788_v20 = vadd.f32 %v2787_v62, %v2759_v9 }
 0x69d   :  { %v2674_v1 = vpop.f32.mrf.mxu1 }
 0x69e   :  { %v2796_v17 = vpack.c.bf16 %v2788_v20, %v2786_v48  ;;  %v6455_v50 = vadd.f32 %v2674_v1, %v2515_v32  ;;  %v2343_v48 = vadd.f32 %v6318_v27, %v2174_v60  ;;  %v4171_v60 = vld [vmem:[%s6592_s6 + $0x38] sm:$0xff] }
 0x6a0   :  { %3925 = vmatmul.msk.bf16.gmra.mxu2 %vm1753_vm2, %v2796_v17  ;;  %v2512_v20 = vadd.f32 %v6419_v18, %v2343_v48  ;;  %v4160_v48 = vld [vmem:[%s6593_s7 + $0x8] sm:$0xff] }
 0x6a2   :  { %v2681_v1 = vadd.f32 %v6445_v52, %v2512_v20  ;;  %v4162_v20 = vld [vmem:[%s6593_s7 + $0x10] sm:$0xff] }
 0x6a3   :  { %v2762_v22 = vpop.f32.mrf.mxu3  ;;  %3199 = vmatpush.bf16.msrb.mxu3 %v4162_v20 }
 0x6a4   :  { %v2791_v26 = vadd.f32 %v2790_v2, %v2762_v22 }
 0x6a5   :  { %v2676_v58 = vpop.f32.mrf.mxu1 }
 0x6a6   :  { %v2797_v7 = vpack.c.bf16 %v2791_v26, %v2791_v26 }
 0x6ab   :  { %v2764_v5 = vpop.f32.mrf.mxu3 }
 0x6ad   :  { %v2916_v6 = vpop.f32.mrf.mxu1 }
 0x6b0   :  { %3926 = vmatmul.msk.bf16.gmra.mxu2 %vm1753_vm2, %v2797_v7 }
 0x6b3   :  { %v2944_v61 = vpop.f32.mrf.mxu3 }
 0x6b4   :  { %v2945_v55 = vadd.f32 %v2944_v61, %v2916_v6 }
 0x6b5   :  { %v2918_v16 = vpop.f32.mrf.mxu1 }
 0x6bb   :  { %v2946_v41 = vpop.f32.mrf.mxu3 }
 0x6bc   :  { %v2947_v34 = vadd.f32 %v2946_v41, %v2918_v16 }
 0x6bd   :  { %v2921_v10 = vpop.f32.mrf.mxu1 }
 0x6be   :  { %v2963_v19 = vpack.c.bf16 %v2947_v34, %v2945_v55 }
 0x6c0   :  { %3968 = vmatmul.msk.bf16.vlgmr.msra.gmra.mxu0 %vm1753_vm2, %v2963_v19 }
 0x6c3   :  { %v2949_v32 = vpop.f32.mrf.mxu3 }
 0x6c4   :  { %v2950_v45 = vadd.f32 %v2949_v32, %v2921_v10 }
 0x6c5   :  { %v2923_v28 = vpop.f32.mrf.mxu1 }
 0x6cb   :  { %v2951_v49 = vpop.f32.mrf.mxu3 }
 0x6cc   :  { %v2952_v59 = vadd.f32 %v2951_v49, %v2923_v28 }
 0x6cd   :  { %v2926_v21 = vpop.f32.mrf.mxu1 }
 0x6ce   :  { %v2964_v12 = vpack.c.bf16 %v2952_v59, %v2950_v45 }
 0x6d0   :  { %3969 = vmatmul.msk.bf16.gmra.mxu0 %vm1753_vm2, %v2964_v12 }
 0x6d3   :  { %v2954_v38 = vpop.f32.mrf.mxu3 }
 0x6d4   :  { %v2955_v51 = vadd.f32 %v2954_v38, %v2926_v21 }
 0x6d5   :  { %v2928_v63 = vpop.f32.mrf.mxu1 }
 0x6db   :  { %v2956_v11 = vpop.f32.mrf.mxu3 }
 0x6dc   :  { %v2957_v44 = vadd.f32 %v2956_v11, %v2928_v63 }
 0x6dd   :  { %v2931_v31 = vpop.f32.mrf.mxu1 }
 0x6de   :  { %v2965_v23 = vpack.c.bf16 %v2957_v44, %v2955_v51 }
 0x6e0   :  { %3970 = vmatmul.msk.bf16.gmra.mxu0 %vm1753_vm2, %v2965_v23 }
 0x6e3   :  { %v2959_v62 = vpop.f32.mrf.mxu3 }
 0x6e4   :  { %v2960_v40 = vadd.f32 %v2959_v62, %v2931_v31 }
 0x6e5   :  { %v2933_v56 = vpop.f32.mrf.mxu1 }
 0x6e6   :  { %v2966_v2 = vpack.c.bf16 %v2960_v40, %v2960_v40  ;;  %v6776_v56 = vmov 0  }
 0x6e7   :  { %v3058_v40 = vsel %vm3056_vm3, 65535, %v6776_v56 }
 0x6eb   :  { %v2961_v57 = vpop.f32.mrf.mxu3 }
 0x6f0   :  { %3971 = vmatmul.msk.bf16.gmra.mxu0 %vm1753_vm2, %v2966_v2 }
 0x703   :  { %v2828_v15 = vpop.f32.mrf.mxu2 }
 0x704   :  { %v2847_v54 = vadd.f32 %v2828_v15, %v6436_v13 }
 0x70b   :  { %v2830_v53 = vpop.f32.mrf.mxu2 }
 0x70c   :  { %v2848_v0 = vadd.f32 %v2830_v53, %v6440_v36  ;;  %v1834_v36 = vadd.f32 %v6170_v42, %v6168_v4  ;;  %v4329_v4 = vld [vmem:[%s6591_s5] ss:$0 sm:$0xff]  ;;  %v4163_v53 = vld [vmem:[%s6592_s6 + $0x18] sm:$0xff] }
 0x70e   :  { %v2007_v43 = vadd.f32 %v6205_v24, %v1834_v36 }
 0x710   :  { %v2176_v35 = vadd.f32 %v6305_v39, %v2007_v43 }
 0x713   :  { %v2833_v25 = vpop.f32.mrf.mxu2 }
 0x714   :  { %v2849_v9 = vadd.f32 %v2833_v25, %v6442_v3  ;;  %v2345_v3 = vadd.f32 %v6326_v47, %v2176_v35  ;;  %v4169_v25 = vld [vmem:[%s6592_s6 + $0x30] sm:$0xff]  ;;  %v4166_v35 = vld [vmem:[%s6593_s7 + $0x20] sm:$0xff] }
 0x715   :  { %3307 = vmatpush.bf16.msra.mxu3 %v4166_v35 }
 0x716   :  { %v2514_v27 = vadd.f32 %v6426_v14, %v2345_v3 }
 0x718   :  { %v2683_v18 = vadd.f32 %v6453_v37, %v2514_v27 }
 0x71b   :  { %v2835_v13 = vpop.f32.mrf.mxu2 }
 0x71c   :  { %v2850_v17 = vadd.f32 %v2835_v13, %v2681_v1  ;;  %v4158_v13 = vld [vmem:[%s6593_s7] sm:$0xff] }
 0x723   :  { %v2838_v30 = vpop.f32.mrf.mxu2 }
 0x724   :  { %v2851_v8 = vadd.f32 %v2838_v30, %v6447_v33 }
 0x72b   :  { %v2840_v22 = vpop.f32.mrf.mxu2 }
 0x72c   :  { %v2852_v52 = vadd.f32 %v2840_v22, %v2683_v18 }
 0x733   :  { %v2843_v58 = vpop.f32.mrf.mxu2 }
 0x734   :  { %v2853_v11 = vadd.f32 %v2843_v58, %v6455_v50  ;;  %v4157_v50 = vld [vmem:[%s6592_s6] sm:$0xff]  ;;  %v4170_v58 = vld [vmem:[%s6593_s7 + $0x30] sm:$0xff] }
 0x73b   :  { %v2845_v26 = vpop.f32.mrf.mxu2 }
 0x73d   :  { %v2997_v5 = vpop.f32.mrf.mxu0 }
 0x73e   :  { %v3016_v6 = vadd.f32 %v2997_v5, %v2847_v54  ;;  %v4161_v54 = vld [vmem:[%s6592_s6 + $0x10] sm:$0xff] }
 0x740   :  { %v3027_v24 = vadd.f32 %v4329_v4, %v3016_v6 }
 0x742   :  { %v3034_v7 = vmax.f32 %v3027_v24, 0.0  ;;  %v4168_v24 = vld [vmem:[%s6593_s7 + $0x28] sm:$0xff] }
 0x745   :  { %v2999_v42 = vpop.f32.mrf.mxu0 }
 0x746   :  { %v3017_v39 = vadd.f32 %v2999_v42, %v2848_v0  ;;  %v4159_v0 = vld [vmem:[%s6592_s6 + $0x8] sm:$0xff] }
 0x748   :  { %v3028_v33 = vadd.f32 %v4329_v4, %v3017_v39  ;;  %v4174_v39 = vld [vmem:[%s6593_s7 + $0x40] sm:$0xff] }
 0x74a   :  { %v3035_v47 = vmax.f32 %v3028_v33, 0.0 }
 0x74c   :  { %v6484_v61 = vpack.c.bf16 %v3035_v47, %v3034_v7 }
 0x74d   :  { %v3002_v14 = vpop.f32.mrf.mxu0 }
 0x74e   :  { %v3018_v37 = vadd.f32 %v3002_v14, %v2849_v9  ;;  %v4173_v9 = vld [vmem:[%s6592_s6 + $0x40] sm:$0xff] }
 0x750   :  { %v3029_v41 = vadd.f32 %v4329_v4, %v3018_v37 }
 0x752   :  { %v3036_v10 = vmax.f32 %v3029_v41, 0.0 }
 0x755   :  { %v3004_v16 = vpop.f32.mrf.mxu0 }
 0x756   :  { %v3019_v55 = vadd.f32 %v3004_v16, %v2850_v17  ;;  %v4172_v16 = vld [vmem:[%s6593_s7 + $0x38] sm:$0xff] }
 0x758   :  { %v3030_v34 = vadd.f32 %v4329_v4, %v3019_v55 }
 0x75a   :  { %v3037_v19 = vmax.f32 %v3030_v34, 0.0 }
 0x75c   :  { %v6486_v32 = vpack.c.bf16 %v3037_v19, %v3036_v10 }
 0x75d   :  { %v3007_v28 = vpop.f32.mrf.mxu0 }
 0x75e   :  { %v3020_v49 = vadd.f32 %v3007_v28, %v2851_v8 }
 0x760   :  { %v3031_v59 = vadd.f32 %v4329_v4, %v3020_v49 }
 0x762   :  { %v3038_v38 = vmax.f32 %v3031_v59, 0.0 }
 0x765   :  { %v3009_v45 = vpop.f32.mrf.mxu0 }
 0x766   :  { %v3021_v21 = vadd.f32 %v3009_v45, %v2852_v52  ;;  %v4164_v52 = vld [vmem:[%s6593_s7 + $0x18] sm:$0xff] }
 0x768   :  { %v3032_v12 = vadd.f32 %v4329_v4, %v3021_v21 }
 0x76a   :  { %v3039_v63 = vmax.f32 %v3032_v12, 0.0 }
 0x76c   :  { %v3043_v51 = vpack.c.bf16 %v3039_v63, %v3038_v38 }
 0x76d   :  { %v3012_v44 = vpop.f32.mrf.mxu0 }
 0x76e   :  { %v3022_v31 = vadd.f32 %v3012_v44, %v2853_v11 }
 0x770   :  { %v3033_v23 = vadd.f32 %v4329_v4, %v3022_v31 }
 0x772   :  { %v3040_v62 = vmax.f32 %v3033_v23, 0.0 }
 0x774   :  { %v3044_v57 = vpack.c.bf16 %v3040_v62, %v3040_v62 }
 0x775   :  { %v3014_v2 = vpop.f32.mrf.mxu0 }
 0x776   :  { %v3060_v15 = vand.u32 %v3058_v40, %v3044_v57 }
 0x778   :  { %3066 = vmatpush.bf16.msra.mxu2 %v3060_v15  ;;  %3169 = vmatpush.bf16.msrb.mxu1 %v3060_v15 }
 0x779   :  { %3223 = vmatpush.bf16.msrb.mxu0 %v3060_v15 }
 0x77c   :  { %3067 = vmatpush.bf16.msra.mxu2 %v3043_v51  ;;  %3170 = vmatpush.bf16.msrb.mxu1 %v3043_v51 }
 0x77d   :  { %3224 = vmatpush.bf16.msrb.mxu0 %v3043_v51 }
 0x780   :  { %3068 = vmatpush.bf16.msra.mxu2 %v6486_v32  ;;  %3171 = vmatpush.bf16.msrb.mxu1 %v6486_v32 }
 0x781   :  { %3225 = vmatpush.bf16.msrb.mxu0 %v6486_v32 }
 0x784   :  { %3069 = vmatpush.bf16.msra.mxu2 %v6484_v61  ;;  %3172 = vmatpush.bf16.msrb.mxu1 %v6484_v61 }
 0x785   :  { %3226 = vmatpush.bf16.msrb.mxu0 %v6484_v61 }
 0x787   :  { %3976 = vmatmul.msk.bf16.vlgmr.msra.gmra.mxu2 %vm3052_vm4, %v4157_v50  ;;  %4002 = vmatmul.msk.bf16.vlgmr.msrb.gmra.mxu1 %vm3052_vm4, %v4161_v54 }
 0x788   :  { %3094 = vmatpush.bf16.msrb.mxu2 %v3060_v15  ;;  %3277 = vmatpush.bf16.msra.mxu1 %v3060_v15 }
 0x789   :  { %3331 = vmatpush.bf16.msra.mxu0 %v3060_v15 }
 0x78a   :  { %4016 = vmatmul.msk.bf16.vlgmr.msrb.gmra.mxu0 %vm3052_vm4, %v4163_v53 }
 0x78c   :  { %3095 = vmatpush.bf16.msrb.mxu2 %v3043_v51  ;;  %3278 = vmatpush.bf16.msra.mxu1 %v3043_v51 }
 0x78d   :  { %3332 = vmatpush.bf16.msra.mxu0 %v3043_v51 }
 0x790   :  { %3096 = vmatpush.bf16.msrb.mxu2 %v6486_v32  ;;  %3279 = vmatpush.bf16.msra.mxu1 %v6486_v32 }
 0x791   :  { %3333 = vmatpush.bf16.msra.mxu0 %v6486_v32 }
 0x794   :  { %3097 = vmatpush.bf16.msrb.mxu2 %v6484_v61  ;;  %3280 = vmatpush.bf16.msra.mxu1 %v6484_v61 }
 0x795   :  { %3334 = vmatpush.bf16.msra.mxu0 %v6484_v61 }
 0x797   :  { %3983 = vmatmul.msk.bf16.vlgmr.msrb.gmra.mxu2 %vm3052_vm4, %v4159_v0  ;;  %4030 = vmatmul.msk.bf16.vlgmr.msra.gmra.mxu1 %vm3052_vm4, %v4165_v46 }
 0x798   :  { %3385 = vmatpush.bf16.msrb.mxu1 %v3060_v15  ;;  %3124 = vmatpush.bf16.msra.mxu2 %v4160_v48  ;;  %v4386_v48 = vmov 16.0  }
 0x799   :  { %3439 = vmatpush.bf16.msrb.mxu0 %v3060_v15  ;;  %4331 = vrcp.f32 %v4386_v48 }
 0x79a   :  { %4044 = vmatmul.msk.bf16.vlgmr.msra.gmra.mxu0 %vm3052_vm4, %v4167_v29 }
 0x79c   :  { %3386 = vmatpush.bf16.msrb.mxu1 %v3043_v51  ;;  %3147 = vmatpush.bf16.msrb.mxu2 %v4158_v13 }
 0x79d   :  { %3440 = vmatpush.bf16.msrb.mxu0 %v3043_v51 }
 0x7a0   :  { %3387 = vmatpush.bf16.msrb.mxu1 %v6486_v32 }
 0x7a1   :  { %3441 = vmatpush.bf16.msrb.mxu0 %v6486_v32 }
 0x7a4   :  { %3388 = vmatpush.bf16.msrb.mxu1 %v6484_v61 }
 0x7a5   :  { %3442 = vmatpush.bf16.msrb.mxu0 %v6484_v61 }
 0x7a7   :  { %4058 = vmatmul.msk.bf16.vlgmr.msrb.gmra.mxu1 %vm3052_vm4, %v4169_v25 }
 0x7a8   :  { %3493 = vmatpush.bf16.msra.mxu1 %v3060_v15 }
 0x7aa   :  { %4072 = vmatmul.msk.bf16.vlgmr.msrb.gmra.mxu0 %vm3052_vm4, %v4171_v60 }
 0x7ac   :  { %3494 = vmatpush.bf16.msra.mxu1 %v3043_v51 }
 0x7b0   :  { %3495 = vmatpush.bf16.msra.mxu1 %v6486_v32 }
 0x7b4   :  { %3496 = vmatpush.bf16.msra.mxu1 %v6484_v61 }
 0x7b7   :  { %4086 = vmatmul.msk.bf16.vlgmr.msra.gmra.mxu1 %vm3052_vm4, %v4173_v9 }
 0x804   :  { %v3174_v1 = vpop.f32.mrf.mxu1 }
 0x807   :  { %v3228_v4 = vpop.f32.mrf.mxu0 }
 0x80a   :  { %v3071_v17 = vpop.f32.mrf.mxu2 }
 0x80c   :  { %v3176_v36 = vpop.f32.mrf.mxu1 }
 0x80d   :  { %v3179_v43 = vpack.c.bf16 %v3176_v36, %v3174_v1  ;;  %v4330_v1 = vld [vmem:[%s6594_s8] ss:$0 sm:$0xff]  ;;  %s4387_s8 = smov [#allocation2]  }
 0x80e   :  { %s3565_s0 = sshll.u32 %s4387_s8, 4  ;;  %s3566_s0 = int_to_ptr.vmem [resolvable:$true] %s3565_s0 }
 0x80f   :  { %4009 = vmatmul.msk.bf16.vlgmr.msrb.gmra.mxu3 %vm1753_vm2, %v3179_v43  ;;  %v3230_v47 = vpop.f32.mrf.mxu0 }
 0x810   :  { %3415 = vmatpush.bf16.msrb.mxu3 %v4170_v58  ;;  %v3233_v41 = vpack.c.bf16 %v3230_v47, %v3228_v4 }
 0x812   :  { %v3073_v30 = vpop.f32.mrf.mxu2 }
 0x813   :  { %v3076_v33 = vpack.c.bf16 %v3073_v30, %v3071_v17  ;;  %v4332_v30 = vpop.eup %4331 }
 0x814   :  { %v3282_v8 = vpop.f32.mrf.mxu1  ;;  %vm3555_vm6 = vweird.f32 %v4332_v30 }
 0x817   :  { %v3336_v37 = vpop.f32.mrf.mxu0 }
 0x81a   :  { %v3099_v3 = vpop.f32.mrf.mxu2 }
 0x81c   :  { %v3284_v27 = vpop.f32.mrf.mxu1 }
 0x81d   :  { %v3287_v18 = vpack.c.bf16 %v3284_v27, %v3282_v8 }
 0x81f   :  { %4037 = vmatmul.msk.bf16.vlgmr.msra.gmra.mxu3 %vm1753_vm2, %v3287_v18  ;;  %v3338_v55 = vpop.f32.mrf.mxu0  ;;  %v3551_v18 = vmul.f32 16.0, %v4332_v30 }
 0x820   :  { %3523 = vmatpush.bf16.msra.mxu3 %v4174_v39  ;;  %v3341_v34 = vpack.c.bf16 %v3338_v55, %v3336_v37 }
 0x822   :  { %v3101_v22 = vpop.f32.mrf.mxu2 }
 0x823   :  { %v3104_v26 = vpack.c.bf16 %v3101_v22, %v3099_v3 }
 0x824   :  { %v3390_v5 = vpop.f32.mrf.mxu1 }
 0x825   :  { %3990 = vmatmul.msk.bf16.vlgmr.msra.gmra.mxu2 %vm1753_vm2, %v3104_v26  ;;  %v3552_v26 = vsub.f32 1.0, %v3551_v18 }
 0x826   :  { %3253 = vmatpush.bf16.msra.mxu2 %v4164_v52 }
 0x827   :  { %v3444_v10 = vpop.f32.mrf.mxu0  ;;  %v3553_v4 = vmul.f32 %v4332_v30, %v3552_v26 }
 0x829   :  { %v3554_v39 = vadd.f32 %v4332_v30, %v3553_v4 }
 0x82b   :  { %v3556_v47 = vsel %vm3555_vm6, %v4332_v30, %v3554_v39 }
 0x82c   :  { %v3392_v6 = vpop.f32.mrf.mxu1 }
 0x82d   :  { %v3395_v42 = vpack.c.bf16 %v3392_v6, %v3390_v5 }
 0x82f   :  { %4065 = vmatmul.msk.bf16.vlgmr.msrb.gmra.mxu3 %vm1753_vm2, %v3395_v42  ;;  %v3446_v19 = vpop.f32.mrf.mxu0 }
 0x830   :  { %v3449_v32 = vpack.c.bf16 %v3446_v19, %v3444_v10 }
 0x834   :  { %v3498_v7 = vpop.f32.mrf.mxu1 }
 0x835   :  { %3995 = vmatmul.msk.bf16.vlgmr.msrb.gmra.mxu2 %vm1753_vm2, %v3076_v33 }
 0x836   :  { %3361 = vmatpush.bf16.msrb.mxu2 %v4168_v24 }
 0x83c   :  { %v3500_v61 = vpop.f32.mrf.mxu1 }
 0x83d   :  { %v3503_v14 = vpack.c.bf16 %v3500_v61, %v3498_v7 }
 0x83f   :  { %4093 = vmatmul.msk.bf16.vlgmr.msra.gmra.mxu3 %vm1753_vm2, %v3503_v14 }
 0x845   :  { %4023 = vmatmul.msk.bf16.vlgmr.msra.gmra.mxu2 %vm1753_vm2, %v3233_v41 }
 0x846   :  { %3469 = vmatpush.bf16.msra.mxu2 %v4172_v16 }
 0x855   :  { %4051 = vmatmul.msk.bf16.vlgmr.msrb.gmra.mxu2 %vm1753_vm2, %v3341_v34 }
 0x865   :  { %4079 = vmatmul.msk.bf16.vlgmr.msra.gmra.mxu2 %vm1753_vm2, %v3449_v32 }
 0x892   :  { %v3201_v49 = vpop.f32.mrf.mxu3 }
 0x89a   :  { %v3203_v59 = vpop.f32.mrf.mxu3 }
 0x8a2   :  { %v3309_v38 = vpop.f32.mrf.mxu3 }
 0x8a8   :  { %v3126_v28 = vpop.f32.mrf.mxu2 }
 0x8aa   :  { %v3311_v11 = vpop.f32.mrf.mxu3 }
 0x8b0   :  { %v3128_v45 = vpop.f32.mrf.mxu2 }
 0x8b2   :  { %v3417_v44 = vpop.f32.mrf.mxu3 }
 0x8b8   :  { %v3149_v21 = vpop.f32.mrf.mxu2 }
 0x8b9   :  { %v3150_v31 = vadd.f32 %v3149_v21, %v3126_v28 }
 0x8ba   :  { %v3419_v40 = vpop.f32.mrf.mxu3 }
 0x8bb   :  { %v3206_v62 = vadd.f32 %v3201_v49, %v3150_v31 }
 0x8c0   :  { %v3151_v12 = vpop.f32.mrf.mxu2 }
 0x8c1   :  { %v3152_v57 = vadd.f32 %v3151_v12, %v3128_v45 }
 0x8c2   :  { %v3525_v29 = vpop.f32.mrf.mxu3 }
 0x8c3   :  { %v3207_v50 = vadd.f32 %v3203_v59, %v3152_v57 }
 0x8c8   :  { %v3255_v63 = vpop.f32.mrf.mxu2 }
 0x8c9   :  { %v3260_v56 = vadd.f32 %v3255_v63, %v3206_v62 }
 0x8ca   :  { %v3527_v35 = vpop.f32.mrf.mxu3 }
 0x8cb   :  { %v3314_v15 = vadd.f32 %v3309_v38, %v3260_v56 }
 0x8d0   :  { %v3257_v51 = vpop.f32.mrf.mxu2 }
 0x8d1   :  { %v3261_v53 = vadd.f32 %v3257_v51, %v3207_v50 }
 0x8d3   :  { %v3315_v25 = vadd.f32 %v3311_v11, %v3261_v53 }
 0x8d8   :  { %v3363_v23 = vpop.f32.mrf.mxu2 }
 0x8d9   :  { %v3368_v54 = vadd.f32 %v3363_v23, %v3314_v15 }
 0x8db   :  { %v3422_v0 = vadd.f32 %v3417_v44, %v3368_v54 }
 0x8e0   :  { %v3365_v2 = vpop.f32.mrf.mxu2 }
 0x8e1   :  { %v3369_v9 = vadd.f32 %v3365_v2, %v3315_v25 }
 0x8e3   :  { %v3423_v13 = vadd.f32 %v3419_v40, %v3369_v9 }
 0x8e8   :  { %v3471_v46 = vpop.f32.mrf.mxu2 }
 0x8e9   :  { %v3476_v60 = vadd.f32 %v3471_v46, %v3422_v0 }
 0x8eb   :  { %v3530_v20 = vadd.f32 %v3525_v29, %v3476_v60 }
 0x8ed   :  { %v3536_v36 = vadd.f32 %v4330_v1, %v3530_v20 }
 0x8ef   :  { %v3538_v3 = vmax.f32 %v3536_v36, 0.0 }
 0x8f0   :  { %v3473_v17 = vpop.f32.mrf.mxu2 }
 0x8f1   :  { %v3477_v43 = vadd.f32 %v3473_v17, %v3423_v13  ;;  %v3541_v52 = vsel %vm3540_vm5, %v3538_v3, 0.0 }
 0x8f3   :  { %v3531_v8 = vadd.f32 %v3527_v35, %v3477_v43 }
 0x8f5   :  { %v3537_v27 = vadd.f32 %v4330_v1, %v3531_v8 }
 0x8f7   :  { %v3539_v22 = vmax.f32 %v3537_v27, 0.0 }
 0x8f9   :  { %v3542_v58 = vsel %vm3540_vm5, %v3539_v22, 0.0 }
 0x8fa   :  { %v3543_v5 = vadd.f32 %v3542_v58, %v3541_v52 }
 0x8fc   :  { %v3544_v6 = vrot.slane %v3543_v5, 4 }
 0x8fe   :  { %v3545_v42 = vadd.f32 %v3544_v6, %v3543_v5 }
 0x900   :  { %v3546_v24 = vrot.slane %v3545_v42, 2 }
 0x902   :  { %v3547_v33 = vadd.f32 %v3546_v24, %v3545_v42 }
 0x904   :  { %v3548_v7 = vrot.slane %v3547_v33, 1 }
 0x906   :  { %v3549_v61 = vadd.f32 %v3548_v7, %v3547_v33 }
 0x908   :  { %v3557_v14 = vmul.f32 %v3556_v47, %v3549_v61 }
 0x90a   :  { %3559 = vst.msk [vmem:[#allocation2] sm:$0x1] %vm3558_vm7, %v3557_v14 }
 0x90b   :  { %3570 = dma.vmem_to_hbm [thread:$0]  %s3566_s0, 16, %s3568_s14, [#allocation3]  }
 0x90c   :  { %4375 = dma.done.wait [#allocation3], 16  }
 0x90d   :  { %4376 = vsyncadd [#allocation3], 4294967280 }
 0x90e   :  { %3575 = vsyncpa [#allocation3], 1 }

</bundles_post_ra>
